<compile_context>
chip_gen: v7x
topology: tpu7x:2x2x1
jax: 0.10.0
libtpu: 0.0.40
codegen_flags: <defaults>
</compile_context>

<pallas_src>
import numpy as np
import jax
import jax.numpy as jnp
from jax.experimental import pallas as pl
from jax.experimental.pallas import tpu as pltpu


# ----------------------------------------------------------------------------------
# L-tile selection: full L for short signals, else a multiple of 128 that divides L.
# ----------------------------------------------------------------------------------
def _choose_tile(L, tl_max=512):
    if L <= tl_max or L % 128 != 0:
        return L
    tl = (tl_max // 128) * 128
    while tl > 0:
        if L % tl == 0:
            return tl
        tl -= 128
    return L


# ----------------------------------------------------------------------------------
# Fused Pallas kernel: all kernel sizes, one (batch, L-tile) per grid step.
# branch_meta: list of (K, off0) in output order; off0 aligns kernel K inside Kmax.
# ----------------------------------------------------------------------------------
def _make_fused_kernel(branch_meta, oa, ob, oc, C, TL, num_t, Kmax, md):
    O = oa + ob + oc
    n_ks = len(branch_meta)
    W = TL + Kmax - 1                       # haloed window width for one L-tile
    # Prefix-sum snapshots are only needed at these window boundaries.
    bounds = sorted({off0 for _, off0 in branch_meta}
                    | {off0 + K for K, off0 in branch_meta})

    def kernel(x_ref, wa_ref, bias_ref, *rest):
        per = rest[:5 * n_ks]
        z_ref = rest[5 * n_ks]
        coef_ref = rest[5 * n_ks + 1]

        # Haloed window of the shared zero-padded signal (resident in VMEM across t).
        if num_t == 1:
            xh = x_ref[0, :, :W]                            # static slice (W == Lp)
        else:
            start = pl.program_id(1) * TL
            if TL % 128 == 0:
                start = pl.multiple_of(start, 128)
            xh = x_ref[0, :, pl.ds(start, W)]

        # Sliding-window slabs built ONCE at the largest kernel width; every branch
        # (statistics + all matmul operands) reuses them.
        slabs = [xh[:, k:k + TL] for k in range(Kmax)]      # f32 (C, TL) each

        # Prefix sums of (x, k*x, x^2) snapshotted at the needed boundaries only —
        # shares the moment arithmetic across the overlapping windows of the three
        # kernel sizes instead of re-summing each one.
        zero = jnp.zeros((C, TL), jnp.float32)
        acc0, acc1, acc2 = zero, zero, zero
        snap = {}
        for k in range(Kmax):
            if k in bounds:
                snap[k] = (acc0, acc1, acc2)
            xs = slabs[k]
            acc0 = acc0 + xs
            if k:
                acc1 = acc1 + float(k) * xs
            acc2 = acc2 + xs * xs
        if Kmax in bounds:
            snap[Kmax] = (acc0, acc1, acc2)

        # Branch A of ALL kernel sizes: one MXU dot against the shared im2col slab
        # (row layout k*C + c); per-kernel-size weights were zero-padded to Kmax.
        col_full = jnp.concatenate(slabs, axis=0).astype(md)        # (Kmax*C, TL)
        za_all = jnp.dot(wa_ref[...], col_full, preferred_element_type=jnp.float32)

        bias = bias_ref[...]                                        # (n_ks*O, 1) f32

        for j, (K, off0) in enumerate(branch_meta):
            wb, wc, swb, swc, swcl = per[5 * j:5 * j + 5]
            s, e = off0, off0 + K
            fK = float(K)
            inv_K = 1.0 / fK
            sqrtK = float(np.sqrt(K))
            lin_std2 = (K * K - 1) / 12.0
            inv_lin_std2 = 1.0 / lin_std2
            lin_mean = (K - 1) / 2.0

            a0e, a1e, a2e = snap[e]
            if s == 0:
                s0, s1, s2 = a0e, a1e, a2e
            else:
                a0s, a1s, a2s = snap[s]
                s0, s1, s2 = a0e - a0s, a1e - a1s, a2e - a2s

            mean = s0 * inv_K
            var = jnp.maximum(s2 * inv_K - mean * mean, 0.0)
            norms = jnp.sqrt(var) * sqrtK
            lin = (s1 - float(s) * s0) if s else s1        # window-relative k moment
            lin_coef = (lin * inv_K - lin_mean * mean) * inv_lin_std2
            lin_off = mean - lin_coef * lin_mean
            lin_norms = jnp.sqrt(
                jnp.maximum(fK * (var - lin_coef * lin_coef * lin_std2), 0.0))

            # 1/norms on the EUP; zero where the reference divides by +inf.
            nz = norms > 0.0
            inv_n = jnp.where(nz, pl.reciprocal(jnp.where(nz, norms, 1.0),
                                                approx=True), 0.0)
            lz = lin_norms > 0.0
            inv_l = jnp.where(lz, pl.reciprocal(jnp.where(lz, lin_norms, 1.0),
                                                approx=True), 0.0)

            base = j * O

            # Branch A: already in the fused dot above; just add bias.
            za = za_all[j * oa:(j + 1) * oa] + bias[base:base + oa]

            # Branch B: per-(c, l) mean removal / std normalisation folded into the
            # operand (slab-wise scaling, single bf16 rounding) plus one small
            # (ob, C) x (C, TL) correction dot.
            col_b = jnp.concatenate(
                [slabs[k] * inv_n for k in range(s, e)], axis=0).astype(md)
            zb = (jnp.dot(wb[...], col_b, preferred_element_type=jnp.float32)
                  - jnp.dot(swb[...], (mean * inv_n).astype(md),
                            preferred_element_type=jnp.float32)
                  + bias[base + oa:base + oa + ob])

            # Branch C: linear-trend removal / normalisation, two correction dots.
            col_c = jnp.concatenate(
                [slabs[k] * inv_l for k in range(s, e)], axis=0).astype(md)
            zc = (jnp.dot(wc[...], col_c, preferred_element_type=jnp.float32)
                  - jnp.dot(swcl[...], (lin_coef * inv_l).astype(md),
                            preferred_element_type=jnp.float32)
                  - jnp.dot(swc[...], (lin_off * inv_l).astype(md),
                            preferred_element_type=jnp.float32)
                  + bias[base + oa + ob:base + O])

            # Direct sub-range stores into the already-concatenated outputs.
            z_ref[0, base:base + oa] = za
            z_ref[0, base + oa:base + oa + ob] = zb
            z_ref[0, base + oa + ob:base + O] = zc

            cb = 5 * j
            coef_ref[0, cb + 0] = norms
            coef_ref[0, cb + 1] = mean
            coef_ref[0, cb + 2] = lin_norms
            coef_ref[0, cb + 3] = lin_coef
            coef_ref[0, cb + 4] = lin_off

    return kernel


# ----------------------------------------------------------------------------------
# Wrapper: shared zero padding + one fused pallas_call for all kernel sizes.
# ----------------------------------------------------------------------------------
def init_inception_params(key, in_channels, out_channels, kernel_sizes):
    params = []
    O = sum(out_channels)
    for i, K in enumerate(kernel_sizes):
        kw, kb = jax.random.split(jax.random.fold_in(key, i))
        weight = jax.random.normal(kw, (O, in_channels, K), dtype=jnp.float32)
        bias = jax.random.normal(kb, (O,), dtype=jnp.float32)
        params.append((weight, bias))
    return params


def inception_inv_conv(x, params, out_channels, *, tile_l=None,
                       matmul_dtype=jnp.bfloat16):
    B, C, L = x.shape
    oa, ob, oc = out_channels
    # TODO(synk): zero-sized output-channel branches (out_channels entry == 0) not supported.
    assert oa > 0 and ob > 0 and oc > 0
    O = oa + ob + oc
    n_ks = len(params)
    md = matmul_dtype

    Ks = [int(w.shape[-1]) for w, _ in params]
    assert all(K % 2 == 1 for K in Ks), "odd kernel sizes expected (same-length output)"
    Kmax = max(Ks)
    pad_max = Kmax // 2
    # Pad once to the largest kernel's halo; every kernel size reuses this array.
    xpad = jnp.pad(x, ((0, 0), (0, 0), (pad_max, pad_max)))
    Lp = xpad.shape[-1]

    TL = tile_l if tile_l is not None else _choose_tile(L)
    assert L % TL == 0
    num_t = L // TL

    branch_meta = []
    wa_rows, bias_rows = [], []
    per_branch_ops, per_branch_specs = [], []
    for (weight, bias), K in zip(params, Ks):
        O_w, Cw, Kw = weight.shape
        assert Cw == C and Kw == K and O_w == O
        off0 = pad_max - K // 2
        branch_meta.append((K, off0))
        lin_op = jnp.arange(K, dtype=jnp.float32)
        # Flattened weights, column index k*C + c to match the in-kernel im2col layout.
        w_kc = jnp.transpose(weight, (0, 2, 1)).reshape(O, K * C)
        # Branch-A weights zero-padded to the shared Kmax window (one fused MXU dot).
        wa_pad = jnp.pad(w_kc[:oa].reshape(oa, K, C),
                         ((0, 0), (off0, Kmax - K - off0), (0, 0))).reshape(oa, Kmax * C)
        wa_rows.append(wa_pad)
        bias_rows.append(bias.reshape(O, 1))
        wb = w_kc[oa:oa + ob].astype(md)
        wc = w_kc[oa + ob:].astype(md)
        swb = jnp.sum(weight[oa:oa + ob], axis=-1).astype(md)                   # (ob, C)
        swc = jnp.sum(weight[oa + ob:], axis=-1).astype(md)                     # (oc, C)
        swcl = jnp.sum(weight[oa + ob:] * lin_op[None, None, :], axis=-1).astype(md)
        per_branch_ops += [wb, wc, swb, swc, swcl]
        per_branch_specs += [
            pl.BlockSpec((ob, K * C), lambda b, t: (0, 0)),
            pl.BlockSpec((oc, K * C), lambda b, t: (0, 0)),
            pl.BlockSpec((ob, C), lambda b, t: (0, 0)),
            pl.BlockSpec((oc, C), lambda b, t: (0, 0)),
            pl.BlockSpec((oc, C), lambda b, t: (0, 0)),
        ]
    wa_all = jnp.concatenate(wa_rows, axis=0).astype(md)            # (n_ks*oa, Kmax*C)
    bias_all = jnp.concatenate(bias_rows, axis=0).astype(jnp.float32)  # (n_ks*O, 1)

    kernel = _make_fused_kernel(branch_meta, oa, ob, oc, C, TL, num_t, Kmax, md)
    z, coef = pl.pallas_call(
        kernel,
        out_shape=(jax.ShapeDtypeStruct((B, n_ks * O, L), jnp.float32),
                   jax.ShapeDtypeStruct((B, n_ks * 5, C, L), jnp.float32)),
        grid=(B, num_t),
        in_specs=[
            # Full padded row per batch element; same block across the t axis, so it
            # is DMA'd once per b and stays resident while the L-tiles are computed.
            pl.BlockSpec((1, C, Lp), lambda b, t: (b, 0, 0)),
            pl.BlockSpec((n_ks * oa, Kmax * C), lambda b, t: (0, 0)),
            pl.BlockSpec((n_ks * O, 1), lambda b, t: (0, 0)),
        ] + per_branch_specs,
        out_specs=(
            pl.BlockSpec((1, n_ks * O, TL), lambda b, t: (b, 0, t)),
            pl.BlockSpec((1, n_ks * 5, C, TL), lambda b, t: (b, 0, 0, t)),
        ),
        compiler_params=pltpu.CompilerParams(
            dimension_semantics=("parallel", "parallel"),
            vmem_limit_bytes=48 * 1024 * 1024),
    )(xpad, wa_all, bias_all, *per_branch_ops)
    # (B, n_ks*5, C, L) -> (B, n_ks, 5, C, L): contiguous split, matches the module.
    coef_matrix = coef.reshape(B, n_ks, 5, C, L)
    return z, coef_matrix


# ----------------------------------------------------------------------------------
# Pure-numpy reference (direct re-implementation of the PyTorch math) for validation.
# Correlation operands are rounded to the kernel's matmul dtype so the Z check
# compares like with like; the window statistics (coef) stay full precision.
# ----------------------------------------------------------------------------------
def _round_to(a, dtype):
    return np.asarray(jnp.asarray(a).astype(dtype).astype(jnp.float32))


def _ref_invconv(x, weight, bias, out_channels, matmul_dtype):
    B, C, L = x.shape
    O, _, K = weight.shape
    oa, ob, oc = out_channels
    pad = K // 2
    xpad = np.pad(x, ((0, 0), (0, 0), (pad, pad)))
    win = np.stack([xpad[:, :, t:t + K] for t in range(L)], axis=2)      # (B,C,L,K)
    mean = win.mean(-1)
    var = np.maximum((win ** 2).mean(-1) - mean ** 2, 0.0)
    stds = np.sqrt(var)
    norms = stds * np.sqrt(K)
    lin_std2 = (K * K - 1) / 12.0
    lin_mean = (K - 1) / 2.0
    lin = (win * np.arange(K)).sum(-1)
    lin_coef = (lin / K - lin_mean * mean) / lin_std2
    lin_off = mean - lin_coef * lin_mean
    lin_norms = np.sqrt(np.maximum(K * (var - lin_coef ** 2 * lin_std2), 0.0))
    win_q = _round_to(win, matmul_dtype)
    w_q = _round_to(weight, matmul_dtype)
    prod = np.einsum('bclk,ock->bocl', win_q, w_q)
    Pa, Pb, Pc = prod[:, :oa], prod[:, oa:oa + ob], prod[:, oa + ob:]
    norms_s = np.where(norms != 0.0, norms, np.inf)
    lnorms_s = np.where(lin_norms != 0.0, lin_norms, np.inf)
    za = Pa.sum(2) + bias[:oa].reshape(1, oa, 1)
    pbn = (Pb - weight[oa:oa + ob].sum(-1)[None, :, :, None] * mean[:, None]) / norms_s[:, None]
    zb = pbn.sum(2) + bias[oa:oa + ob].reshape(1, ob, 1)
    pcn = (Pc - ((weight[oa + ob:] * np.arange(K)).sum(-1)[None, :, :, None] * lin_coef[:, None]
                 + weight[oa + ob:].sum(-1)[None, :, :, None] * lin_off[:, None])) / lnorms_s[:, None]
    zc = pcn.sum(2) + bias[oa + ob:].reshape(1, oc, 1)
    z = np.concatenate([za, zb, zc], axis=1)
    coef = np.stack([norms, mean, lin_norms, lin_coef, lin_off], axis=1)  # (B,5,C,L)
    return z, coef


def _ref_inception(x, params, out_channels, matmul_dtype):
    Zs, coefs = [], []
    for w, b in params:
        z, c = _ref_invconv(x, w, b, out_channels, matmul_dtype)
        Zs.append(z)
        coefs.append(c[:, None])                             # (B,1,5,C,L)
    return np.concatenate(Zs, axis=1), np.concatenate(coefs, axis=1)


# ----------------------------------------------------------------------------------
if __name__ == "__main__":
    B, C, L = 2, 4, 16
    out_channels = (2, 2, 2)
    kernel_sizes = [9, 19, 39]

    key = jax.random.PRNGKey(0)
    kx, kp = jax.random.split(key)
    x = jax.random.normal(kx, (B, C, L), dtype=jnp.float32)
    params = init_inception_params(kp, C, out_channels, kernel_sizes)

    Z, coef = inception_inv_conv(x, params, out_channels)
    Z = jax.block_until_ready(Z)
    coef = jax.block_until_ready(coef)

    x_np = np.asarray(x)
    params_np = [(np.asarray(w), np.asarray(b)) for w, b in params]
    Z_ref, coef_ref = _ref_inception(x_np, params_np, out_channels, jnp.bfloat16)

    # Z goes through bf16 MXU operands + approx reciprocal -> relaxed tolerance;
    # coef (window statistics) is computed fully in f32 -> tight tolerance.
    np.testing.assert_allclose(np.asarray(Z), Z_ref, rtol=5e-2, atol=1e-1)
    np.testing.assert_allclose(np.asarray(coef), coef_ref, rtol=1e-3, atol=1e-4)

    print("KERNEL_OK")
</pallas_src>

<mosaic_0001>
module attributes {stable_mosaic.version = 11 : i64} {
  func.func @kernel(%arg0: i32, %arg1: i32, %arg2: memref<1x4x54xf32, #tpu.memory_space<vmem>>, %arg3: memref<6x156xbf16, #tpu.memory_space<vmem>>, %arg4: memref<18x1xf32, #tpu.memory_space<vmem>>, %arg5: memref<2x36xbf16, #tpu.memory_space<vmem>>, %arg6: memref<2x36xbf16, #tpu.memory_space<vmem>>, %arg7: memref<2x4xbf16, #tpu.memory_space<vmem>>, %arg8: memref<2x4xbf16, #tpu.memory_space<vmem>>, %arg9: memref<2x4xbf16, #tpu.memory_space<vmem>>, %arg10: memref<2x76xbf16, #tpu.memory_space<vmem>>, %arg11: memref<2x76xbf16, #tpu.memory_space<vmem>>, %arg12: memref<2x4xbf16, #tpu.memory_space<vmem>>, %arg13: memref<2x4xbf16, #tpu.memory_space<vmem>>, %arg14: memref<2x4xbf16, #tpu.memory_space<vmem>>, %arg15: memref<2x156xbf16, #tpu.memory_space<vmem>>, %arg16: memref<2x156xbf16, #tpu.memory_space<vmem>>, %arg17: memref<2x4xbf16, #tpu.memory_space<vmem>>, %arg18: memref<2x4xbf16, #tpu.memory_space<vmem>>, %arg19: memref<2x4xbf16, #tpu.memory_space<vmem>>, %arg20: memref<1x18x16xf32, #tpu.memory_space<vmem>>, %arg21: memref<1x15x4x16xf32, #tpu.memory_space<vmem>>) attributes {dimension_semantics = [#tpu.dimension_semantics<parallel>, #tpu.dimension_semantics<parallel>], iteration_bounds = array<i64: 2, 1>, scalar_prefetch = 0 : i64, scratch_operands = 0 : i64, tpu.core_type = #tpu.core_type<tc>, window_params = [{transform_indices = @transform_0, window_bounds = array<i64: 1, 4, 54>}, {pipeline_mode = #tpu.pipeline_mode<synchronous>, transform_indices = @transform_1, window_bounds = array<i64: 6, 156>}, {pipeline_mode = #tpu.pipeline_mode<synchronous>, transform_indices = @transform_2, window_bounds = array<i64: 18, 1>}, {pipeline_mode = #tpu.pipeline_mode<synchronous>, transform_indices = @transform_3, window_bounds = array<i64: 2, 36>}, {pipeline_mode = #tpu.pipeline_mode<synchronous>, transform_indices = @transform_4, window_bounds = array<i64: 2, 36>}, {pipeline_mode = #tpu.pipeline_mode<synchronous>, transform_indices = @transform_5, window_bounds = array<i64: 2, 4>}, {pipeline_mode = #tpu.pipeline_mode<synchronous>, transform_indices = @transform_6, window_bounds = array<i64: 2, 4>}, {pipeline_mode = #tpu.pipeline_mode<synchronous>, transform_indices = @transform_7, window_bounds = array<i64: 2, 4>}, {pipeline_mode = #tpu.pipeline_mode<synchronous>, transform_indices = @transform_8, window_bounds = array<i64: 2, 76>}, {pipeline_mode = #tpu.pipeline_mode<synchronous>, transform_indices = @transform_9, window_bounds = array<i64: 2, 76>}, {pipeline_mode = #tpu.pipeline_mode<synchronous>, transform_indices = @transform_10, window_bounds = array<i64: 2, 4>}, {pipeline_mode = #tpu.pipeline_mode<synchronous>, transform_indices = @transform_11, window_bounds = array<i64: 2, 4>}, {pipeline_mode = #tpu.pipeline_mode<synchronous>, transform_indices = @transform_12, window_bounds = array<i64: 2, 4>}, {pipeline_mode = #tpu.pipeline_mode<synchronous>, transform_indices = @transform_13, window_bounds = array<i64: 2, 156>}, {pipeline_mode = #tpu.pipeline_mode<synchronous>, transform_indices = @transform_14, window_bounds = array<i64: 2, 156>}, {pipeline_mode = #tpu.pipeline_mode<synchronous>, transform_indices = @transform_15, window_bounds = array<i64: 2, 4>}, {pipeline_mode = #tpu.pipeline_mode<synchronous>, transform_indices = @transform_16, window_bounds = array<i64: 2, 4>}, {pipeline_mode = #tpu.pipeline_mode<synchronous>, transform_indices = @transform_17, window_bounds = array<i64: 2, 4>}, {transform_indices = @transform_18, window_bounds = array<i64: 1, 18, 16>}, {transform_indices = @transform_19, window_bounds = array<i64: 1, 15, 4, 16>}]} {
    %c0 = arith.constant 0 : index
    %c0_0 = arith.constant 0 : index
    %c0_1 = arith.constant 0 : index
    %0 = vector.load %arg2[%c0, %c0_0, %c0_1] : memref<1x4x54xf32, #tpu.memory_space<vmem>>, vector<1x4x54xf32>
    %1 = vector.shape_cast %0 : vector<1x4x54xf32> to vector<4x54xf32>
    %2 = vector.extract_strided_slice %1 {offsets = [0, 0], sizes = [4, 16], strides = [1, 1]} : vector<4x54xf32> to vector<4x16xf32>
    %3 = vector.extract_strided_slice %1 {offsets = [0, 1], sizes = [4, 16], strides = [1, 1]} : vector<4x54xf32> to vector<4x16xf32>
    %4 = vector.extract_strided_slice %1 {offsets = [0, 2], sizes = [4, 16], strides = [1, 1]} : vector<4x54xf32> to vector<4x16xf32>
    %5 = vector.extract_strided_slice %1 {offsets = [0, 3], sizes = [4, 16], strides = [1, 1]} : vector<4x54xf32> to vector<4x16xf32>
    %6 = vector.extract_strided_slice %1 {offsets = [0, 4], sizes = [4, 16], strides = [1, 1]} : vector<4x54xf32> to vector<4x16xf32>
    %7 = vector.extract_strided_slice %1 {offsets = [0, 5], sizes = [4, 16], strides = [1, 1]} : vector<4x54xf32> to vector<4x16xf32>
    %8 = vector.extract_strided_slice %1 {offsets = [0, 6], sizes = [4, 16], strides = [1, 1]} : vector<4x54xf32> to vector<4x16xf32>
    %9 = vector.extract_strided_slice %1 {offsets = [0, 7], sizes = [4, 16], strides = [1, 1]} : vector<4x54xf32> to vector<4x16xf32>
    %10 = vector.extract_strided_slice %1 {offsets = [0, 8], sizes = [4, 16], strides = [1, 1]} : vector<4x54xf32> to vector<4x16xf32>
    %11 = vector.extract_strided_slice %1 {offsets = [0, 9], sizes = [4, 16], strides = [1, 1]} : vector<4x54xf32> to vector<4x16xf32>
    %12 = vector.extract_strided_slice %1 {offsets = [0, 10], sizes = [4, 16], strides = [1, 1]} : vector<4x54xf32> to vector<4x16xf32>
    %13 = vector.extract_strided_slice %1 {offsets = [0, 11], sizes = [4, 16], strides = [1, 1]} : vector<4x54xf32> to vector<4x16xf32>
    %14 = vector.extract_strided_slice %1 {offsets = [0, 12], sizes = [4, 16], strides = [1, 1]} : vector<4x54xf32> to vector<4x16xf32>
    %15 = vector.extract_strided_slice %1 {offsets = [0, 13], sizes = [4, 16], strides = [1, 1]} : vector<4x54xf32> to vector<4x16xf32>
    %16 = vector.extract_strided_slice %1 {offsets = [0, 14], sizes = [4, 16], strides = [1, 1]} : vector<4x54xf32> to vector<4x16xf32>
    %17 = vector.extract_strided_slice %1 {offsets = [0, 15], sizes = [4, 16], strides = [1, 1]} : vector<4x54xf32> to vector<4x16xf32>
    %18 = vector.extract_strided_slice %1 {offsets = [0, 16], sizes = [4, 16], strides = [1, 1]} : vector<4x54xf32> to vector<4x16xf32>
    %19 = vector.extract_strided_slice %1 {offsets = [0, 17], sizes = [4, 16], strides = [1, 1]} : vector<4x54xf32> to vector<4x16xf32>
    %20 = vector.extract_strided_slice %1 {offsets = [0, 18], sizes = [4, 16], strides = [1, 1]} : vector<4x54xf32> to vector<4x16xf32>
    %21 = vector.extract_strided_slice %1 {offsets = [0, 19], sizes = [4, 16], strides = [1, 1]} : vector<4x54xf32> to vector<4x16xf32>
    %22 = vector.extract_strided_slice %1 {offsets = [0, 20], sizes = [4, 16], strides = [1, 1]} : vector<4x54xf32> to vector<4x16xf32>
    %23 = vector.extract_strided_slice %1 {offsets = [0, 21], sizes = [4, 16], strides = [1, 1]} : vector<4x54xf32> to vector<4x16xf32>
    %24 = vector.extract_strided_slice %1 {offsets = [0, 22], sizes = [4, 16], strides = [1, 1]} : vector<4x54xf32> to vector<4x16xf32>
    %25 = vector.extract_strided_slice %1 {offsets = [0, 23], sizes = [4, 16], strides = [1, 1]} : vector<4x54xf32> to vector<4x16xf32>
    %26 = vector.extract_strided_slice %1 {offsets = [0, 24], sizes = [4, 16], strides = [1, 1]} : vector<4x54xf32> to vector<4x16xf32>
    %27 = vector.extract_strided_slice %1 {offsets = [0, 25], sizes = [4, 16], strides = [1, 1]} : vector<4x54xf32> to vector<4x16xf32>
    %28 = vector.extract_strided_slice %1 {offsets = [0, 26], sizes = [4, 16], strides = [1, 1]} : vector<4x54xf32> to vector<4x16xf32>
    %29 = vector.extract_strided_slice %1 {offsets = [0, 27], sizes = [4, 16], strides = [1, 1]} : vector<4x54xf32> to vector<4x16xf32>
    %30 = vector.extract_strided_slice %1 {offsets = [0, 28], sizes = [4, 16], strides = [1, 1]} : vector<4x54xf32> to vector<4x16xf32>
    %31 = vector.extract_strided_slice %1 {offsets = [0, 29], sizes = [4, 16], strides = [1, 1]} : vector<4x54xf32> to vector<4x16xf32>
    %32 = vector.extract_strided_slice %1 {offsets = [0, 30], sizes = [4, 16], strides = [1, 1]} : vector<4x54xf32> to vector<4x16xf32>
    %33 = vector.extract_strided_slice %1 {offsets = [0, 31], sizes = [4, 16], strides = [1, 1]} : vector<4x54xf32> to vector<4x16xf32>
    %34 = vector.extract_strided_slice %1 {offsets = [0, 32], sizes = [4, 16], strides = [1, 1]} : vector<4x54xf32> to vector<4x16xf32>
    %35 = vector.extract_strided_slice %1 {offsets = [0, 33], sizes = [4, 16], strides = [1, 1]} : vector<4x54xf32> to vector<4x16xf32>
    %36 = vector.extract_strided_slice %1 {offsets = [0, 34], sizes = [4, 16], strides = [1, 1]} : vector<4x54xf32> to vector<4x16xf32>
    %37 = vector.extract_strided_slice %1 {offsets = [0, 35], sizes = [4, 16], strides = [1, 1]} : vector<4x54xf32> to vector<4x16xf32>
    %38 = vector.extract_strided_slice %1 {offsets = [0, 36], sizes = [4, 16], strides = [1, 1]} : vector<4x54xf32> to vector<4x16xf32>
    %39 = vector.extract_strided_slice %1 {offsets = [0, 37], sizes = [4, 16], strides = [1, 1]} : vector<4x54xf32> to vector<4x16xf32>
    %40 = vector.extract_strided_slice %1 {offsets = [0, 38], sizes = [4, 16], strides = [1, 1]} : vector<4x54xf32> to vector<4x16xf32>
    %cst = arith.constant 0.000000e+00 : f32
    %41 = vector.broadcast %cst : f32 to vector<4x16xf32>
    %42 = arith.addf %41, %2 : vector<4x16xf32>
    %43 = arith.mulf %2, %2 : vector<4x16xf32>
    %44 = arith.addf %41, %43 : vector<4x16xf32>
    %45 = arith.addf %42, %3 : vector<4x16xf32>
    %cst_2 = arith.constant 1.000000e+00 : f32
    %46 = vector.broadcast %cst_2 : f32 to vector<4x16xf32>
    %47 = arith.mulf %46, %3 : vector<4x16xf32>
    %48 = arith.addf %41, %47 : vector<4x16xf32>
    %49 = arith.mulf %3, %3 : vector<4x16xf32>
    %50 = arith.addf %44, %49 : vector<4x16xf32>
    %51 = arith.addf %45, %4 : vector<4x16xf32>
    %cst_3 = arith.constant 2.000000e+00 : f32
    %52 = vector.broadcast %cst_3 : f32 to vector<4x16xf32>
    %53 = arith.mulf %52, %4 : vector<4x16xf32>
    %54 = arith.addf %48, %53 : vector<4x16xf32>
    %55 = arith.mulf %4, %4 : vector<4x16xf32>
    %56 = arith.addf %50, %55 : vector<4x16xf32>
    %57 = arith.addf %51, %5 : vector<4x16xf32>
    %cst_4 = arith.constant 3.000000e+00 : f32
    %58 = vector.broadcast %cst_4 : f32 to vector<4x16xf32>
    %59 = arith.mulf %58, %5 : vector<4x16xf32>
    %60 = arith.addf %54, %59 : vector<4x16xf32>
    %61 = arith.mulf %5, %5 : vector<4x16xf32>
    %62 = arith.addf %56, %61 : vector<4x16xf32>
    %63 = arith.addf %57, %6 : vector<4x16xf32>
    %cst_5 = arith.constant 4.000000e+00 : f32
    %64 = vector.broadcast %cst_5 : f32 to vector<4x16xf32>
    %65 = arith.mulf %64, %6 : vector<4x16xf32>
    %66 = arith.addf %60, %65 : vector<4x16xf32>
    %67 = arith.mulf %6, %6 : vector<4x16xf32>
    %68 = arith.addf %62, %67 : vector<4x16xf32>
    %69 = arith.addf %63, %7 : vector<4x16xf32>
    %cst_6 = arith.constant 5.000000e+00 : f32
    %70 = vector.broadcast %cst_6 : f32 to vector<4x16xf32>
    %71 = arith.mulf %70, %7 : vector<4x16xf32>
    %72 = arith.addf %66, %71 : vector<4x16xf32>
    %73 = arith.mulf %7, %7 : vector<4x16xf32>
    %74 = arith.addf %68, %73 : vector<4x16xf32>
    %75 = arith.addf %69, %8 : vector<4x16xf32>
    %cst_7 = arith.constant 6.000000e+00 : f32
    %76 = vector.broadcast %cst_7 : f32 to vector<4x16xf32>
    %77 = arith.mulf %76, %8 : vector<4x16xf32>
    %78 = arith.addf %72, %77 : vector<4x16xf32>
    %79 = arith.mulf %8, %8 : vector<4x16xf32>
    %80 = arith.addf %74, %79 : vector<4x16xf32>
    %81 = arith.addf %75, %9 : vector<4x16xf32>
    %cst_8 = arith.constant 7.000000e+00 : f32
    %82 = vector.broadcast %cst_8 : f32 to vector<4x16xf32>
    %83 = arith.mulf %82, %9 : vector<4x16xf32>
    %84 = arith.addf %78, %83 : vector<4x16xf32>
    %85 = arith.mulf %9, %9 : vector<4x16xf32>
    %86 = arith.addf %80, %85 : vector<4x16xf32>
    %87 = arith.addf %81, %10 : vector<4x16xf32>
    %cst_9 = arith.constant 8.000000e+00 : f32
    %88 = vector.broadcast %cst_9 : f32 to vector<4x16xf32>
    %89 = arith.mulf %88, %10 : vector<4x16xf32>
    %90 = arith.addf %84, %89 : vector<4x16xf32>
    %91 = arith.mulf %10, %10 : vector<4x16xf32>
    %92 = arith.addf %86, %91 : vector<4x16xf32>
    %93 = arith.addf %87, %11 : vector<4x16xf32>
    %cst_10 = arith.constant 9.000000e+00 : f32
    %94 = vector.broadcast %cst_10 : f32 to vector<4x16xf32>
    %95 = arith.mulf %94, %11 : vector<4x16xf32>
    %96 = arith.addf %90, %95 : vector<4x16xf32>
    %97 = arith.mulf %11, %11 : vector<4x16xf32>
    %98 = arith.addf %92, %97 : vector<4x16xf32>
    %99 = arith.addf %93, %12 : vector<4x16xf32>
    %cst_11 = arith.constant 1.000000e+01 : f32
    %100 = vector.broadcast %cst_11 : f32 to vector<4x16xf32>
    %101 = arith.mulf %100, %12 : vector<4x16xf32>
    %102 = arith.addf %96, %101 : vector<4x16xf32>
    %103 = arith.mulf %12, %12 : vector<4x16xf32>
    %104 = arith.addf %98, %103 : vector<4x16xf32>
    %105 = arith.addf %99, %13 : vector<4x16xf32>
    %cst_12 = arith.constant 1.100000e+01 : f32
    %106 = vector.broadcast %cst_12 : f32 to vector<4x16xf32>
    %107 = arith.mulf %106, %13 : vector<4x16xf32>
    %108 = arith.addf %102, %107 : vector<4x16xf32>
    %109 = arith.mulf %13, %13 : vector<4x16xf32>
    %110 = arith.addf %104, %109 : vector<4x16xf32>
    %111 = arith.addf %105, %14 : vector<4x16xf32>
    %cst_13 = arith.constant 1.200000e+01 : f32
    %112 = vector.broadcast %cst_13 : f32 to vector<4x16xf32>
    %113 = arith.mulf %112, %14 : vector<4x16xf32>
    %114 = arith.addf %108, %113 : vector<4x16xf32>
    %115 = arith.mulf %14, %14 : vector<4x16xf32>
    %116 = arith.addf %110, %115 : vector<4x16xf32>
    %117 = arith.addf %111, %15 : vector<4x16xf32>
    %cst_14 = arith.constant 1.300000e+01 : f32
    %118 = vector.broadcast %cst_14 : f32 to vector<4x16xf32>
    %119 = arith.mulf %118, %15 : vector<4x16xf32>
    %120 = arith.addf %114, %119 : vector<4x16xf32>
    %121 = arith.mulf %15, %15 : vector<4x16xf32>
    %122 = arith.addf %116, %121 : vector<4x16xf32>
    %123 = arith.addf %117, %16 : vector<4x16xf32>
    %cst_15 = arith.constant 1.400000e+01 : f32
    %124 = vector.broadcast %cst_15 : f32 to vector<4x16xf32>
    %125 = arith.mulf %124, %16 : vector<4x16xf32>
    %126 = arith.addf %120, %125 : vector<4x16xf32>
    %127 = arith.mulf %16, %16 : vector<4x16xf32>
    %128 = arith.addf %122, %127 : vector<4x16xf32>
    %129 = arith.addf %123, %17 : vector<4x16xf32>
    %cst_16 = arith.constant 1.500000e+01 : f32
    %130 = vector.broadcast %cst_16 : f32 to vector<4x16xf32>
    %131 = arith.mulf %130, %17 : vector<4x16xf32>
    %132 = arith.addf %126, %131 : vector<4x16xf32>
    %133 = arith.mulf %17, %17 : vector<4x16xf32>
    %134 = arith.addf %128, %133 : vector<4x16xf32>
    %135 = arith.addf %129, %18 : vector<4x16xf32>
    %cst_17 = arith.constant 1.600000e+01 : f32
    %136 = vector.broadcast %cst_17 : f32 to vector<4x16xf32>
    %137 = arith.mulf %136, %18 : vector<4x16xf32>
    %138 = arith.addf %132, %137 : vector<4x16xf32>
    %139 = arith.mulf %18, %18 : vector<4x16xf32>
    %140 = arith.addf %134, %139 : vector<4x16xf32>
    %141 = arith.addf %135, %19 : vector<4x16xf32>
    %cst_18 = arith.constant 1.700000e+01 : f32
    %142 = vector.broadcast %cst_18 : f32 to vector<4x16xf32>
    %143 = arith.mulf %142, %19 : vector<4x16xf32>
    %144 = arith.addf %138, %143 : vector<4x16xf32>
    %145 = arith.mulf %19, %19 : vector<4x16xf32>
    %146 = arith.addf %140, %145 : vector<4x16xf32>
    %147 = arith.addf %141, %20 : vector<4x16xf32>
    %cst_19 = arith.constant 1.800000e+01 : f32
    %148 = vector.broadcast %cst_19 : f32 to vector<4x16xf32>
    %149 = arith.mulf %148, %20 : vector<4x16xf32>
    %150 = arith.addf %144, %149 : vector<4x16xf32>
    %151 = arith.mulf %20, %20 : vector<4x16xf32>
    %152 = arith.addf %146, %151 : vector<4x16xf32>
    %153 = arith.addf %147, %21 : vector<4x16xf32>
    %cst_20 = arith.constant 1.900000e+01 : f32
    %154 = vector.broadcast %cst_20 : f32 to vector<4x16xf32>
    %155 = arith.mulf %154, %21 : vector<4x16xf32>
    %156 = arith.addf %150, %155 : vector<4x16xf32>
    %157 = arith.mulf %21, %21 : vector<4x16xf32>
    %158 = arith.addf %152, %157 : vector<4x16xf32>
    %159 = arith.addf %153, %22 : vector<4x16xf32>
    %cst_21 = arith.constant 2.000000e+01 : f32
    %160 = vector.broadcast %cst_21 : f32 to vector<4x16xf32>
    %161 = arith.mulf %160, %22 : vector<4x16xf32>
    %162 = arith.addf %156, %161 : vector<4x16xf32>
    %163 = arith.mulf %22, %22 : vector<4x16xf32>
    %164 = arith.addf %158, %163 : vector<4x16xf32>
    %165 = arith.addf %159, %23 : vector<4x16xf32>
    %cst_22 = arith.constant 2.100000e+01 : f32
    %166 = vector.broadcast %cst_22 : f32 to vector<4x16xf32>
    %167 = arith.mulf %166, %23 : vector<4x16xf32>
    %168 = arith.addf %162, %167 : vector<4x16xf32>
    %169 = arith.mulf %23, %23 : vector<4x16xf32>
    %170 = arith.addf %164, %169 : vector<4x16xf32>
    %171 = arith.addf %165, %24 : vector<4x16xf32>
    %cst_23 = arith.constant 2.200000e+01 : f32
    %172 = vector.broadcast %cst_23 : f32 to vector<4x16xf32>
    %173 = arith.mulf %172, %24 : vector<4x16xf32>
    %174 = arith.addf %168, %173 : vector<4x16xf32>
    %175 = arith.mulf %24, %24 : vector<4x16xf32>
    %176 = arith.addf %170, %175 : vector<4x16xf32>
    %177 = arith.addf %171, %25 : vector<4x16xf32>
    %cst_24 = arith.constant 2.300000e+01 : f32
    %178 = vector.broadcast %cst_24 : f32 to vector<4x16xf32>
    %179 = arith.mulf %178, %25 : vector<4x16xf32>
    %180 = arith.addf %174, %179 : vector<4x16xf32>
    %181 = arith.mulf %25, %25 : vector<4x16xf32>
    %182 = arith.addf %176, %181 : vector<4x16xf32>
    %183 = arith.addf %177, %26 : vector<4x16xf32>
    %cst_25 = arith.constant 2.400000e+01 : f32
    %184 = vector.broadcast %cst_25 : f32 to vector<4x16xf32>
    %185 = arith.mulf %184, %26 : vector<4x16xf32>
    %186 = arith.addf %180, %185 : vector<4x16xf32>
    %187 = arith.mulf %26, %26 : vector<4x16xf32>
    %188 = arith.addf %182, %187 : vector<4x16xf32>
    %189 = arith.addf %183, %27 : vector<4x16xf32>
    %cst_26 = arith.constant 2.500000e+01 : f32
    %190 = vector.broadcast %cst_26 : f32 to vector<4x16xf32>
    %191 = arith.mulf %190, %27 : vector<4x16xf32>
    %192 = arith.addf %186, %191 : vector<4x16xf32>
    %193 = arith.mulf %27, %27 : vector<4x16xf32>
    %194 = arith.addf %188, %193 : vector<4x16xf32>
    %195 = arith.addf %189, %28 : vector<4x16xf32>
    %cst_27 = arith.constant 2.600000e+01 : f32
    %196 = vector.broadcast %cst_27 : f32 to vector<4x16xf32>
    %197 = arith.mulf %196, %28 : vector<4x16xf32>
    %198 = arith.addf %192, %197 : vector<4x16xf32>
    %199 = arith.mulf %28, %28 : vector<4x16xf32>
    %200 = arith.addf %194, %199 : vector<4x16xf32>
    %201 = arith.addf %195, %29 : vector<4x16xf32>
    %cst_28 = arith.constant 2.700000e+01 : f32
    %202 = vector.broadcast %cst_28 : f32 to vector<4x16xf32>
    %203 = arith.mulf %202, %29 : vector<4x16xf32>
    %204 = arith.addf %198, %203 : vector<4x16xf32>
    %205 = arith.mulf %29, %29 : vector<4x16xf32>
    %206 = arith.addf %200, %205 : vector<4x16xf32>
    %207 = arith.addf %201, %30 : vector<4x16xf32>
    %cst_29 = arith.constant 2.800000e+01 : f32
    %208 = vector.broadcast %cst_29 : f32 to vector<4x16xf32>
    %209 = arith.mulf %208, %30 : vector<4x16xf32>
    %210 = arith.addf %204, %209 : vector<4x16xf32>
    %211 = arith.mulf %30, %30 : vector<4x16xf32>
    %212 = arith.addf %206, %211 : vector<4x16xf32>
    %213 = arith.addf %207, %31 : vector<4x16xf32>
    %cst_30 = arith.constant 2.900000e+01 : f32
    %214 = vector.broadcast %cst_30 : f32 to vector<4x16xf32>
    %215 = arith.mulf %214, %31 : vector<4x16xf32>
    %216 = arith.addf %210, %215 : vector<4x16xf32>
    %217 = arith.mulf %31, %31 : vector<4x16xf32>
    %218 = arith.addf %212, %217 : vector<4x16xf32>
    %219 = arith.addf %213, %32 : vector<4x16xf32>
    %cst_31 = arith.constant 3.000000e+01 : f32
    %220 = vector.broadcast %cst_31 : f32 to vector<4x16xf32>
    %221 = arith.mulf %220, %32 : vector<4x16xf32>
    %222 = arith.addf %216, %221 : vector<4x16xf32>
    %223 = arith.mulf %32, %32 : vector<4x16xf32>
    %224 = arith.addf %218, %223 : vector<4x16xf32>
    %225 = arith.addf %219, %33 : vector<4x16xf32>
    %cst_32 = arith.constant 3.100000e+01 : f32
    %226 = vector.broadcast %cst_32 : f32 to vector<4x16xf32>
    %227 = arith.mulf %226, %33 : vector<4x16xf32>
    %228 = arith.addf %222, %227 : vector<4x16xf32>
    %229 = arith.mulf %33, %33 : vector<4x16xf32>
    %230 = arith.addf %224, %229 : vector<4x16xf32>
    %231 = arith.addf %225, %34 : vector<4x16xf32>
    %cst_33 = arith.constant 3.200000e+01 : f32
    %232 = vector.broadcast %cst_33 : f32 to vector<4x16xf32>
    %233 = arith.mulf %232, %34 : vector<4x16xf32>
    %234 = arith.addf %228, %233 : vector<4x16xf32>
    %235 = arith.mulf %34, %34 : vector<4x16xf32>
    %236 = arith.addf %230, %235 : vector<4x16xf32>
    %237 = arith.addf %231, %35 : vector<4x16xf32>
    %cst_34 = arith.constant 3.300000e+01 : f32
    %238 = vector.broadcast %cst_34 : f32 to vector<4x16xf32>
    %239 = arith.mulf %238, %35 : vector<4x16xf32>
    %240 = arith.addf %234, %239 : vector<4x16xf32>
    %241 = arith.mulf %35, %35 : vector<4x16xf32>
    %242 = arith.addf %236, %241 : vector<4x16xf32>
    %243 = arith.addf %237, %36 : vector<4x16xf32>
    %cst_35 = arith.constant 3.400000e+01 : f32
    %244 = vector.broadcast %cst_35 : f32 to vector<4x16xf32>
    %245 = arith.mulf %244, %36 : vector<4x16xf32>
    %246 = arith.addf %240, %245 : vector<4x16xf32>
    %247 = arith.mulf %36, %36 : vector<4x16xf32>
    %248 = arith.addf %242, %247 : vector<4x16xf32>
    %249 = arith.addf %243, %37 : vector<4x16xf32>
    %cst_36 = arith.constant 3.500000e+01 : f32
    %250 = vector.broadcast %cst_36 : f32 to vector<4x16xf32>
    %251 = arith.mulf %250, %37 : vector<4x16xf32>
    %252 = arith.addf %246, %251 : vector<4x16xf32>
    %253 = arith.mulf %37, %37 : vector<4x16xf32>
    %254 = arith.addf %248, %253 : vector<4x16xf32>
    %255 = arith.addf %249, %38 : vector<4x16xf32>
    %cst_37 = arith.constant 3.600000e+01 : f32
    %256 = vector.broadcast %cst_37 : f32 to vector<4x16xf32>
    %257 = arith.mulf %256, %38 : vector<4x16xf32>
    %258 = arith.addf %252, %257 : vector<4x16xf32>
    %259 = arith.mulf %38, %38 : vector<4x16xf32>
    %260 = arith.addf %254, %259 : vector<4x16xf32>
    %261 = arith.addf %255, %39 : vector<4x16xf32>
    %cst_38 = arith.constant 3.700000e+01 : f32
    %262 = vector.broadcast %cst_38 : f32 to vector<4x16xf32>
    %263 = arith.mulf %262, %39 : vector<4x16xf32>
    %264 = arith.addf %258, %263 : vector<4x16xf32>
    %265 = arith.mulf %39, %39 : vector<4x16xf32>
    %266 = arith.addf %260, %265 : vector<4x16xf32>
    %267 = arith.addf %261, %40 : vector<4x16xf32>
    %cst_39 = arith.constant 3.800000e+01 : f32
    %268 = vector.broadcast %cst_39 : f32 to vector<4x16xf32>
    %269 = arith.mulf %268, %40 : vector<4x16xf32>
    %270 = arith.addf %264, %269 : vector<4x16xf32>
    %271 = arith.mulf %40, %40 : vector<4x16xf32>
    %272 = arith.addf %266, %271 : vector<4x16xf32>
    %273 = tpu.concatenate %2, %3, %4, %5, %6, %7, %8, %9, %10, %11, %12, %13, %14, %15, %16, %17 in 0 : vector<4x16xf32>, vector<4x16xf32>, vector<4x16xf32>, vector<4x16xf32>, vector<4x16xf32>, vector<4x16xf32>, vector<4x16xf32>, vector<4x16xf32>, vector<4x16xf32>, vector<4x16xf32>, vector<4x16xf32>, vector<4x16xf32>, vector<4x16xf32>, vector<4x16xf32>, vector<4x16xf32>, vector<4x16xf32> -> vector<64x16xf32>
    %274 = tpu.concatenate %18, %19, %20, %21, %22, %23, %24, %25, %26, %27, %28, %29, %30, %31, %32, %33 in 0 : vector<4x16xf32>, vector<4x16xf32>, vector<4x16xf32>, vector<4x16xf32>, vector<4x16xf32>, vector<4x16xf32>, vector<4x16xf32>, vector<4x16xf32>, vector<4x16xf32>, vector<4x16xf32>, vector<4x16xf32>, vector<4x16xf32>, vector<4x16xf32>, vector<4x16xf32>, vector<4x16xf32>, vector<4x16xf32> -> vector<64x16xf32>
    %275 = tpu.concatenate %34, %35, %36, %37, %38, %39, %40 in 0 : vector<4x16xf32>, vector<4x16xf32>, vector<4x16xf32>, vector<4x16xf32>, vector<4x16xf32>, vector<4x16xf32>, vector<4x16xf32> -> vector<28x16xf32>
    %276 = tpu.concatenate %273, %274, %275 in 0 : vector<64x16xf32>, vector<64x16xf32>, vector<28x16xf32> -> vector<156x16xf32>
    %277 = arith.truncf %276 : vector<156x16xf32> to vector<156x16xbf16>
    %c0_40 = arith.constant 0 : index
    %c0_41 = arith.constant 0 : index
    %278 = vector.load %arg3[%c0_40, %c0_41] : memref<6x156xbf16, #tpu.memory_space<vmem>>, vector<6x156xbf16>
    %cst_42 = arith.constant dense<0.000000e+00> : vector<6x16xf32>
    %279 = tpu.matmul %278, %277, %cst_42 {dimension_numbers = #tpu.dot_dimension_numbers<[1], [0], [0], [1], [0, 0, 1, 1], [], []>} : vector<6x156xbf16>, vector<156x16xbf16>, vector<6x16xf32> -> vector<6x16xf32>
    %c0_43 = arith.constant 0 : index
    %c0_44 = arith.constant 0 : index
    %280 = vector.load %arg4[%c0_43, %c0_44] : memref<18x1xf32, #tpu.memory_space<vmem>>, vector<18x1xf32>
    %281 = arith.subf %177, %123 : vector<4x16xf32>
    %282 = arith.subf %180, %126 : vector<4x16xf32>
    %283 = arith.subf %182, %128 : vector<4x16xf32>
    %cst_45 = arith.constant 0.111111112 : f32
    %284 = vector.broadcast %cst_45 : f32 to vector<4x16xf32>
    %285 = arith.mulf %281, %284 : vector<4x16xf32>
    %cst_46 = arith.constant 0.111111112 : f32
    %286 = vector.broadcast %cst_46 : f32 to vector<4x16xf32>
    %287 = arith.mulf %283, %286 : vector<4x16xf32>
    %288 = arith.mulf %285, %285 : vector<4x16xf32>
    %289 = arith.subf %287, %288 : vector<4x16xf32>
    %cst_47 = arith.constant 0.000000e+00 : f32
    %290 = vector.broadcast %cst_47 : f32 to vector<4x16xf32>
    %291 = arith.maximumf %289, %290 : vector<4x16xf32>
    %292 = math.sqrt %291 : vector<4x16xf32>
    %cst_48 = arith.constant 3.000000e+00 : f32
    %293 = vector.broadcast %cst_48 : f32 to vector<4x16xf32>
    %294 = arith.mulf %292, %293 : vector<4x16xf32>
    %cst_49 = arith.constant 1.500000e+01 : f32
    %295 = vector.broadcast %cst_49 : f32 to vector<4x16xf32>
    %296 = arith.mulf %295, %281 : vector<4x16xf32>
    %297 = arith.subf %282, %296 : vector<4x16xf32>
    %cst_50 = arith.constant 0.111111112 : f32
    %298 = vector.broadcast %cst_50 : f32 to vector<4x16xf32>
    %299 = arith.mulf %297, %298 : vector<4x16xf32>
    %cst_51 = arith.constant 4.000000e+00 : f32
    %300 = vector.broadcast %cst_51 : f32 to vector<4x16xf32>
    %301 = arith.mulf %300, %285 : vector<4x16xf32>
    %302 = arith.subf %299, %301 : vector<4x16xf32>
    %cst_52 = arith.constant 1.500000e-01 : f32
    %303 = vector.broadcast %cst_52 : f32 to vector<4x16xf32>
    %304 = arith.mulf %302, %303 : vector<4x16xf32>
    %cst_53 = arith.constant 4.000000e+00 : f32
    %305 = vector.broadcast %cst_53 : f32 to vector<4x16xf32>
    %306 = arith.mulf %304, %305 : vector<4x16xf32>
    %307 = arith.subf %285, %306 : vector<4x16xf32>
    %308 = arith.mulf %304, %304 : vector<4x16xf32>
    %cst_54 = arith.constant 6.66666651 : f32
    %309 = vector.broadcast %cst_54 : f32 to vector<4x16xf32>
    %310 = arith.mulf %308, %309 : vector<4x16xf32>
    %311 = arith.subf %291, %310 : vector<4x16xf32>
    %cst_55 = arith.constant 9.000000e+00 : f32
    %312 = vector.broadcast %cst_55 : f32 to vector<4x16xf32>
    %313 = arith.mulf %312, %311 : vector<4x16xf32>
    %cst_56 = arith.constant 0.000000e+00 : f32
    %314 = vector.broadcast %cst_56 : f32 to vector<4x16xf32>
    %315 = arith.maximumf %313, %314 : vector<4x16xf32>
    %316 = math.sqrt %315 : vector<4x16xf32>
    %cst_57 = arith.constant 0.000000e+00 : f32
    %317 = vector.broadcast %cst_57 : f32 to vector<4x16xf32>
    %318 = arith.cmpf ogt, %294, %317 : vector<4x16xf32>
    %cst_58 = arith.constant 1.000000e+00 : f32
    %319 = vector.broadcast %cst_58 : f32 to vector<4x16xf32>
    %320 = arith.select %318, %294, %319 : vector<4x16xi1>, vector<4x16xf32>
    %321 = tpu.reciprocal %320 {approx = true} : vector<4x16xf32> -> vector<4x16xf32>
    %cst_59 = arith.constant 0.000000e+00 : f32
    %322 = vector.broadcast %cst_59 : f32 to vector<4x16xf32>
    %323 = arith.select %318, %321, %322 : vector<4x16xi1>, vector<4x16xf32>
    %cst_60 = arith.constant 0.000000e+00 : f32
    %324 = vector.broadcast %cst_60 : f32 to vector<4x16xf32>
    %325 = arith.cmpf ogt, %316, %324 : vector<4x16xf32>
    %cst_61 = arith.constant 1.000000e+00 : f32
    %326 = vector.broadcast %cst_61 : f32 to vector<4x16xf32>
    %327 = arith.select %325, %316, %326 : vector<4x16xi1>, vector<4x16xf32>
    %328 = tpu.reciprocal %327 {approx = true} : vector<4x16xf32> -> vector<4x16xf32>
    %cst_62 = arith.constant 0.000000e+00 : f32
    %329 = vector.broadcast %cst_62 : f32 to vector<4x16xf32>
    %330 = arith.select %325, %328, %329 : vector<4x16xi1>, vector<4x16xf32>
    %331 = vector.extract_strided_slice %279 {offsets = [0, 0], sizes = [2, 16], strides = [1, 1]} : vector<6x16xf32> to vector<2x16xf32>
    %332 = vector.extract_strided_slice %280 {offsets = [0, 0], sizes = [2, 1], strides = [1, 1]} : vector<18x1xf32> to vector<2x1xf32>
    %333 = vector.broadcast %332 : vector<2x1xf32> to vector<2x16xf32>
    %334 = arith.addf %331, %333 : vector<2x16xf32>
    %335 = arith.mulf %17, %323 : vector<4x16xf32>
    %336 = arith.mulf %18, %323 : vector<4x16xf32>
    %337 = arith.mulf %19, %323 : vector<4x16xf32>
    %338 = arith.mulf %20, %323 : vector<4x16xf32>
    %339 = arith.mulf %21, %323 : vector<4x16xf32>
    %340 = arith.mulf %22, %323 : vector<4x16xf32>
    %341 = arith.mulf %23, %323 : vector<4x16xf32>
    %342 = arith.mulf %24, %323 : vector<4x16xf32>
    %343 = arith.mulf %25, %323 : vector<4x16xf32>
    %344 = tpu.concatenate %335, %336, %337, %338, %339, %340, %341, %342, %343 in 0 : vector<4x16xf32>, vector<4x16xf32>, vector<4x16xf32>, vector<4x16xf32>, vector<4x16xf32>, vector<4x16xf32>, vector<4x16xf32>, vector<4x16xf32>, vector<4x16xf32> -> vector<36x16xf32>
    %345 = arith.truncf %344 : vector<36x16xf32> to vector<36x16xbf16>
    %c0_63 = arith.constant 0 : index
    %c0_64 = arith.constant 0 : index
    %346 = vector.load %arg5[%c0_63, %c0_64] : memref<2x36xbf16, #tpu.memory_space<vmem>>, vector<2x36xbf16>
    %cst_65 = arith.constant dense<0.000000e+00> : vector<2x16xf32>
    %347 = tpu.matmul %346, %345, %cst_65 {dimension_numbers = #tpu.dot_dimension_numbers<[1], [0], [0], [1], [0, 0, 1, 1], [], []>} : vector<2x36xbf16>, vector<36x16xbf16>, vector<2x16xf32> -> vector<2x16xf32>
    %c0_66 = arith.constant 0 : index
    %c0_67 = arith.constant 0 : index
    %348 = vector.load %arg7[%c0_66, %c0_67] : memref<2x4xbf16, #tpu.memory_space<vmem>>, vector<2x4xbf16>
    %349 = arith.mulf %285, %323 : vector<4x16xf32>
    %350 = arith.truncf %349 : vector<4x16xf32> to vector<4x16xbf16>
    %cst_68 = arith.constant dense<0.000000e+00> : vector<2x16xf32>
    %351 = tpu.matmul %348, %350, %cst_68 {dimension_numbers = #tpu.dot_dimension_numbers<[1], [0], [0], [1], [0, 0, 1, 1], [], []>} : vector<2x4xbf16>, vector<4x16xbf16>, vector<2x16xf32> -> vector<2x16xf32>
    %352 = arith.subf %347, %351 : vector<2x16xf32>
    %353 = vector.extract_strided_slice %280 {offsets = [2, 0], sizes = [2, 1], strides = [1, 1]} : vector<18x1xf32> to vector<2x1xf32>
    %354 = vector.broadcast %353 : vector<2x1xf32> to vector<2x16xf32>
    %355 = arith.addf %352, %354 : vector<2x16xf32>
    %356 = arith.mulf %17, %330 : vector<4x16xf32>
    %357 = arith.mulf %18, %330 : vector<4x16xf32>
    %358 = arith.mulf %19, %330 : vector<4x16xf32>
    %359 = arith.mulf %20, %330 : vector<4x16xf32>
    %360 = arith.mulf %21, %330 : vector<4x16xf32>
    %361 = arith.mulf %22, %330 : vector<4x16xf32>
    %362 = arith.mulf %23, %330 : vector<4x16xf32>
    %363 = arith.mulf %24, %330 : vector<4x16xf32>
    %364 = arith.mulf %25, %330 : vector<4x16xf32>
    %365 = tpu.concatenate %356, %357, %358, %359, %360, %361, %362, %363, %364 in 0 : vector<4x16xf32>, vector<4x16xf32>, vector<4x16xf32>, vector<4x16xf32>, vector<4x16xf32>, vector<4x16xf32>, vector<4x16xf32>, vector<4x16xf32>, vector<4x16xf32> -> vector<36x16xf32>
    %366 = arith.truncf %365 : vector<36x16xf32> to vector<36x16xbf16>
    %c0_69 = arith.constant 0 : index
    %c0_70 = arith.constant 0 : index
    %367 = vector.load %arg6[%c0_69, %c0_70] : memref<2x36xbf16, #tpu.memory_space<vmem>>, vector<2x36xbf16>
    %cst_71 = arith.constant dense<0.000000e+00> : vector<2x16xf32>
    %368 = tpu.matmul %367, %366, %cst_71 {dimension_numbers = #tpu.dot_dimension_numbers<[1], [0], [0], [1], [0, 0, 1, 1], [], []>} : vector<2x36xbf16>, vector<36x16xbf16>, vector<2x16xf32> -> vector<2x16xf32>
    %c0_72 = arith.constant 0 : index
    %c0_73 = arith.constant 0 : index
    %369 = vector.load %arg9[%c0_72, %c0_73] : memref<2x4xbf16, #tpu.memory_space<vmem>>, vector<2x4xbf16>
    %370 = arith.mulf %304, %330 : vector<4x16xf32>
    %371 = arith.truncf %370 : vector<4x16xf32> to vector<4x16xbf16>
    %cst_74 = arith.constant dense<0.000000e+00> : vector<2x16xf32>
    %372 = tpu.matmul %369, %371, %cst_74 {dimension_numbers = #tpu.dot_dimension_numbers<[1], [0], [0], [1], [0, 0, 1, 1], [], []>} : vector<2x4xbf16>, vector<4x16xbf16>, vector<2x16xf32> -> vector<2x16xf32>
    %373 = arith.subf %368, %372 : vector<2x16xf32>
    %c0_75 = arith.constant 0 : index
    %c0_76 = arith.constant 0 : index
    %374 = vector.load %arg8[%c0_75, %c0_76] : memref<2x4xbf16, #tpu.memory_space<vmem>>, vector<2x4xbf16>
    %375 = arith.mulf %307, %330 : vector<4x16xf32>
    %376 = arith.truncf %375 : vector<4x16xf32> to vector<4x16xbf16>
    %cst_77 = arith.constant dense<0.000000e+00> : vector<2x16xf32>
    %377 = tpu.matmul %374, %376, %cst_77 {dimension_numbers = #tpu.dot_dimension_numbers<[1], [0], [0], [1], [0, 0, 1, 1], [], []>} : vector<2x4xbf16>, vector<4x16xbf16>, vector<2x16xf32> -> vector<2x16xf32>
    %378 = arith.subf %373, %377 : vector<2x16xf32>
    %379 = vector.extract_strided_slice %280 {offsets = [4, 0], sizes = [2, 1], strides = [1, 1]} : vector<18x1xf32> to vector<2x1xf32>
    %380 = vector.broadcast %379 : vector<2x1xf32> to vector<2x16xf32>
    %381 = arith.addf %378, %380 : vector<2x16xf32>
    %c0_78 = arith.constant 0 : index
    %c0_79 = arith.constant 0 : index
    %c0_80 = arith.constant 0 : index
    %382 = vector.load %arg20[%c0_78, %c0_79, %c0_80] : memref<1x18x16xf32, #tpu.memory_space<vmem>>, vector<1x2x16xf32>
    %383 = vector.shape_cast %382 : vector<1x2x16xf32> to vector<2x16xf32>
    %384 = vector.shape_cast %334 : vector<2x16xf32> to vector<1x2x16xf32>
    tpu.vector_store %arg20[%c0_78, %c0_79, %c0_80], %384 {strides = array<i32>} : memref<1x18x16xf32, #tpu.memory_space<vmem>>, vector<1x2x16xf32>,
    %c0_81 = arith.constant 0 : index
    %c2 = arith.constant 2 : index
    %c0_82 = arith.constant 0 : index
    %385 = vector.load %arg20[%c0_81, %c2, %c0_82] : memref<1x18x16xf32, #tpu.memory_space<vmem>>, vector<1x2x16xf32>
    %386 = vector.shape_cast %385 : vector<1x2x16xf32> to vector<2x16xf32>
    %387 = vector.shape_cast %355 : vector<2x16xf32> to vector<1x2x16xf32>
    tpu.vector_store %arg20[%c0_81, %c2, %c0_82], %387 {strides = array<i32>} : memref<1x18x16xf32, #tpu.memory_space<vmem>>, vector<1x2x16xf32>,
    %c0_83 = arith.constant 0 : index
    %c4 = arith.constant 4 : index
    %c0_84 = arith.constant 0 : index
    %388 = vector.load %arg20[%c0_83, %c4, %c0_84] : memref<1x18x16xf32, #tpu.memory_space<vmem>>, vector<1x2x16xf32>
    %389 = vector.shape_cast %388 : vector<1x2x16xf32> to vector<2x16xf32>
    %390 = vector.shape_cast %381 : vector<2x16xf32> to vector<1x2x16xf32>
    tpu.vector_store %arg20[%c0_83, %c4, %c0_84], %390 {strides = array<i32>} : memref<1x18x16xf32, #tpu.memory_space<vmem>>, vector<1x2x16xf32>,
    %c0_85 = arith.constant 0 : index
    %c0_86 = arith.constant 0 : index
    %c0_87 = arith.constant 0 : index
    %c0_88 = arith.constant 0 : index
    %391 = vector.load %arg21[%c0_85, %c0_86, %c0_87, %c0_88] : memref<1x15x4x16xf32, #tpu.memory_space<vmem>>, vector<1x1x4x16xf32>
    %392 = vector.shape_cast %391 : vector<1x1x4x16xf32> to vector<4x16xf32>
    %393 = vector.shape_cast %294 : vector<4x16xf32> to vector<1x1x4x16xf32>
    tpu.vector_store %arg21[%c0_85, %c0_86, %c0_87, %c0_88], %393 {strides = array<i32>} : memref<1x15x4x16xf32, #tpu.memory_space<vmem>>, vector<1x1x4x16xf32>,
    %c0_89 = arith.constant 0 : index
    %c1 = arith.constant 1 : index
    %c0_90 = arith.constant 0 : index
    %c0_91 = arith.constant 0 : index
    %394 = vector.load %arg21[%c0_89, %c1, %c0_90, %c0_91] : memref<1x15x4x16xf32, #tpu.memory_space<vmem>>, vector<1x1x4x16xf32>
    %395 = vector.shape_cast %394 : vector<1x1x4x16xf32> to vector<4x16xf32>
    %396 = vector.shape_cast %285 : vector<4x16xf32> to vector<1x1x4x16xf32>
    tpu.vector_store %arg21[%c0_89, %c1, %c0_90, %c0_91], %396 {strides = array<i32>} : memref<1x15x4x16xf32, #tpu.memory_space<vmem>>, vector<1x1x4x16xf32>,
    %c0_92 = arith.constant 0 : index
    %c2_93 = arith.constant 2 : index
    %c0_94 = arith.constant 0 : index
    %c0_95 = arith.constant 0 : index
    %397 = vector.load %arg21[%c0_92, %c2_93, %c0_94, %c0_95] : memref<1x15x4x16xf32, #tpu.memory_space<vmem>>, vector<1x1x4x16xf32>
    %398 = vector.shape_cast %397 : vector<1x1x4x16xf32> to vector<4x16xf32>
    %399 = vector.shape_cast %316 : vector<4x16xf32> to vector<1x1x4x16xf32>
    tpu.vector_store %arg21[%c0_92, %c2_93, %c0_94, %c0_95], %399 {strides = array<i32>} : memref<1x15x4x16xf32, #tpu.memory_space<vmem>>, vector<1x1x4x16xf32>,
    %c0_96 = arith.constant 0 : index
    %c3 = arith.constant 3 : index
    %c0_97 = arith.constant 0 : index
    %c0_98 = arith.constant 0 : index
    %400 = vector.load %arg21[%c0_96, %c3, %c0_97, %c0_98] : memref<1x15x4x16xf32, #tpu.memory_space<vmem>>, vector<1x1x4x16xf32>
    %401 = vector.shape_cast %400 : vector<1x1x4x16xf32> to vector<4x16xf32>
    %402 = vector.shape_cast %304 : vector<4x16xf32> to vector<1x1x4x16xf32>
    tpu.vector_store %arg21[%c0_96, %c3, %c0_97, %c0_98], %402 {strides = array<i32>} : memref<1x15x4x16xf32, #tpu.memory_space<vmem>>, vector<1x1x4x16xf32>,
    %c0_99 = arith.constant 0 : index
    %c4_100 = arith.constant 4 : index
    %c0_101 = arith.constant 0 : index
    %c0_102 = arith.constant 0 : index
    %403 = vector.load %arg21[%c0_99, %c4_100, %c0_101, %c0_102] : memref<1x15x4x16xf32, #tpu.memory_space<vmem>>, vector<1x1x4x16xf32>
    %404 = vector.shape_cast %403 : vector<1x1x4x16xf32> to vector<4x16xf32>
    %405 = vector.shape_cast %307 : vector<4x16xf32> to vector<1x1x4x16xf32>
    tpu.vector_store %arg21[%c0_99, %c4_100, %c0_101, %c0_102], %405 {strides = array<i32>} : memref<1x15x4x16xf32, #tpu.memory_space<vmem>>, vector<1x1x4x16xf32>,
    %406 = arith.subf %207, %93 : vector<4x16xf32>
    %407 = arith.subf %210, %96 : vector<4x16xf32>
    %408 = arith.subf %212, %98 : vector<4x16xf32>
    %cst_103 = arith.constant 0.0526315793 : f32
    %409 = vector.broadcast %cst_103 : f32 to vector<4x16xf32>
    %410 = arith.mulf %406, %409 : vector<4x16xf32>
    %cst_104 = arith.constant 0.0526315793 : f32
    %411 = vector.broadcast %cst_104 : f32 to vector<4x16xf32>
    %412 = arith.mulf %408, %411 : vector<4x16xf32>
    %413 = arith.mulf %410, %410 : vector<4x16xf32>
    %414 = arith.subf %412, %413 : vector<4x16xf32>
    %cst_105 = arith.constant 0.000000e+00 : f32
    %415 = vector.broadcast %cst_105 : f32 to vector<4x16xf32>
    %416 = arith.maximumf %414, %415 : vector<4x16xf32>
    %417 = math.sqrt %416 : vector<4x16xf32>
    %cst_106 = arith.constant 4.35889912 : f32
    %418 = vector.broadcast %cst_106 : f32 to vector<4x16xf32>
    %419 = arith.mulf %417, %418 : vector<4x16xf32>
    %cst_107 = arith.constant 1.000000e+01 : f32
    %420 = vector.broadcast %cst_107 : f32 to vector<4x16xf32>
    %421 = arith.mulf %420, %406 : vector<4x16xf32>
    %422 = arith.subf %407, %421 : vector<4x16xf32>
    %cst_108 = arith.constant 0.0526315793 : f32
    %423 = vector.broadcast %cst_108 : f32 to vector<4x16xf32>
    %424 = arith.mulf %422, %423 : vector<4x16xf32>
    %cst_109 = arith.constant 9.000000e+00 : f32
    %425 = vector.broadcast %cst_109 : f32 to vector<4x16xf32>
    %426 = arith.mulf %425, %410 : vector<4x16xf32>
    %427 = arith.subf %424, %426 : vector<4x16xf32>
    %cst_110 = arith.constant 0.0333333351 : f32
    %428 = vector.broadcast %cst_110 : f32 to vector<4x16xf32>
    %429 = arith.mulf %427, %428 : vector<4x16xf32>
    %cst_111 = arith.constant 9.000000e+00 : f32
    %430 = vector.broadcast %cst_111 : f32 to vector<4x16xf32>
    %431 = arith.mulf %429, %430 : vector<4x16xf32>
    %432 = arith.subf %410, %431 : vector<4x16xf32>
    %433 = arith.mulf %429, %429 : vector<4x16xf32>
    %cst_112 = arith.constant 3.000000e+01 : f32
    %434 = vector.broadcast %cst_112 : f32 to vector<4x16xf32>
    %435 = arith.mulf %433, %434 : vector<4x16xf32>
    %436 = arith.subf %416, %435 : vector<4x16xf32>
    %cst_113 = arith.constant 1.900000e+01 : f32
    %437 = vector.broadcast %cst_113 : f32 to vector<4x16xf32>
    %438 = arith.mulf %437, %436 : vector<4x16xf32>
    %cst_114 = arith.constant 0.000000e+00 : f32
    %439 = vector.broadcast %cst_114 : f32 to vector<4x16xf32>
    %440 = arith.maximumf %438, %439 : vector<4x16xf32>
    %441 = math.sqrt %440 : vector<4x16xf32>
    %cst_115 = arith.constant 0.000000e+00 : f32
    %442 = vector.broadcast %cst_115 : f32 to vector<4x16xf32>
    %443 = arith.cmpf ogt, %419, %442 : vector<4x16xf32>
    %cst_116 = arith.constant 1.000000e+00 : f32
    %444 = vector.broadcast %cst_116 : f32 to vector<4x16xf32>
    %445 = arith.select %443, %419, %444 : vector<4x16xi1>, vector<4x16xf32>
    %446 = tpu.reciprocal %445 {approx = true} : vector<4x16xf32> -> vector<4x16xf32>
    %cst_117 = arith.constant 0.000000e+00 : f32
    %447 = vector.broadcast %cst_117 : f32 to vector<4x16xf32>
    %448 = arith.select %443, %446, %447 : vector<4x16xi1>, vector<4x16xf32>
    %cst_118 = arith.constant 0.000000e+00 : f32
    %449 = vector.broadcast %cst_118 : f32 to vector<4x16xf32>
    %450 = arith.cmpf ogt, %441, %449 : vector<4x16xf32>
    %cst_119 = arith.constant 1.000000e+00 : f32
    %451 = vector.broadcast %cst_119 : f32 to vector<4x16xf32>
    %452 = arith.select %450, %441, %451 : vector<4x16xi1>, vector<4x16xf32>
    %453 = tpu.reciprocal %452 {approx = true} : vector<4x16xf32> -> vector<4x16xf32>
    %cst_120 = arith.constant 0.000000e+00 : f32
    %454 = vector.broadcast %cst_120 : f32 to vector<4x16xf32>
    %455 = arith.select %450, %453, %454 : vector<4x16xi1>, vector<4x16xf32>
    %456 = vector.extract_strided_slice %279 {offsets = [2, 0], sizes = [2, 16], strides = [1, 1]} : vector<6x16xf32> to vector<2x16xf32>
    %457 = vector.extract_strided_slice %280 {offsets = [6, 0], sizes = [2, 1], strides = [1, 1]} : vector<18x1xf32> to vector<2x1xf32>
    %458 = vector.broadcast %457 : vector<2x1xf32> to vector<2x16xf32>
    %459 = arith.addf %456, %458 : vector<2x16xf32>
    %460 = arith.mulf %12, %448 : vector<4x16xf32>
    %461 = arith.mulf %13, %448 : vector<4x16xf32>
    %462 = arith.mulf %14, %448 : vector<4x16xf32>
    %463 = arith.mulf %15, %448 : vector<4x16xf32>
    %464 = arith.mulf %16, %448 : vector<4x16xf32>
    %465 = arith.mulf %17, %448 : vector<4x16xf32>
    %466 = arith.mulf %18, %448 : vector<4x16xf32>
    %467 = arith.mulf %19, %448 : vector<4x16xf32>
    %468 = arith.mulf %20, %448 : vector<4x16xf32>
    %469 = arith.mulf %21, %448 : vector<4x16xf32>
    %470 = arith.mulf %22, %448 : vector<4x16xf32>
    %471 = arith.mulf %23, %448 : vector<4x16xf32>
    %472 = arith.mulf %24, %448 : vector<4x16xf32>
    %473 = arith.mulf %25, %448 : vector<4x16xf32>
    %474 = arith.mulf %26, %448 : vector<4x16xf32>
    %475 = arith.mulf %27, %448 : vector<4x16xf32>
    %476 = arith.mulf %28, %448 : vector<4x16xf32>
    %477 = arith.mulf %29, %448 : vector<4x16xf32>
    %478 = arith.mulf %30, %448 : vector<4x16xf32>
    %479 = tpu.concatenate %460, %461, %462, %463, %464, %465, %466, %467, %468, %469, %470, %471, %472, %473, %474, %475 in 0 : vector<4x16xf32>, vector<4x16xf32>, vector<4x16xf32>, vector<4x16xf32>, vector<4x16xf32>, vector<4x16xf32>, vector<4x16xf32>, vector<4x16xf32>, vector<4x16xf32>, vector<4x16xf32>, vector<4x16xf32>, vector<4x16xf32>, vector<4x16xf32>, vector<4x16xf32>, vector<4x16xf32>, vector<4x16xf32> -> vector<64x16xf32>
    %480 = tpu.concatenate %476, %477, %478 in 0 : vector<4x16xf32>, vector<4x16xf32>, vector<4x16xf32> -> vector<12x16xf32>
    %481 = tpu.concatenate %479, %480 in 0 : vector<64x16xf32>, vector<12x16xf32> -> vector<76x16xf32>
    %482 = arith.truncf %481 : vector<76x16xf32> to vector<76x16xbf16>
    %c0_121 = arith.constant 0 : index
    %c0_122 = arith.constant 0 : index
    %483 = vector.load %arg10[%c0_121, %c0_122] : memref<2x76xbf16, #tpu.memory_space<vmem>>, vector<2x76xbf16>
    %cst_123 = arith.constant dense<0.000000e+00> : vector<2x16xf32>
    %484 = tpu.matmul %483, %482, %cst_123 {dimension_numbers = #tpu.dot_dimension_numbers<[1], [0], [0], [1], [0, 0, 1, 1], [], []>} : vector<2x76xbf16>, vector<76x16xbf16>, vector<2x16xf32> -> vector<2x16xf32>
    %c0_124 = arith.constant 0 : index
    %c0_125 = arith.constant 0 : index
    %485 = vector.load %arg12[%c0_124, %c0_125] : memref<2x4xbf16, #tpu.memory_space<vmem>>, vector<2x4xbf16>
    %486 = arith.mulf %410, %448 : vector<4x16xf32>
    %487 = arith.truncf %486 : vector<4x16xf32> to vector<4x16xbf16>
    %cst_126 = arith.constant dense<0.000000e+00> : vector<2x16xf32>
    %488 = tpu.matmul %485, %487, %cst_126 {dimension_numbers = #tpu.dot_dimension_numbers<[1], [0], [0], [1], [0, 0, 1, 1], [], []>} : vector<2x4xbf16>, vector<4x16xbf16>, vector<2x16xf32> -> vector<2x16xf32>
    %489 = arith.subf %484, %488 : vector<2x16xf32>
    %490 = vector.extract_strided_slice %280 {offsets = [8, 0], sizes = [2, 1], strides = [1, 1]} : vector<18x1xf32> to vector<2x1xf32>
    %491 = vector.broadcast %490 : vector<2x1xf32> to vector<2x16xf32>
    %492 = arith.addf %489, %491 : vector<2x16xf32>
    %493 = arith.mulf %12, %455 : vector<4x16xf32>
    %494 = arith.mulf %13, %455 : vector<4x16xf32>
    %495 = arith.mulf %14, %455 : vector<4x16xf32>
    %496 = arith.mulf %15, %455 : vector<4x16xf32>
    %497 = arith.mulf %16, %455 : vector<4x16xf32>
    %498 = arith.mulf %17, %455 : vector<4x16xf32>
    %499 = arith.mulf %18, %455 : vector<4x16xf32>
    %500 = arith.mulf %19, %455 : vector<4x16xf32>
    %501 = arith.mulf %20, %455 : vector<4x16xf32>
    %502 = arith.mulf %21, %455 : vector<4x16xf32>
    %503 = arith.mulf %22, %455 : vector<4x16xf32>
    %504 = arith.mulf %23, %455 : vector<4x16xf32>
    %505 = arith.mulf %24, %455 : vector<4x16xf32>
    %506 = arith.mulf %25, %455 : vector<4x16xf32>
    %507 = arith.mulf %26, %455 : vector<4x16xf32>
    %508 = arith.mulf %27, %455 : vector<4x16xf32>
    %509 = arith.mulf %28, %455 : vector<4x16xf32>
    %510 = arith.mulf %29, %455 : vector<4x16xf32>
    %511 = arith.mulf %30, %455 : vector<4x16xf32>
    %512 = tpu.concatenate %493, %494, %495, %496, %497, %498, %499, %500, %501, %502, %503, %504, %505, %506, %507, %508 in 0 : vector<4x16xf32>, vector<4x16xf32>, vector<4x16xf32>, vector<4x16xf32>, vector<4x16xf32>, vector<4x16xf32>, vector<4x16xf32>, vector<4x16xf32>, vector<4x16xf32>, vector<4x16xf32>, vector<4x16xf32>, vector<4x16xf32>, vector<4x16xf32>, vector<4x16xf32>, vector<4x16xf32>, vector<4x16xf32> -> vector<64x16xf32>
    %513 = tpu.concatenate %509, %510, %511 in 0 : vector<4x16xf32>, vector<4x16xf32>, vector<4x16xf32> -> vector<12x16xf32>
    %514 = tpu.concatenate %512, %513 in 0 : vector<64x16xf32>, vector<12x16xf32> -> vector<76x16xf32>
    %515 = arith.truncf %514 : vector<76x16xf32> to vector<76x16xbf16>
    %c0_127 = arith.constant 0 : index
    %c0_128 = arith.constant 0 : index
    %516 = vector.load %arg11[%c0_127, %c0_128] : memref<2x76xbf16, #tpu.memory_space<vmem>>, vector<2x76xbf16>
    %cst_129 = arith.constant dense<0.000000e+00> : vector<2x16xf32>
    %517 = tpu.matmul %516, %515, %cst_129 {dimension_numbers = #tpu.dot_dimension_numbers<[1], [0], [0], [1], [0, 0, 1, 1], [], []>} : vector<2x76xbf16>, vector<76x16xbf16>, vector<2x16xf32> -> vector<2x16xf32>
    %c0_130 = arith.constant 0 : index
    %c0_131 = arith.constant 0 : index
    %518 = vector.load %arg14[%c0_130, %c0_131] : memref<2x4xbf16, #tpu.memory_space<vmem>>, vector<2x4xbf16>
    %519 = arith.mulf %429, %455 : vector<4x16xf32>
    %520 = arith.truncf %519 : vector<4x16xf32> to vector<4x16xbf16>
    %cst_132 = arith.constant dense<0.000000e+00> : vector<2x16xf32>
    %521 = tpu.matmul %518, %520, %cst_132 {dimension_numbers = #tpu.dot_dimension_numbers<[1], [0], [0], [1], [0, 0, 1, 1], [], []>} : vector<2x4xbf16>, vector<4x16xbf16>, vector<2x16xf32> -> vector<2x16xf32>
    %522 = arith.subf %517, %521 : vector<2x16xf32>
    %c0_133 = arith.constant 0 : index
    %c0_134 = arith.constant 0 : index
    %523 = vector.load %arg13[%c0_133, %c0_134] : memref<2x4xbf16, #tpu.memory_space<vmem>>, vector<2x4xbf16>
    %524 = arith.mulf %432, %455 : vector<4x16xf32>
    %525 = arith.truncf %524 : vector<4x16xf32> to vector<4x16xbf16>
    %cst_135 = arith.constant dense<0.000000e+00> : vector<2x16xf32>
    %526 = tpu.matmul %523, %525, %cst_135 {dimension_numbers = #tpu.dot_dimension_numbers<[1], [0], [0], [1], [0, 0, 1, 1], [], []>} : vector<2x4xbf16>, vector<4x16xbf16>, vector<2x16xf32> -> vector<2x16xf32>
    %527 = arith.subf %522, %526 : vector<2x16xf32>
    %528 = vector.extract_strided_slice %280 {offsets = [10, 0], sizes = [2, 1], strides = [1, 1]} : vector<18x1xf32> to vector<2x1xf32>
    %529 = vector.broadcast %528 : vector<2x1xf32> to vector<2x16xf32>
    %530 = arith.addf %527, %529 : vector<2x16xf32>
    %c0_136 = arith.constant 0 : index
    %c6 = arith.constant 6 : index
    %c0_137 = arith.constant 0 : index
    %531 = vector.load %arg20[%c0_136, %c6, %c0_137] : memref<1x18x16xf32, #tpu.memory_space<vmem>>, vector<1x2x16xf32>
    %532 = vector.shape_cast %531 : vector<1x2x16xf32> to vector<2x16xf32>
    %533 = vector.shape_cast %459 : vector<2x16xf32> to vector<1x2x16xf32>
    tpu.vector_store %arg20[%c0_136, %c6, %c0_137], %533 {strides = array<i32>} : memref<1x18x16xf32, #tpu.memory_space<vmem>>, vector<1x2x16xf32>,
    %c0_138 = arith.constant 0 : index
    %c8 = arith.constant 8 : index
    %c0_139 = arith.constant 0 : index
    %534 = vector.load %arg20[%c0_138, %c8, %c0_139] : memref<1x18x16xf32, #tpu.memory_space<vmem>>, vector<1x2x16xf32>
    %535 = vector.shape_cast %534 : vector<1x2x16xf32> to vector<2x16xf32>
    %536 = vector.shape_cast %492 : vector<2x16xf32> to vector<1x2x16xf32>
    tpu.vector_store %arg20[%c0_138, %c8, %c0_139], %536 {strides = array<i32>} : memref<1x18x16xf32, #tpu.memory_space<vmem>>, vector<1x2x16xf32>,
    %c0_140 = arith.constant 0 : index
    %c10 = arith.constant 10 : index
    %c0_141 = arith.constant 0 : index
    %537 = vector.load %arg20[%c0_140, %c10, %c0_141] : memref<1x18x16xf32, #tpu.memory_space<vmem>>, vector<1x2x16xf32>
    %538 = vector.shape_cast %537 : vector<1x2x16xf32> to vector<2x16xf32>
    %539 = vector.shape_cast %530 : vector<2x16xf32> to vector<1x2x16xf32>
    tpu.vector_store %arg20[%c0_140, %c10, %c0_141], %539 {strides = array<i32>} : memref<1x18x16xf32, #tpu.memory_space<vmem>>, vector<1x2x16xf32>,
    %c0_142 = arith.constant 0 : index
    %c5 = arith.constant 5 : index
    %c0_143 = arith.constant 0 : index
    %c0_144 = arith.constant 0 : index
    %540 = vector.load %arg21[%c0_142, %c5, %c0_143, %c0_144] : memref<1x15x4x16xf32, #tpu.memory_space<vmem>>, vector<1x1x4x16xf32>
    %541 = vector.shape_cast %540 : vector<1x1x4x16xf32> to vector<4x16xf32>
    %542 = vector.shape_cast %419 : vector<4x16xf32> to vector<1x1x4x16xf32>
    tpu.vector_store %arg21[%c0_142, %c5, %c0_143, %c0_144], %542 {strides = array<i32>} : memref<1x15x4x16xf32, #tpu.memory_space<vmem>>, vector<1x1x4x16xf32>,
    %c0_145 = arith.constant 0 : index
    %c6_146 = arith.constant 6 : index
    %c0_147 = arith.constant 0 : index
    %c0_148 = arith.constant 0 : index
    %543 = vector.load %arg21[%c0_145, %c6_146, %c0_147, %c0_148] : memref<1x15x4x16xf32, #tpu.memory_space<vmem>>, vector<1x1x4x16xf32>
    %544 = vector.shape_cast %543 : vector<1x1x4x16xf32> to vector<4x16xf32>
    %545 = vector.shape_cast %410 : vector<4x16xf32> to vector<1x1x4x16xf32>
    tpu.vector_store %arg21[%c0_145, %c6_146, %c0_147, %c0_148], %545 {strides = array<i32>} : memref<1x15x4x16xf32, #tpu.memory_space<vmem>>, vector<1x1x4x16xf32>,
    %c0_149 = arith.constant 0 : index
    %c7 = arith.constant 7 : index
    %c0_150 = arith.constant 0 : index
    %c0_151 = arith.constant 0 : index
    %546 = vector.load %arg21[%c0_149, %c7, %c0_150, %c0_151] : memref<1x15x4x16xf32, #tpu.memory_space<vmem>>, vector<1x1x4x16xf32>
    %547 = vector.shape_cast %546 : vector<1x1x4x16xf32> to vector<4x16xf32>
    %548 = vector.shape_cast %441 : vector<4x16xf32> to vector<1x1x4x16xf32>
    tpu.vector_store %arg21[%c0_149, %c7, %c0_150, %c0_151], %548 {strides = array<i32>} : memref<1x15x4x16xf32, #tpu.memory_space<vmem>>, vector<1x1x4x16xf32>,
    %c0_152 = arith.constant 0 : index
    %c8_153 = arith.constant 8 : index
    %c0_154 = arith.constant 0 : index
    %c0_155 = arith.constant 0 : index
    %549 = vector.load %arg21[%c0_152, %c8_153, %c0_154, %c0_155] : memref<1x15x4x16xf32, #tpu.memory_space<vmem>>, vector<1x1x4x16xf32>
    %550 = vector.shape_cast %549 : vector<1x1x4x16xf32> to vector<4x16xf32>
    %551 = vector.shape_cast %429 : vector<4x16xf32> to vector<1x1x4x16xf32>
    tpu.vector_store %arg21[%c0_152, %c8_153, %c0_154, %c0_155], %551 {strides = array<i32>} : memref<1x15x4x16xf32, #tpu.memory_space<vmem>>, vector<1x1x4x16xf32>,
    %c0_156 = arith.constant 0 : index
    %c9 = arith.constant 9 : index
    %c0_157 = arith.constant 0 : index
    %c0_158 = arith.constant 0 : index
    %552 = vector.load %arg21[%c0_156, %c9, %c0_157, %c0_158] : memref<1x15x4x16xf32, #tpu.memory_space<vmem>>, vector<1x1x4x16xf32>
    %553 = vector.shape_cast %552 : vector<1x1x4x16xf32> to vector<4x16xf32>
    %554 = vector.shape_cast %432 : vector<4x16xf32> to vector<1x1x4x16xf32>
    tpu.vector_store %arg21[%c0_156, %c9, %c0_157, %c0_158], %554 {strides = array<i32>} : memref<1x15x4x16xf32, #tpu.memory_space<vmem>>, vector<1x1x4x16xf32>,
    %cst_159 = arith.constant 0.025641026 : f32
    %555 = vector.broadcast %cst_159 : f32 to vector<4x16xf32>
    %556 = arith.mulf %267, %555 : vector<4x16xf32>
    %cst_160 = arith.constant 0.025641026 : f32
    %557 = vector.broadcast %cst_160 : f32 to vector<4x16xf32>
    %558 = arith.mulf %272, %557 : vector<4x16xf32>
    %559 = arith.mulf %556, %556 : vector<4x16xf32>
    %560 = arith.subf %558, %559 : vector<4x16xf32>
    %cst_161 = arith.constant 0.000000e+00 : f32
    %561 = vector.broadcast %cst_161 : f32 to vector<4x16xf32>
    %562 = arith.maximumf %560, %561 : vector<4x16xf32>
    %563 = math.sqrt %562 : vector<4x16xf32>
    %cst_162 = arith.constant 6.24499797 : f32
    %564 = vector.broadcast %cst_162 : f32 to vector<4x16xf32>
    %565 = arith.mulf %563, %564 : vector<4x16xf32>
    %cst_163 = arith.constant 0.025641026 : f32
    %566 = vector.broadcast %cst_163 : f32 to vector<4x16xf32>
    %567 = arith.mulf %270, %566 : vector<4x16xf32>
    %cst_164 = arith.constant 1.900000e+01 : f32
    %568 = vector.broadcast %cst_164 : f32 to vector<4x16xf32>
    %569 = arith.mulf %568, %556 : vector<4x16xf32>
    %570 = arith.subf %567, %569 : vector<4x16xf32>
    %cst_165 = arith.constant 0.00789473671 : f32
    %571 = vector.broadcast %cst_165 : f32 to vector<4x16xf32>
    %572 = arith.mulf %570, %571 : vector<4x16xf32>
    %cst_166 = arith.constant 1.900000e+01 : f32
    %573 = vector.broadcast %cst_166 : f32 to vector<4x16xf32>
    %574 = arith.mulf %572, %573 : vector<4x16xf32>
    %575 = arith.subf %556, %574 : vector<4x16xf32>
    %576 = arith.mulf %572, %572 : vector<4x16xf32>
    %cst_167 = arith.constant 126.666664 : f32
    %577 = vector.broadcast %cst_167 : f32 to vector<4x16xf32>
    %578 = arith.mulf %576, %577 : vector<4x16xf32>
    %579 = arith.subf %562, %578 : vector<4x16xf32>
    %cst_168 = arith.constant 3.900000e+01 : f32
    %580 = vector.broadcast %cst_168 : f32 to vector<4x16xf32>
    %581 = arith.mulf %580, %579 : vector<4x16xf32>
    %cst_169 = arith.constant 0.000000e+00 : f32
    %582 = vector.broadcast %cst_169 : f32 to vector<4x16xf32>
    %583 = arith.maximumf %581, %582 : vector<4x16xf32>
    %584 = math.sqrt %583 : vector<4x16xf32>
    %cst_170 = arith.constant 0.000000e+00 : f32
    %585 = vector.broadcast %cst_170 : f32 to vector<4x16xf32>
    %586 = arith.cmpf ogt, %565, %585 : vector<4x16xf32>
    %cst_171 = arith.constant 1.000000e+00 : f32
    %587 = vector.broadcast %cst_171 : f32 to vector<4x16xf32>
    %588 = arith.select %586, %565, %587 : vector<4x16xi1>, vector<4x16xf32>
    %589 = tpu.reciprocal %588 {approx = true} : vector<4x16xf32> -> vector<4x16xf32>
    %cst_172 = arith.constant 0.000000e+00 : f32
    %590 = vector.broadcast %cst_172 : f32 to vector<4x16xf32>
    %591 = arith.select %586, %589, %590 : vector<4x16xi1>, vector<4x16xf32>
    %cst_173 = arith.constant 0.000000e+00 : f32
    %592 = vector.broadcast %cst_173 : f32 to vector<4x16xf32>
    %593 = arith.cmpf ogt, %584, %592 : vector<4x16xf32>
    %cst_174 = arith.constant 1.000000e+00 : f32
    %594 = vector.broadcast %cst_174 : f32 to vector<4x16xf32>
    %595 = arith.select %593, %584, %594 : vector<4x16xi1>, vector<4x16xf32>
    %596 = tpu.reciprocal %595 {approx = true} : vector<4x16xf32> -> vector<4x16xf32>
    %cst_175 = arith.constant 0.000000e+00 : f32
    %597 = vector.broadcast %cst_175 : f32 to vector<4x16xf32>
    %598 = arith.select %593, %596, %597 : vector<4x16xi1>, vector<4x16xf32>
    %599 = vector.extract_strided_slice %279 {offsets = [4, 0], sizes = [2, 16], strides = [1, 1]} : vector<6x16xf32> to vector<2x16xf32>
    %600 = vector.extract_strided_slice %280 {offsets = [12, 0], sizes = [2, 1], strides = [1, 1]} : vector<18x1xf32> to vector<2x1xf32>
    %601 = vector.broadcast %600 : vector<2x1xf32> to vector<2x16xf32>
    %602 = arith.addf %599, %601 : vector<2x16xf32>
    %603 = arith.mulf %2, %591 : vector<4x16xf32>
    %604 = arith.mulf %3, %591 : vector<4x16xf32>
    %605 = arith.mulf %4, %591 : vector<4x16xf32>
    %606 = arith.mulf %5, %591 : vector<4x16xf32>
    %607 = arith.mulf %6, %591 : vector<4x16xf32>
    %608 = arith.mulf %7, %591 : vector<4x16xf32>
    %609 = arith.mulf %8, %591 : vector<4x16xf32>
    %610 = arith.mulf %9, %591 : vector<4x16xf32>
    %611 = arith.mulf %10, %591 : vector<4x16xf32>
    %612 = arith.mulf %11, %591 : vector<4x16xf32>
    %613 = arith.mulf %12, %591 : vector<4x16xf32>
    %614 = arith.mulf %13, %591 : vector<4x16xf32>
    %615 = arith.mulf %14, %591 : vector<4x16xf32>
    %616 = arith.mulf %15, %591 : vector<4x16xf32>
    %617 = arith.mulf %16, %591 : vector<4x16xf32>
    %618 = arith.mulf %17, %591 : vector<4x16xf32>
    %619 = arith.mulf %18, %591 : vector<4x16xf32>
    %620 = arith.mulf %19, %591 : vector<4x16xf32>
    %621 = arith.mulf %20, %591 : vector<4x16xf32>
    %622 = arith.mulf %21, %591 : vector<4x16xf32>
    %623 = arith.mulf %22, %591 : vector<4x16xf32>
    %624 = arith.mulf %23, %591 : vector<4x16xf32>
    %625 = arith.mulf %24, %591 : vector<4x16xf32>
    %626 = arith.mulf %25, %591 : vector<4x16xf32>
    %627 = arith.mulf %26, %591 : vector<4x16xf32>
    %628 = arith.mulf %27, %591 : vector<4x16xf32>
    %629 = arith.mulf %28, %591 : vector<4x16xf32>
    %630 = arith.mulf %29, %591 : vector<4x16xf32>
    %631 = arith.mulf %30, %591 : vector<4x16xf32>
    %632 = arith.mulf %31, %591 : vector<4x16xf32>
    %633 = arith.mulf %32, %591 : vector<4x16xf32>
    %634 = arith.mulf %33, %591 : vector<4x16xf32>
    %635 = arith.mulf %34, %591 : vector<4x16xf32>
    %636 = arith.mulf %35, %591 : vector<4x16xf32>
    %637 = arith.mulf %36, %591 : vector<4x16xf32>
    %638 = arith.mulf %37, %591 : vector<4x16xf32>
    %639 = arith.mulf %38, %591 : vector<4x16xf32>
    %640 = arith.mulf %39, %591 : vector<4x16xf32>
    %641 = arith.mulf %40, %591 : vector<4x16xf32>
    %642 = tpu.concatenate %603, %604, %605, %606, %607, %608, %609, %610, %611, %612, %613, %614, %615, %616, %617, %618 in 0 : vector<4x16xf32>, vector<4x16xf32>, vector<4x16xf32>, vector<4x16xf32>, vector<4x16xf32>, vector<4x16xf32>, vector<4x16xf32>, vector<4x16xf32>, vector<4x16xf32>, vector<4x16xf32>, vector<4x16xf32>, vector<4x16xf32>, vector<4x16xf32>, vector<4x16xf32>, vector<4x16xf32>, vector<4x16xf32> -> vector<64x16xf32>
    %643 = tpu.concatenate %619, %620, %621, %622, %623, %624, %625, %626, %627, %628, %629, %630, %631, %632, %633, %634 in 0 : vector<4x16xf32>, vector<4x16xf32>, vector<4x16xf32>, vector<4x16xf32>, vector<4x16xf32>, vector<4x16xf32>, vector<4x16xf32>, vector<4x16xf32>, vector<4x16xf32>, vector<4x16xf32>, vector<4x16xf32>, vector<4x16xf32>, vector<4x16xf32>, vector<4x16xf32>, vector<4x16xf32>, vector<4x16xf32> -> vector<64x16xf32>
    %644 = tpu.concatenate %635, %636, %637, %638, %639, %640, %641 in 0 : vector<4x16xf32>, vector<4x16xf32>, vector<4x16xf32>, vector<4x16xf32>, vector<4x16xf32>, vector<4x16xf32>, vector<4x16xf32> -> vector<28x16xf32>
    %645 = tpu.concatenate %642, %643, %644 in 0 : vector<64x16xf32>, vector<64x16xf32>, vector<28x16xf32> -> vector<156x16xf32>
    %646 = arith.truncf %645 : vector<156x16xf32> to vector<156x16xbf16>
    %c0_176 = arith.constant 0 : index
    %c0_177 = arith.constant 0 : index
    %647 = vector.load %arg15[%c0_176, %c0_177] : memref<2x156xbf16, #tpu.memory_space<vmem>>, vector<2x156xbf16>
    %cst_178 = arith.constant dense<0.000000e+00> : vector<2x16xf32>
    %648 = tpu.matmul %647, %646, %cst_178 {dimension_numbers = #tpu.dot_dimension_numbers<[1], [0], [0], [1], [0, 0, 1, 1], [], []>} : vector<2x156xbf16>, vector<156x16xbf16>, vector<2x16xf32> -> vector<2x16xf32>
    %c0_179 = arith.constant 0 : index
    %c0_180 = arith.constant 0 : index
    %649 = vector.load %arg17[%c0_179, %c0_180] : memref<2x4xbf16, #tpu.memory_space<vmem>>, vector<2x4xbf16>
    %650 = arith.mulf %556, %591 : vector<4x16xf32>
    %651 = arith.truncf %650 : vector<4x16xf32> to vector<4x16xbf16>
    %cst_181 = arith.constant dense<0.000000e+00> : vector<2x16xf32>
    %652 = tpu.matmul %649, %651, %cst_181 {dimension_numbers = #tpu.dot_dimension_numbers<[1], [0], [0], [1], [0, 0, 1, 1], [], []>} : vector<2x4xbf16>, vector<4x16xbf16>, vector<2x16xf32> -> vector<2x16xf32>
    %653 = arith.subf %648, %652 : vector<2x16xf32>
    %654 = vector.extract_strided_slice %280 {offsets = [14, 0], sizes = [2, 1], strides = [1, 1]} : vector<18x1xf32> to vector<2x1xf32>
    %655 = vector.broadcast %654 : vector<2x1xf32> to vector<2x16xf32>
    %656 = arith.addf %653, %655 : vector<2x16xf32>
    %657 = arith.mulf %2, %598 : vector<4x16xf32>
    %658 = arith.mulf %3, %598 : vector<4x16xf32>
    %659 = arith.mulf %4, %598 : vector<4x16xf32>
    %660 = arith.mulf %5, %598 : vector<4x16xf32>
    %661 = arith.mulf %6, %598 : vector<4x16xf32>
    %662 = arith.mulf %7, %598 : vector<4x16xf32>
    %663 = arith.mulf %8, %598 : vector<4x16xf32>
    %664 = arith.mulf %9, %598 : vector<4x16xf32>
    %665 = arith.mulf %10, %598 : vector<4x16xf32>
    %666 = arith.mulf %11, %598 : vector<4x16xf32>
    %667 = arith.mulf %12, %598 : vector<4x16xf32>
    %668 = arith.mulf %13, %598 : vector<4x16xf32>
    %669 = arith.mulf %14, %598 : vector<4x16xf32>
    %670 = arith.mulf %15, %598 : vector<4x16xf32>
    %671 = arith.mulf %16, %598 : vector<4x16xf32>
    %672 = arith.mulf %17, %598 : vector<4x16xf32>
    %673 = arith.mulf %18, %598 : vector<4x16xf32>
    %674 = arith.mulf %19, %598 : vector<4x16xf32>
    %675 = arith.mulf %20, %598 : vector<4x16xf32>
    %676 = arith.mulf %21, %598 : vector<4x16xf32>
    %677 = arith.mulf %22, %598 : vector<4x16xf32>
    %678 = arith.mulf %23, %598 : vector<4x16xf32>
    %679 = arith.mulf %24, %598 : vector<4x16xf32>
    %680 = arith.mulf %25, %598 : vector<4x16xf32>
    %681 = arith.mulf %26, %598 : vector<4x16xf32>
    %682 = arith.mulf %27, %598 : vector<4x16xf32>
    %683 = arith.mulf %28, %598 : vector<4x16xf32>
    %684 = arith.mulf %29, %598 : vector<4x16xf32>
    %685 = arith.mulf %30, %598 : vector<4x16xf32>
    %686 = arith.mulf %31, %598 : vector<4x16xf32>
    %687 = arith.mulf %32, %598 : vector<4x16xf32>
    %688 = arith.mulf %33, %598 : vector<4x16xf32>
    %689 = arith.mulf %34, %598 : vector<4x16xf32>
    %690 = arith.mulf %35, %598 : vector<4x16xf32>
    %691 = arith.mulf %36, %598 : vector<4x16xf32>
    %692 = arith.mulf %37, %598 : vector<4x16xf32>
    %693 = arith.mulf %38, %598 : vector<4x16xf32>
    %694 = arith.mulf %39, %598 : vector<4x16xf32>
    %695 = arith.mulf %40, %598 : vector<4x16xf32>
    %696 = tpu.concatenate %657, %658, %659, %660, %661, %662, %663, %664, %665, %666, %667, %668, %669, %670, %671, %672 in 0 : vector<4x16xf32>, vector<4x16xf32>, vector<4x16xf32>, vector<4x16xf32>, vector<4x16xf32>, vector<4x16xf32>, vector<4x16xf32>, vector<4x16xf32>, vector<4x16xf32>, vector<4x16xf32>, vector<4x16xf32>, vector<4x16xf32>, vector<4x16xf32>, vector<4x16xf32>, vector<4x16xf32>, vector<4x16xf32> -> vector<64x16xf32>
    %697 = tpu.concatenate %673, %674, %675, %676, %677, %678, %679, %680, %681, %682, %683, %684, %685, %686, %687, %688 in 0 : vector<4x16xf32>, vector<4x16xf32>, vector<4x16xf32>, vector<4x16xf32>, vector<4x16xf32>, vector<4x16xf32>, vector<4x16xf32>, vector<4x16xf32>, vector<4x16xf32>, vector<4x16xf32>, vector<4x16xf32>, vector<4x16xf32>, vector<4x16xf32>, vector<4x16xf32>, vector<4x16xf32>, vector<4x16xf32> -> vector<64x16xf32>
    %698 = tpu.concatenate %689, %690, %691, %692, %693, %694, %695 in 0 : vector<4x16xf32>, vector<4x16xf32>, vector<4x16xf32>, vector<4x16xf32>, vector<4x16xf32>, vector<4x16xf32>, vector<4x16xf32> -> vector<28x16xf32>
    %699 = tpu.concatenate %696, %697, %698 in 0 : vector<64x16xf32>, vector<64x16xf32>, vector<28x16xf32> -> vector<156x16xf32>
    %700 = arith.truncf %699 : vector<156x16xf32> to vector<156x16xbf16>
    %c0_182 = arith.constant 0 : index
    %c0_183 = arith.constant 0 : index
    %701 = vector.load %arg16[%c0_182, %c0_183] : memref<2x156xbf16, #tpu.memory_space<vmem>>, vector<2x156xbf16>
    %cst_184 = arith.constant dense<0.000000e+00> : vector<2x16xf32>
    %702 = tpu.matmul %701, %700, %cst_184 {dimension_numbers = #tpu.dot_dimension_numbers<[1], [0], [0], [1], [0, 0, 1, 1], [], []>} : vector<2x156xbf16>, vector<156x16xbf16>, vector<2x16xf32> -> vector<2x16xf32>
    %c0_185 = arith.constant 0 : index
    %c0_186 = arith.constant 0 : index
    %703 = vector.load %arg19[%c0_185, %c0_186] : memref<2x4xbf16, #tpu.memory_space<vmem>>, vector<2x4xbf16>
    %704 = arith.mulf %572, %598 : vector<4x16xf32>
    %705 = arith.truncf %704 : vector<4x16xf32> to vector<4x16xbf16>
    %cst_187 = arith.constant dense<0.000000e+00> : vector<2x16xf32>
    %706 = tpu.matmul %703, %705, %cst_187 {dimension_numbers = #tpu.dot_dimension_numbers<[1], [0], [0], [1], [0, 0, 1, 1], [], []>} : vector<2x4xbf16>, vector<4x16xbf16>, vector<2x16xf32> -> vector<2x16xf32>
    %707 = arith.subf %702, %706 : vector<2x16xf32>
    %c0_188 = arith.constant 0 : index
    %c0_189 = arith.constant 0 : index
    %708 = vector.load %arg18[%c0_188, %c0_189] : memref<2x4xbf16, #tpu.memory_space<vmem>>, vector<2x4xbf16>
    %709 = arith.mulf %575, %598 : vector<4x16xf32>
    %710 = arith.truncf %709 : vector<4x16xf32> to vector<4x16xbf16>
    %cst_190 = arith.constant dense<0.000000e+00> : vector<2x16xf32>
    %711 = tpu.matmul %708, %710, %cst_190 {dimension_numbers = #tpu.dot_dimension_numbers<[1], [0], [0], [1], [0, 0, 1, 1], [], []>} : vector<2x4xbf16>, vector<4x16xbf16>, vector<2x16xf32> -> vector<2x16xf32>
    %712 = arith.subf %707, %711 : vector<2x16xf32>
    %713 = vector.extract_strided_slice %280 {offsets = [16, 0], sizes = [2, 1], strides = [1, 1]} : vector<18x1xf32> to vector<2x1xf32>
    %714 = vector.broadcast %713 : vector<2x1xf32> to vector<2x16xf32>
    %715 = arith.addf %712, %714 : vector<2x16xf32>
    %c0_191 = arith.constant 0 : index
    %c12 = arith.constant 12 : index
    %c0_192 = arith.constant 0 : index
    %716 = vector.load %arg20[%c0_191, %c12, %c0_192] : memref<1x18x16xf32, #tpu.memory_space<vmem>>, vector<1x2x16xf32>
    %717 = vector.shape_cast %716 : vector<1x2x16xf32> to vector<2x16xf32>
    %718 = vector.shape_cast %602 : vector<2x16xf32> to vector<1x2x16xf32>
    tpu.vector_store %arg20[%c0_191, %c12, %c0_192], %718 {strides = array<i32>} : memref<1x18x16xf32, #tpu.memory_space<vmem>>, vector<1x2x16xf32>,
    %c0_193 = arith.constant 0 : index
    %c14 = arith.constant 14 : index
    %c0_194 = arith.constant 0 : index
    %719 = vector.load %arg20[%c0_193, %c14, %c0_194] : memref<1x18x16xf32, #tpu.memory_space<vmem>>, vector<1x2x16xf32>
    %720 = vector.shape_cast %719 : vector<1x2x16xf32> to vector<2x16xf32>
    %721 = vector.shape_cast %656 : vector<2x16xf32> to vector<1x2x16xf32>
    tpu.vector_store %arg20[%c0_193, %c14, %c0_194], %721 {strides = array<i32>} : memref<1x18x16xf32, #tpu.memory_space<vmem>>, vector<1x2x16xf32>,
    %c0_195 = arith.constant 0 : index
    %c16 = arith.constant 16 : index
    %c0_196 = arith.constant 0 : index
    %722 = vector.load %arg20[%c0_195, %c16, %c0_196] : memref<1x18x16xf32, #tpu.memory_space<vmem>>, vector<1x2x16xf32>
    %723 = vector.shape_cast %722 : vector<1x2x16xf32> to vector<2x16xf32>
    %724 = vector.shape_cast %715 : vector<2x16xf32> to vector<1x2x16xf32>
    tpu.vector_store %arg20[%c0_195, %c16, %c0_196], %724 {strides = array<i32>} : memref<1x18x16xf32, #tpu.memory_space<vmem>>, vector<1x2x16xf32>,
    %c0_197 = arith.constant 0 : index
    %c10_198 = arith.constant 10 : index
    %c0_199 = arith.constant 0 : index
    %c0_200 = arith.constant 0 : index
    %725 = vector.load %arg21[%c0_197, %c10_198, %c0_199, %c0_200] : memref<1x15x4x16xf32, #tpu.memory_space<vmem>>, vector<1x1x4x16xf32>
    %726 = vector.shape_cast %725 : vector<1x1x4x16xf32> to vector<4x16xf32>
    %727 = vector.shape_cast %565 : vector<4x16xf32> to vector<1x1x4x16xf32>
    tpu.vector_store %arg21[%c0_197, %c10_198, %c0_199, %c0_200], %727 {strides = array<i32>} : memref<1x15x4x16xf32, #tpu.memory_space<vmem>>, vector<1x1x4x16xf32>,
    %c0_201 = arith.constant 0 : index
    %c11 = arith.constant 11 : index
    %c0_202 = arith.constant 0 : index
    %c0_203 = arith.constant 0 : index
    %728 = vector.load %arg21[%c0_201, %c11, %c0_202, %c0_203] : memref<1x15x4x16xf32, #tpu.memory_space<vmem>>, vector<1x1x4x16xf32>
    %729 = vector.shape_cast %728 : vector<1x1x4x16xf32> to vector<4x16xf32>
    %730 = vector.shape_cast %556 : vector<4x16xf32> to vector<1x1x4x16xf32>
    tpu.vector_store %arg21[%c0_201, %c11, %c0_202, %c0_203], %730 {strides = array<i32>} : memref<1x15x4x16xf32, #tpu.memory_space<vmem>>, vector<1x1x4x16xf32>,
    %c0_204 = arith.constant 0 : index
    %c12_205 = arith.constant 12 : index
    %c0_206 = arith.constant 0 : index
    %c0_207 = arith.constant 0 : index
    %731 = vector.load %arg21[%c0_204, %c12_205, %c0_206, %c0_207] : memref<1x15x4x16xf32, #tpu.memory_space<vmem>>, vector<1x1x4x16xf32>
    %732 = vector.shape_cast %731 : vector<1x1x4x16xf32> to vector<4x16xf32>
    %733 = vector.shape_cast %584 : vector<4x16xf32> to vector<1x1x4x16xf32>
    tpu.vector_store %arg21[%c0_204, %c12_205, %c0_206, %c0_207], %733 {strides = array<i32>} : memref<1x15x4x16xf32, #tpu.memory_space<vmem>>, vector<1x1x4x16xf32>,
    %c0_208 = arith.constant 0 : index
    %c13 = arith.constant 13 : index
    %c0_209 = arith.constant 0 : index
    %c0_210 = arith.constant 0 : index
    %734 = vector.load %arg21[%c0_208, %c13, %c0_209, %c0_210] : memref<1x15x4x16xf32, #tpu.memory_space<vmem>>, vector<1x1x4x16xf32>
    %735 = vector.shape_cast %734 : vector<1x1x4x16xf32> to vector<4x16xf32>
    %736 = vector.shape_cast %572 : vector<4x16xf32> to vector<1x1x4x16xf32>
    tpu.vector_store %arg21[%c0_208, %c13, %c0_209, %c0_210], %736 {strides = array<i32>} : memref<1x15x4x16xf32, #tpu.memory_space<vmem>>, vector<1x1x4x16xf32>,
    %c0_211 = arith.constant 0 : index
    %c14_212 = arith.constant 14 : index
    %c0_213 = arith.constant 0 : index
    %c0_214 = arith.constant 0 : index
    %737 = vector.load %arg21[%c0_211, %c14_212, %c0_213, %c0_214] : memref<1x15x4x16xf32, #tpu.memory_space<vmem>>, vector<1x1x4x16xf32>
    %738 = vector.shape_cast %737 : vector<1x1x4x16xf32> to vector<4x16xf32>
    %739 = vector.shape_cast %575 : vector<4x16xf32> to vector<1x1x4x16xf32>
    tpu.vector_store %arg21[%c0_211, %c14_212, %c0_213, %c0_214], %739 {strides = array<i32>} : memref<1x15x4x16xf32, #tpu.memory_space<vmem>>, vector<1x1x4x16xf32>,
    return
  }
  func.func @transform_0(%arg0: i32, %arg1: i32) -> (i32, i32, i32) {
    %c0_i32 = arith.constant 0 : i32
    %c0_i32_0 = arith.constant 0 : i32
    %c0_i32_1 = arith.constant 0 : i32
    return %arg0, %c0_i32, %c0_i32_0 : i32, i32, i32
  }
  func.func @transform_1(%arg0: i32, %arg1: i32) -> (i32, i32) {
    %c0_i32 = arith.constant 0 : i32
    %c0_i32_0 = arith.constant 0 : i32
    %c0_i32_1 = arith.constant 0 : i32
    return %c0_i32, %c0_i32_0 : i32, i32
  }
  func.func @transform_2(%arg0: i32, %arg1: i32) -> (i32, i32) {
    %c0_i32 = arith.constant 0 : i32
    %c0_i32_0 = arith.constant 0 : i32
    %c0_i32_1 = arith.constant 0 : i32
    return %c0_i32, %c0_i32_0 : i32, i32
  }
  func.func @transform_3(%arg0: i32, %arg1: i32) -> (i32, i32) {
    %c0_i32 = arith.constant 0 : i32
    %c0_i32_0 = arith.constant 0 : i32
    %c0_i32_1 = arith.constant 0 : i32
    return %c0_i32, %c0_i32_0 : i32, i32
  }
  func.func @transform_4(%arg0: i32, %arg1: i32) -> (i32, i32) {
    %c0_i32 = arith.constant 0 : i32
    %c0_i32_0 = arith.constant 0 : i32
    %c0_i32_1 = arith.constant 0 : i32
    return %c0_i32, %c0_i32_0 : i32, i32
  }
  func.func @transform_5(%arg0: i32, %arg1: i32) -> (i32, i32) {
    %c0_i32 = arith.constant 0 : i32
    %c0_i32_0 = arith.constant 0 : i32
    %c0_i32_1 = arith.constant 0 : i32
    return %c0_i32, %c0_i32_0 : i32, i32
  }
  func.func @transform_6(%arg0: i32, %arg1: i32) -> (i32, i32) {
    %c0_i32 = arith.constant 0 : i32
    %c0_i32_0 = arith.constant 0 : i32
    %c0_i32_1 = arith.constant 0 : i32
    return %c0_i32, %c0_i32_0 : i32, i32
  }
  func.func @transform_7(%arg0: i32, %arg1: i32) -> (i32, i32) {
    %c0_i32 = arith.constant 0 : i32
    %c0_i32_0 = arith.constant 0 : i32
    %c0_i32_1 = arith.constant 0 : i32
    return %c0_i32, %c0_i32_0 : i32, i32
  }
  func.func @transform_8(%arg0: i32, %arg1: i32) -> (i32, i32) {
    %c0_i32 = arith.constant 0 : i32
    %c0_i32_0 = arith.constant 0 : i32
    %c0_i32_1 = arith.constant 0 : i32
    return %c0_i32, %c0_i32_0 : i32, i32
  }
  func.func @transform_9(%arg0: i32, %arg1: i32) -> (i32, i32) {
    %c0_i32 = arith.constant 0 : i32
    %c0_i32_0 = arith.constant 0 : i32
    %c0_i32_1 = arith.constant 0 : i32
    return %c0_i32, %c0_i32_0 : i32, i32
  }
  func.func @transform_10(%arg0: i32, %arg1: i32) -> (i32, i32) {
    %c0_i32 = arith.constant 0 : i32
    %c0_i32_0 = arith.constant 0 : i32
    %c0_i32_1 = arith.constant 0 : i32
    return %c0_i32, %c0_i32_0 : i32, i32
  }
  func.func @transform_11(%arg0: i32, %arg1: i32) -> (i32, i32) {
    %c0_i32 = arith.constant 0 : i32
    %c0_i32_0 = arith.constant 0 : i32
    %c0_i32_1 = arith.constant 0 : i32
    return %c0_i32, %c0_i32_0 : i32, i32
  }
  func.func @transform_12(%arg0: i32, %arg1: i32) -> (i32, i32) {
    %c0_i32 = arith.constant 0 : i32
    %c0_i32_0 = arith.constant 0 : i32
    %c0_i32_1 = arith.constant 0 : i32
    return %c0_i32, %c0_i32_0 : i32, i32
  }
  func.func @transform_13(%arg0: i32, %arg1: i32) -> (i32, i32) {
    %c0_i32 = arith.constant 0 : i32
    %c0_i32_0 = arith.constant 0 : i32
    %c0_i32_1 = arith.constant 0 : i32
    return %c0_i32, %c0_i32_0 : i32, i32
  }
  func.func @transform_14(%arg0: i32, %arg1: i32) -> (i32, i32) {
    %c0_i32 = arith.constant 0 : i32
    %c0_i32_0 = arith.constant 0 : i32
    %c0_i32_1 = arith.constant 0 : i32
    return %c0_i32, %c0_i32_0 : i32, i32
  }
  func.func @transform_15(%arg0: i32, %arg1: i32) -> (i32, i32) {
    %c0_i32 = arith.constant 0 : i32
    %c0_i32_0 = arith.constant 0 : i32
    %c0_i32_1 = arith.constant 0 : i32
    return %c0_i32, %c0_i32_0 : i32, i32
  }
  func.func @transform_16(%arg0: i32, %arg1: i32) -> (i32, i32) {
    %c0_i32 = arith.constant 0 : i32
    %c0_i32_0 = arith.constant 0 : i32
    %c0_i32_1 = arith.constant 0 : i32
    return %c0_i32, %c0_i32_0 : i32, i32
  }
  func.func @transform_17(%arg0: i32, %arg1: i32) -> (i32, i32) {
    %c0_i32 = arith.constant 0 : i32
    %c0_i32_0 = arith.constant 0 : i32
    %c0_i32_1 = arith.constant 0 : i32
    return %c0_i32, %c0_i32_0 : i32, i32
  }
  func.func @transform_18(%arg0: i32, %arg1: i32) -> (i32, i32, i32) {
    %c0_i32 = arith.constant 0 : i32
    %c0_i32_0 = arith.constant 0 : i32
    return %arg0, %c0_i32, %arg1 : i32, i32, i32
  }
  func.func @transform_19(%arg0: i32, %arg1: i32) -> (i32, i32, i32, i32) {
    %c0_i32 = arith.constant 0 : i32
    %c0_i32_0 = arith.constant 0 : i32
    %c0_i32_1 = arith.constant 0 : i32
    return %arg0, %c0_i32, %c0_i32_0, %arg1 : i32, i32, i32, i32
  }
}

</mosaic_0001>

<bundles_post_ra>
// kernel: tpu_custom_call.1
= control target key start
LH: loop header
LB: loop body
LE: loop exit
PB: predicated region body
PF: predicated region fallthrough
CT: control target
= control target key end

     0   :  { %s6811_s0 = inlined_call_operand.vmem [shape: f32[2,4,54], index: 0, kind: input, shape index: {}]   ;;  %s6812_s1 = inlined_call_operand.vmem [shape: bf16[6,156], index: 1, kind: input, shape index: {}]   ;;  %s6813_s2 = inlined_call_operand.vmem [shape: f32[18,1], index: 2, kind: input, shape index: {}]   ;;  %s6814_s3 = inlined_call_operand.vmem [shape: bf16[2,36], index: 3, kind: input, shape index: {}]   ;;  %s6815_s4 = inlined_call_operand.vmem [shape: bf16[2,36], index: 4, kind: input, shape index: {}]   ;;  %s6816_s5 = inlined_call_operand.vmem [shape: bf16[2,4], index: 5, kind: input, shape index: {}]   ;;  %s6817_s6 = inlined_call_operand.vmem [shape: bf16[2,4], index: 6, kind: input, shape index: {}]   ;;  %s6818_s7 = inlined_call_operand.vmem [shape: bf16[2,4], index: 7, kind: input, shape index: {}]   ;;  %s6819_s8 = inlined_call_operand.vmem [shape: bf16[2,76], index: 8, kind: input, shape index: {}]   ;;  %s6820_s9 = inlined_call_operand.vmem [shape: bf16[2,76], index: 9, kind: input, shape index: {}]   ;;  %s6821_s10 = inlined_call_operand.vmem [shape: bf16[2,4], index: 10, kind: input, shape index: {}]   ;;  %s6822_s11 = inlined_call_operand.vmem [shape: bf16[2,4], index: 11, kind: input, shape index: {}]   ;;  %s6823_s12 = inlined_call_operand.vmem [shape: bf16[2,4], index: 12, kind: input, shape index: {}]   ;;  %s6824_s13 = inlined_call_operand.vmem [shape: bf16[2,156], index: 13, kind: input, shape index: {}]   ;;  %s6825_s14 = inlined_call_operand.vmem [shape: bf16[2,156], index: 14, kind: input, shape index: {}]   ;;  %s6826_s15 = inlined_call_operand.vmem [shape: bf16[2,4], index: 15, kind: input, shape index: {}]   ;;  %s6827_s16 = inlined_call_operand.vmem [shape: bf16[2,4], index: 16, kind: input, shape index: {}]   ;;  %s6828_s17 = inlined_call_operand.vmem [shape: bf16[2,4], index: 17, kind: input, shape index: {}]   ;;  %s6829_s18 = inlined_call_operand.vmem [shape: f32[2,18,16], index: 18, kind: output, shape index: {0}]   ;;  %s6830_s19 = inlined_call_operand.hbm [shape: f32[2,15,4,16], index: 19, kind: output, shape index: {1}]  }
   0x1   :  { %6958 = sst [smem:[#allocation34_spill]] %s6811_s0 }
   0x2   :  { %6959 = sst [smem:[#allocation35_spill]] %s6812_s1 }
   0x3   :  { %6960 = sst [smem:[#allocation36_spill]] %s6813_s2 }
   0x4   :  { %6961 = sst [smem:[#allocation37_spill]] %s6814_s3 }
   0x5   :  { %6962 = sst [smem:[#allocation38_spill]] %s6815_s4 }
   0x6   :  { %6963 = sst [smem:[#allocation39_spill]] %s6817_s6 }
   0x7   :  { %6964 = sst [smem:[#allocation40_spill]] %s6818_s7 }
   0x8   :  { %6965 = sst [smem:[#allocation41_spill]] %s6819_s8 }
   0x9   :  { %6966 = sst [smem:[#allocation42_spill]] %s6820_s9 }
   0xa   :  { %6967 = sst [smem:[#allocation43_spill]] %s6821_s10 }
   0xb   :  { %6968 = sst [smem:[#allocation44_spill]] %s6822_s11 }
   0xc   :  { %6969 = sst [smem:[#allocation45_spill]] %s6823_s12 }
   0xd   :  { %6970 = sst [smem:[#allocation46_spill]] %s6824_s13 }
   0xe   :  { %6971 = sst [smem:[#allocation47_spill]] %s6825_s14 }
   0xf   :  { %6972 = sst [smem:[#allocation48_spill]] %s6826_s15 }
  0x10   :  { %6973 = sst [smem:[#allocation49_spill]] %s6827_s16 }
  0x11   :  { %6974 = sst [smem:[#allocation50_spill]] %s6828_s17 }
  0x12   :  { %6975 = sst [smem:[#allocation51_spill]] %s6830_s19 }
  0x13   :  { %25 = vsyncpa [#allocation3], 0 }
  0x14   :  { %27 = vsyncpa [#allocation3 + $0x1], 0  ;;  %s4790_s0 = smov 0   ;;  %s4792_s30 = smov 0  }
  0x15   :  { %s4794_s20 = smov 0   ;;  %s4796_s21 = smov 0  }
  0x16   :  { %s4798_s1 = smov 0   ;;  %s4800_s22 = smov 0  }
  0x17 LB: > { %6976 = sst [smem:[#allocation5_spill]] %s4586_s0  ;;  %s3854_s2 = sadd.s32 4294967295, %s4606_s22   ;;  %s4606_s22 = sphi %s4800_s22, %s33_s22   ;;  %s4602_s1 = sphi %s4798_s1, %s7125_s1   ;;  %s4598_s21 = sphi %s4796_s21, %s7124_s21   ;;  %s4594_s20 = sphi %s4794_s20, %s7123_s20   ;;  %s4590_s30 = sphi %s4792_s30, %s7122_s30   ;;  %s4586_s0 = sphi %s4790_s0, %s7121_s0  }
  0x18   : > { %6977 = sst [smem:[#allocation6_spill]] %s4590_s30  ;;  %s3855_s23 = sadd.s32 4294967294, %s4606_s22  }
  0x19   : > { %6978 = sst [smem:[#allocation7_spill]] %s4594_s20  ;;  %s45_s24 = sadd.s32 1, %s4602_s1 }
  0x1a   : > { %6979 = sst [smem:[#allocation8_spill]] %s4598_s21  ;;  %s465_s25 = sadd.s32 1, %s4594_s20 }
  0x1b   : > { %6980 = sst [smem:[#allocation9_spill]] %s4602_s1  ;;  %p47_p0 = scmp.ge.s32.totalorder %s45_s24, 2 }
  0x1c   : > { %6981 = sst [smem:[#allocation10_spill]] %s4606_s22  ;;  %p475_p1 = scmp.ne.s32.totalorder %s4594_s20, %s4590_s30 }
  0x1d   : > { %p476_p2 = scmp.eq.s32.totalorder %s3854_s2, 1  ;;  %p481_p3 = scmp.ne.s32.totalorder %s4590_s30, %s4586_s0 }
  0x1e   : > { %s7127_s24 = smov (%p47_p0, %s45_s24), 0  ;;  %p482_p5 = scmp.eq.s32.totalorder %s3855_s23, 1 }
  0x1f   : > { %6982 = sst [smem:[#allocation11_spill]] %s7127_s24  ;;  %p4830_p4 = por %p476_p2, %p475_p1 }
  0x20   : > { %s460_s26 = ssub.s32 %s4602_s1, %s7127_s24  ;;  %p3858_p6 = scmp.ge.s32.totalorder %s4606_s22, 1 }
  0x21   : > { %s6983_s3 = scalar_select %p4830_p4, 1, 0 }
  0x22   : > { %p463_p7 = scmp.eq.s32.totalorder %s460_s26, 0  ;;  %p4837_p8 = por %p482_p5, %p481_p3 }
  0x23   : > { %6984 = sst [smem:[#allocation12_spill]] %s6983_s3  ;;  %p558_p9 = scmp.lt.s32.totalorder %s4606_s22, 3 }
  0x24   : > { %s6985_s27 = scalar_select %p4837_p8, 1, 0 }
  0x25   : > { %s4843_s28 = scalar_select %p463_p7, %s4594_s20, %s465_s25  }
  0x26   : > { %6986 = sst [smem:[#allocation13_spill]] %s6985_s27  ;;  %p559_p10 = pnand %p3858_p6, %p558_p9 }
  0x27   : > { %6987 = sst [smem:[#allocation14_spill]] %s4843_s28 }
  0x28   : > { %562 = sbr.rel (%p559_p10) target bundleno = 1591 (0x637), region = 92 }
  0x2f   : > { %p621_p11 = scmp.lt.s32.totalorder %s4598_s21, 1  ;;  %s6988_s1 = sld [smem:[#allocation34_spill]]  ;;  %vm1823_vm0 = vcmask 125952   ;;  %vm1191_vm5 = vcmask 1043456   ;;  %vm1261_vm10 = vcmask 228352   ;;  %vm4665_vm11 = vmmov 0  }
  0x30   : > { %s6837_s27 = smov 126   ;;  %s6865_s25 = smov 127   ;;  %vm1265_vm12 = vcmask 1045504  }
  0x31   : > { %s4847_s29 = scalar_select %p621_p11, %s4598_s21, 1 }
  0x32   : > { %s6863_s28 = smov 125   ;;  %s6861_s24 = smov 123  }
  0x33   : > { %s3859_s2 = sshll.u32 %s4847_s29, 2  ;;  %s6841_s23 = smov 121  }
  0x34   : > { %s7015_s20 = smov 96   ;;  %s7016_s19 = sld [smem:[#allocation36_spill]] }
  0x35   : > { %s4853_s26 = scalar_lea.vmem %s6988_s1, %s3859_s2  ;;  %s6835_s1 = smov 124  }
  0x36   : > { %6989 = sst [smem:[#allocation15_spill]] %s4853_s26  ;;  %v4856_v0 = vld [vmem:[%s4853_s26] sm:$0xf]  ;;  %s6839_s2 = smov 122  }
  0x37   : > { %648 = vrot.lane.b32.xlu1 %v4856_v0, %s6837_s27  ;;  %639 = vrot.lane.b32.xlu0 %v4856_v0, %s6865_s25  ;;  %v4864_v1 = vmul.f32 %v4856_v0, %v4856_v0  ;;  %v652_v2 = vmul.f32 2.0, %v4856_v0  ;;  %v666_v3 = vmul.f32 3.0, %v4856_v0  ;;  %v680_v4 = vmul.f32 4.0, %v4856_v0  ;;  %s6889_s0 = smov 16   ;;  %s6891_s22 = smov 18  }
  0x38   : > { %v694_v5 = vmul.f32 5.0, %v4856_v0  ;;  %v708_v6 = vmul.f32 6.0, %v4856_v0  ;;  %v722_v7 = vmul.f32 7.0, %v4856_v0  ;;  %v736_v8 = vmul.f32 8.0, %v4856_v0  ;;  %s6895_s3 = smov 20   ;;  %s6905_s21 = smov 15  }
  0x39   : > { %v750_v9 = vmul.f32 9.0, %v4856_v0  ;;  %v764_v10 = vmul.f32 10.0, %v4856_v0  ;;  %v778_v11 = vmul.f32 11.0, %v4856_v0  ;;  %v792_v12 = vmul.f32 12.0, %v4856_v0  ;;  %s7025_s17 = sld [smem:[#allocation35_spill]]  ;;  %s6907_s16 = smov 28  }
  0x3a   : > { %v806_v13 = vmul.f32 13.0, %v4856_v0  ;;  %v820_v14 = vmul.f32 14.0, %v4856_v0  ;;  %v834_v15 = vmul.f32 15.0, %v4856_v0  ;;  %v848_v16 = vmul.f32 16.0, %v4856_v0  ;;  %s6911_s9 = smov 23   ;;  %s7042_s13 = smov 122  }
  0x3b   : > { %662 = vrot.lane.b32.xlu1 %v4856_v0, %s6863_s28  ;;  %644 = vrot.lane.b32.xlu0 %v4864_v1, %s6865_s25  ;;  %v862_v17 = vmul.f32 17.0, %v4856_v0  ;;  %v876_v18 = vmul.f32 18.0, %v4856_v0  ;;  %v890_v19 = vmul.f32 19.0, %v4856_v0  ;;  %v904_v20 = vmul.f32 20.0, %v4856_v0  ;;  %s7043_s15 = smov 120   ;;  %s7045_s11 = smov 21  }
  0x3c   : > { %v918_v23 = vmul.f32 21.0, %v4856_v0  ;;  %v932_v26 = vmul.f32 22.0, %v4856_v0  ;;  %v946_v31 = vmul.f32 23.0, %v4856_v0  ;;  %v960_v34 = vmul.f32 24.0, %v4856_v0  ;;  %s7046_s12 = smov 23   ;;  %s6923_s14 = smov 25  }
  0x3d   : > { %v974_v39 = vmul.f32 25.0, %v4856_v0  ;;  %v988_v42 = vmul.f32 26.0, %v4856_v0  ;;  %v1002_v47 = vmul.f32 27.0, %v4856_v0  ;;  %v1016_v50 = vmul.f32 28.0, %v4856_v0  ;;  %s7050_s8 = smov 22   ;;  %s6926_s7 = smov 26  }
  0x3e   : > { %v1030_v55 = vmul.f32 29.0, %v4856_v0  ;;  %v1044_v58 = vmul.f32 30.0, %v4856_v0  ;;  %v1058_v63 = vmul.f32 31.0, %v4856_v0  ;;  %s7051_s6 = sld [smem:[#allocation39_spill]]  ;;  %s7055_s4 = smov 24  }
  0x3f   : > { %654 = vrot.lane.b32.xlu1 %v652_v2, %s6865_s25  ;;  %658 = vrot.lane.b32.xlu0 %v4864_v1, %s6837_s27  ;;  %s7056_s10 = smov 27  }
  0x43   : > { %672 = vrot.lane.b32.xlu1 %v4864_v1, %s6863_s28  ;;  %668 = vrot.lane.b32.xlu0 %v666_v3, %s6837_s27  ;;  %s6845_s27 = smov 119  }
  0x47   : > { %682 = vrot.lane.b32.xlu1 %v680_v4, %s6863_s28  ;;  %676 = vrot.lane.b32.xlu0 %v4856_v0, %s6835_s1  ;;  %v1072_v4 = vmul.f32 32.0, %v4856_v0 }
  0x4b   : > { %690 = vrot.lane.b32.xlu1 %v4856_v0, %s6861_s24  ;;  %686 = vrot.lane.b32.xlu0 %v4864_v1, %s6835_s1 }
  0x4f   : > { %700 = vrot.lane.b32.xlu1 %v4864_v1, %s6861_s24  ;;  %696 = vrot.lane.b32.xlu0 %v694_v5, %s6835_s1  ;;  %s6843_s1 = smov 120  }
  0x53   : > { %710 = vrot.lane.b32.xlu1 %v708_v6, %s6861_s24  ;;  %704 = vrot.lane.b32.xlu0 %v4856_v0, %s6839_s2 }
  0x57   : > { %718 = vrot.lane.b32.xlu1 %v4856_v0, %s6841_s23  ;;  %714 = vrot.lane.b32.xlu0 %v4864_v1, %s6839_s2 }
  0x5b   : > { %728 = vrot.lane.b32.xlu1 %v4864_v1, %s6841_s23  ;;  %724 = vrot.lane.b32.xlu0 %v722_v7, %s6839_s2  ;;  %s6847_s2 = smov 118  }
  0x5f   : > { %738 = vrot.lane.b32.xlu1 %v736_v8, %s6841_s23  ;;  %732 = vrot.lane.b32.xlu0 %v4856_v0, %s6843_s1  ;;  %s6849_s23 = smov 117  }
  0x63   : > { %746 = vrot.lane.b32.xlu1 %v4856_v0, %s6845_s27  ;;  %742 = vrot.lane.b32.xlu0 %v4864_v1, %s6843_s1 }
  0x67   : > { %756 = vrot.lane.b32.xlu1 %v4864_v1, %s6845_s27  ;;  %752 = vrot.lane.b32.xlu0 %v750_v9, %s6843_s1  ;;  %s6851_s1 = smov 116   ;;  %v1086_v9 = vmul.f32 33.0, %v4856_v0 }
  0x6b   : > { %766 = vrot.lane.b32.xlu1 %v764_v10, %s6845_s27  ;;  %760 = vrot.lane.b32.xlu0 %v4856_v0, %s6847_s2  ;;  %s6853_s27 = smov 115  }
  0x6f   : > { %774 = vrot.lane.b32.xlu1 %v4856_v0, %s6849_s23  ;;  %770 = vrot.lane.b32.xlu0 %v4864_v1, %s6847_s2 }
  0x73   : > { %784 = vrot.lane.b32.xlu1 %v4864_v1, %s6849_s23  ;;  %780 = vrot.lane.b32.xlu0 %v778_v11, %s6847_s2  ;;  %s6855_s2 = smov 114  }
  0x77   : > { %794 = vrot.lane.b32.xlu1 %v792_v12, %s6849_s23  ;;  %788 = vrot.lane.b32.xlu0 %v4856_v0, %s6851_s1  ;;  %s6857_s23 = smov 113   ;;  %v1100_v12 = vmul.f32 34.0, %v4856_v0 }
  0x7b   : > { %802 = vrot.lane.b32.xlu1 %v4856_v0, %s6853_s27  ;;  %798 = vrot.lane.b32.xlu0 %v4864_v1, %s6851_s1 }
  0x7f   : > { %812 = vrot.lane.b32.xlu1 %v4864_v1, %s6853_s27  ;;  %808 = vrot.lane.b32.xlu0 %v806_v13, %s6851_s1  ;;  %s6859_s1 = smov 112  }
  0x83   : > { %822 = vrot.lane.b32.xlu1 %v820_v14, %s6853_s27  ;;  %816 = vrot.lane.b32.xlu0 %v4856_v0, %s6855_s2  ;;  %s4624_s27 = smov 111  }
  0x87   : > { %830 = vrot.lane.b32.xlu1 %v4856_v0, %s6857_s23  ;;  %826 = vrot.lane.b32.xlu0 %v4864_v1, %s6855_s2 }
  0x8b   : > { %840 = vrot.lane.b32.xlu1 %v4864_v1, %s6857_s23  ;;  %836 = vrot.lane.b32.xlu0 %v834_v15, %s6855_s2  ;;  %s4625_s2 = smov 110  }
  0x8f   : > { %850 = vrot.lane.b32.xlu1 %v848_v16, %s6857_s23  ;;  %844 = vrot.lane.b32.xlu0 %v4856_v0, %s6859_s1  ;;  %s4626_s23 = smov 109  }
  0x93   : > { %858 = vrot.lane.b32.xlu1 %v4856_v0, %s4624_s27  ;;  %854 = vrot.lane.b32.xlu0 %v4864_v1, %s6859_s1 }
  0x97   : > { %868 = vrot.lane.b32.xlu1 %v4864_v1, %s4624_s27  ;;  %864 = vrot.lane.b32.xlu0 %v862_v17, %s6859_s1  ;;  %s4627_s1 = smov 108  }
  0x9b   : > { %878 = vrot.lane.b32.xlu1 %v876_v18, %s4624_s27  ;;  %872 = vrot.lane.b32.xlu0 %v4856_v0, %s4625_s2  ;;  %s4628_s27 = smov 107  }
  0x9f   : > { %886 = vrot.lane.b32.xlu1 %v4856_v0, %s4626_s23  ;;  %882 = vrot.lane.b32.xlu0 %v4864_v1, %s4625_s2 }
  0xa3   : > { %896 = vrot.lane.b32.xlu1 %v4864_v1, %s4626_s23  ;;  %892 = vrot.lane.b32.xlu0 %v890_v19, %s4625_s2  ;;  %s4629_s2 = smov 106   ;;  %v1114_v19 = vmul.f32 35.0, %v4856_v0 }
  0xa7   : > { %906 = vrot.lane.b32.xlu1 %v904_v20, %s4626_s23  ;;  %900 = vrot.lane.b32.xlu0 %v4856_v0, %s4627_s1  ;;  %s4630_s23 = smov 105  }
  0xa9   : > { %v4968_v21 = vpop.permute.xlu1 %648  ;;  %v4970_v22 = vpop.permute.xlu0 %639 }
  0xaa   : > { %v642_v15 = vadd.f32 %v4970_v22, %v4856_v0 }
  0xab   : > { %914 = vrot.lane.b32.xlu1 %v4856_v0, %s4628_s27  ;;  %910 = vrot.lane.b32.xlu0 %v4864_v1, %s4627_s1 }
  0xac   : > { %v651_v18 = vadd.f32 %v4968_v21, %v642_v15 }
  0xad   : > { %v4975_v24 = vpop.permute.xlu1 %662  ;;  %v4977_v25 = vpop.permute.xlu0 %644 }
  0xaf   : > { %924 = vrot.lane.b32.xlu1 %v4864_v1, %s4628_s27  ;;  %920 = vrot.lane.b32.xlu0 %v918_v23, %s4627_s1  ;;  %s4631_s1 = smov 104   ;;  %v665_v23 = vadd.f32 %v4975_v24, %v651_v18 }
  0xb1   : > { %v4981_v27 = vpop.permute.xlu1 %654  ;;  %v4983_v28 = vpop.permute.xlu0 %658 }
  0xb3   : > { %934 = vrot.lane.b32.xlu1 %v932_v26, %s4628_s27  ;;  %928 = vrot.lane.b32.xlu0 %v4856_v0, %s4629_s2  ;;  %s4632_s27 = smov 103   ;;  %v647_v26 = vadd.f32 %v4977_v25, %v4864_v1 }
  0xb5   : > { %v4986_v29 = vpop.permute.xlu1 %672  ;;  %v4988_v30 = vpop.permute.xlu0 %668 }
  0xb7   : > { %942 = vrot.lane.b32.xlu1 %v4856_v0, %s4630_s23  ;;  %938 = vrot.lane.b32.xlu0 %v4864_v1, %s4629_s2 }
  0xb9   : > { %v4993_v32 = vpop.permute.xlu1 %682  ;;  %v4995_v33 = vpop.permute.xlu0 %676 }
  0xbb   : > { %952 = vrot.lane.b32.xlu1 %v4864_v1, %s4630_s23  ;;  %948 = vrot.lane.b32.xlu0 %v946_v31, %s4629_s2  ;;  %s4633_s2 = smov 102   ;;  %v1128_v31 = vmul.f32 36.0, %v4856_v0 }
  0xbd   : > { %v4999_v35 = vpop.permute.xlu1 %690  ;;  %v5001_v36 = vpop.permute.xlu0 %686 }
  0xbf   : > { %962 = vrot.lane.b32.xlu1 %v960_v34, %s4630_s23  ;;  %956 = vrot.lane.b32.xlu0 %v4856_v0, %s4631_s1  ;;  %s4634_s23 = smov 101   ;;  %v661_v34 = vadd.f32 %v4983_v28, %v647_v26 }
  0xc1   : > { %v5004_v37 = vpop.permute.xlu1 %700  ;;  %v5006_v38 = vpop.permute.xlu0 %696 }
  0xc3   : > { %970 = vrot.lane.b32.xlu1 %v4856_v0, %s4632_s27  ;;  %966 = vrot.lane.b32.xlu0 %v4864_v1, %s4631_s1 }
  0xc5   : > { %v5011_v40 = vpop.permute.xlu1 %710  ;;  %v5013_v41 = vpop.permute.xlu0 %704 }
  0xc7   : > { %980 = vrot.lane.b32.xlu1 %v4864_v1, %s4632_s27  ;;  %976 = vrot.lane.b32.xlu0 %v974_v39, %s4631_s1  ;;  %s4635_s1 = smov 100   ;;  %v679_v39 = vadd.f32 %v4995_v33, %v665_v23 }
  0xc9   : > { %v5017_v43 = vpop.permute.xlu1 %718  ;;  %v5019_v44 = vpop.permute.xlu0 %714 }
  0xcb   : > { %990 = vrot.lane.b32.xlu1 %v988_v42, %s4632_s27  ;;  %984 = vrot.lane.b32.xlu0 %v4856_v0, %s4633_s2  ;;  %s4636_s27 = smov 99  }
  0xcd   : > { %v5022_v45 = vpop.permute.xlu1 %728  ;;  %v5024_v46 = vpop.permute.xlu0 %724 }
  0xcf   : > { %998 = vrot.lane.b32.xlu1 %v4856_v0, %s4634_s23  ;;  %994 = vrot.lane.b32.xlu0 %v4864_v1, %s4633_s2 }
  0xd1   : > { %v5029_v48 = vpop.permute.xlu1 %738  ;;  %v5031_v49 = vpop.permute.xlu0 %732 }
  0xd3   : > { %1008 = vrot.lane.b32.xlu1 %v4864_v1, %s4634_s23  ;;  %1004 = vrot.lane.b32.xlu0 %v1002_v47, %s4633_s2  ;;  %s4637_s2 = smov 98  }
  0xd5   : > { %v5035_v51 = vpop.permute.xlu1 %746  ;;  %v5037_v52 = vpop.permute.xlu0 %742 }
  0xd7   : > { %1018 = vrot.lane.b32.xlu1 %v1016_v50, %s4634_s23  ;;  %1012 = vrot.lane.b32.xlu0 %v4856_v0, %s4635_s1  ;;  %s4638_s23 = smov 97   ;;  %v675_v50 = vadd.f32 %v4986_v29, %v661_v34  ;;  %v1142_v29 = vmul.f32 37.0, %v4856_v0 }
  0xd9   : > { %v5040_v53 = vpop.permute.xlu1 %756  ;;  %v5042_v54 = vpop.permute.xlu0 %752  ;;  %v689_v24 = vadd.f32 %v5001_v36, %v675_v50 }
  0xdb   : > { %1026 = vrot.lane.b32.xlu1 %v4856_v0, %s4636_s27  ;;  %1022 = vrot.lane.b32.xlu0 %v4864_v1, %s4635_s1  ;;  %v703_v28 = vadd.f32 %v5004_v37, %v689_v24 }
  0xdd   : > { %v5047_v56 = vpop.permute.xlu1 %766  ;;  %v5049_v57 = vpop.permute.xlu0 %760 }
  0xdf   : > { %1036 = vrot.lane.b32.xlu1 %v4864_v1, %s4636_s27  ;;  %1032 = vrot.lane.b32.xlu0 %v1030_v55, %s4635_s1  ;;  %s6867_s1 = smov 96   ;;  %v693_v55 = vadd.f32 %v4999_v35, %v679_v39  ;;  %v717_v35 = vadd.f32 %v5019_v44, %v703_v28 }
  0xe1   : > { %v5053_v59 = vpop.permute.xlu1 %774  ;;  %v5055_v60 = vpop.permute.xlu0 %770  ;;  %v707_v25 = vadd.f32 %v5013_v41, %v693_v55  ;;  %v731_v15 = vadd.f32 %v5022_v45, %v717_v35 }
  0xe3   : > { %1046 = vrot.lane.b32.xlu1 %v1044_v58, %s4636_s27  ;;  %1040 = vrot.lane.b32.xlu0 %v4856_v0, %s4637_s2  ;;  %s4640_s27 = smov 95   ;;  %v745_v18 = vadd.f32 %v5037_v52, %v731_v15  ;;  %v5152_v52 = vrot.slane %v4856_v0, 4 }
  0xe5   : > { %v5058_v61 = vpop.permute.xlu1 %784  ;;  %v5060_v62 = vpop.permute.xlu0 %780 }
  0xe7   : > { %1054 = vrot.lane.b32.xlu1 %v4856_v0, %s4638_s23  ;;  %1050 = vrot.lane.b32.xlu0 %v4864_v1, %s4637_s2 }
  0xe9   : > { %v5065_v2 = vpop.permute.xlu1 %794  ;;  %v5067_v3 = vpop.permute.xlu0 %788 }
  0xea   : > { %6990 = vst [vmem:[#allocation16_spill] sm:$0xff] %v5067_v3 }
  0xeb   : > { %1064 = vrot.lane.b32.xlu1 %v4864_v1, %s4638_s23  ;;  %1060 = vrot.lane.b32.xlu0 %v1058_v63, %s4637_s2  ;;  %s4641_s2 = smov 94  }
  0xed   : > { %v5071_v5 = vpop.permute.xlu1 %802  ;;  %v5073_v6 = vpop.permute.xlu0 %798 }
  0xef   : > { %1074 = vrot.lane.b32.xlu1 %v1072_v4, %s4638_s23  ;;  %1068 = vrot.lane.b32.xlu0 %v4856_v0, %s6867_s1  ;;  %s4642_s23 = smov 93   ;;  %v721_v4 = vadd.f32 %v5017_v43, %v707_v25  ;;  %v1156_v43 = vmul.f32 38.0, %v4856_v0 }
  0xf1   : > { %v5077_v7 = vpop.permute.xlu1 %812  ;;  %v5079_v8 = vpop.permute.xlu0 %808  ;;  %v735_v36 = vadd.f32 %v5031_v49, %v721_v4 }
  0xf3   : > { %1082 = vrot.lane.b32.xlu1 %v4856_v0, %s4640_s27  ;;  %1078 = vrot.lane.b32.xlu0 %v4864_v1, %s6867_s1  ;;  %v5136_v37 = vadd.f32 %v5035_v51, %v735_v36  ;;  %v5147_v51 = vadd.f32 %v5040_v53, %v745_v18 }
  0xf5   : > { %v5085_v10 = vpop.permute.xlu1 %822  ;;  %v5087_v11 = vpop.permute.xlu0 %816  ;;  %v763_v44 = vadd.f32 %v5049_v57, %v5136_v37 }
  0xf6   : > { %6991 = vst [vmem:[#allocation17_spill] sm:$0xff] %v5087_v11 }
  0xf7   : > { %1092 = vrot.lane.b32.xlu1 %v4864_v1, %s4640_s27  ;;  %1088 = vrot.lane.b32.xlu0 %v1086_v9, %s6867_s1  ;;  %v777_v26 = vadd.f32 %v5053_v59, %v763_v44 }
  0xf9   : > { %v5092_v13 = vpop.permute.xlu1 %830  ;;  %v5094_v14 = vpop.permute.xlu0 %826  ;;  %v791_v34 = vadd.f32 %v5067_v3, %v777_v26 }
  0xfb   : > { %1102 = vrot.lane.b32.xlu1 %v1100_v12, %s4640_s27  ;;  %1096 = vrot.lane.b32.xlu0 %v4856_v0, %s4641_s2  ;;  %s4643_s27 = smov 92   ;;  %v805_v55 = vadd.f32 %v5071_v5, %v791_v34 }
  0xfd   : > { %v5099_v16 = vpop.permute.xlu1 %840  ;;  %v5101_v17 = vpop.permute.xlu0 %836  ;;  %v819_v24 = vadd.f32 %v5087_v11, %v805_v55 }
  0xff   : > { %1110 = vrot.lane.b32.xlu1 %v4856_v0, %s4642_s23  ;;  %1106 = vrot.lane.b32.xlu0 %v4864_v1, %s4641_s2  ;;  %v833_v4 = vadd.f32 %v5092_v13, %v819_v24 }
 0x101   : > { %v5107_v20 = vpop.permute.xlu1 %850  ;;  %v5109_v22 = vpop.permute.xlu0 %844 }
 0x103   : > { %1120 = vrot.lane.b32.xlu1 %v4864_v1, %s4642_s23  ;;  %1116 = vrot.lane.b32.xlu0 %v1114_v19, %s4641_s2  ;;  %s4644_s2 = smov 91   ;;  %v6870_v19 = vmov 0  }
 0x104   : > { %1269 = vmatprep.subr.bf16.mxu0 %v6870_v19  ;;  %4207 = vset.pattern.permute.xlu1 %v6870_v19 }
 0x105   : > { %v859_v42 = vpop.permute.xlu1 %858  ;;  %v855_v47 = vpop.permute.xlu0 %854  ;;  %4498 = vset.pattern.permute.xlu0 %v6870_v19 }
 0x107   : > { %1130 = vrot.lane.b32.xlu1 %v1128_v31, %s4642_s23  ;;  %1124 = vrot.lane.b32.xlu0 %v4856_v0, %s4643_s27  ;;  %s4646_s23 = smov 90   ;;  %v773_v31 = vadd.f32 %v5055_v60, %v5147_v51 }
 0x109   : > { %v869_v58 = vpop.permute.xlu1 %868  ;;  %v5123_v63 = vpop.permute.xlu0 %864  ;;  %v787_v53 = vadd.f32 %v5058_v61, %v773_v31 }
 0x10b   : > { %1138 = vrot.lane.b32.xlu1 %v4856_v0, %s4644_s2  ;;  %1134 = vrot.lane.b32.xlu0 %v4864_v1, %s4643_s27  ;;  %v801_v59 = vadd.f32 %v5073_v6, %v787_v53 }
 0x10d   : > { %v5132_v9 = vpop.permute.xlu1 %878  ;;  %v873_v12 = vpop.permute.xlu0 %872  ;;  %v815_v28 = vadd.f32 %v5077_v7, %v801_v59 }
 0x10f   : > { %1148 = vrot.lane.b32.xlu1 %v4864_v1, %s4644_s2  ;;  %1144 = vrot.lane.b32.xlu0 %v1142_v29, %s4643_s27  ;;  %v829_v61 = vadd.f32 %v5094_v14, %v815_v28  ;;  %s6992_s27 = smov 121  }
 0x111   : > { %v887_v23 = vpop.permute.xlu1 %886  ;;  %v883_v45 = vpop.permute.xlu0 %882  ;;  %v843_v29 = vadd.f32 %v5099_v16, %v829_v61 }
 0x113   : > { %1158 = vrot.lane.b32.xlu1 %v1156_v43, %s4644_s2  ;;  %1152 = vrot.lane.b32.xlu0 %v4856_v0, %s4646_s23  ;;  %v857_v7 = vadd.f32 %v855_v47, %v843_v29  ;;  %s6993_s2 = smov 119  }
 0x115   : > { %v897_v39 = vpop.permute.xlu1 %896  ;;  %v5157_v50 = vpop.permute.xlu0 %892  ;;  %v871_v43 = vadd.f32 %v869_v58, %v857_v7 }
 0x117   : > { %1167 = vrot.lane.b32.xlu1 %v5152_v52, %s6865_s25  ;;  %1162 = vrot.lane.b32.xlu0 %v4864_v1, %s4646_s23  ;;  %v847_v1 = vadd.f32 %v5109_v22, %v833_v4  ;;  %v885_v14 = vadd.f32 %v883_v45, %v871_v43  ;;  %s6869_s23 = sand.u32 1, %s4590_s30   ;;  %s6995_s25 = smov 113  }
 0x118   : > { %s7022_s30 = smov 127  }
 0x119   : > { %v5166_v25 = vpop.permute.xlu1 %906  ;;  %v901_v60 = vpop.permute.xlu0 %900  ;;  %v861_v35 = vadd.f32 %v859_v42, %v847_v1  ;;  %v899_v42 = vadd.f32 %v897_v39, %v885_v14 }
 0x11b   : > { %1173 = vrot.lane.b32.xlu1 %v5152_v52, %s6861_s24  ;;  %1170 = vrot.lane.b32.xlu0 %v5152_v52, %s6863_s28  ;;  %v875_v13 = vadd.f32 %v873_v12, %v861_v35  ;;  %s6994_s24 = smov 117   ;;  %s4038_s28 = smul.u32 60, %s6869_s23 }
 0x11c   : > { %s6880_s23 = smov 1  }
 0x11d   : > { %v915_v5 = vpop.permute.xlu1 %914  ;;  %v911_v6 = vpop.permute.xlu0 %910  ;;  %v889_v18 = vadd.f32 %v887_v23, %v875_v13  ;;  %s5196_s1 = scalar_lea.vmem [#allocation2], %s4038_s28  ;;  %s7007_s28 = smov 115  }
 0x11e   : > { %v913_v47 = vadd.f32 %v911_v6, %v899_v42  ;;  %6997 = sst [smem:[#allocation19_spill]] %s5196_s1 }
 0x11f   : > { %1176 = vrot.lane.b32.xlu0 %v5152_v52, %s6992_s27  ;;  %v903_v22 = vadd.f32 %v901_v60, %v889_v18 }
 0x121   : > { %v925_v36 = vpop.permute.xlu1 %924  ;;  %v5179_v15 = vpop.permute.xlu0 %920  ;;  %v917_v26 = vadd.f32 %v915_v5, %v903_v22 }
 0x122   : > { %v927_v23 = vadd.f32 %v925_v36, %v913_v47 }
 0x123   : > { %1179 = vrot.lane.b32.xlu0 %v5152_v52, %s6993_s2 }
 0x125   : > { %v5183_v44 = vpop.permute.xlu1 %934  ;;  %v929_v16 = vpop.permute.xlu0 %928 }
 0x126   : > { %v931_v12 = vadd.f32 %v929_v16, %v917_v26 }
 0x127   : > { %1182 = vrot.lane.b32.xlu0 %v5152_v52, %s6994_s24 }
 0x129   : > { %v943_v31 = vpop.permute.xlu1 %942  ;;  %v939_v58 = vpop.permute.xlu0 %938 }
 0x12a   : > { %v945_v34 = vadd.f32 %v943_v31, %v931_v12  ;;  %v941_v53 = vadd.f32 %v939_v58, %v927_v23 }
 0x12b   : > { %1188 = vrot.lane.b32.xlu0 %v5152_v52, %s6995_s25 }
 0x12c   : > { %v1312_v45 = vsub.f32 %v945_v34, %v819_v24 }
 0x12d   : > { %v953_v39 = vpop.permute.xlu1 %952  ;;  %v5192_v55 = vpop.permute.xlu0 %948 }
 0x12e   : > { %v5194_v59 = vmul.f32 0.11111111, %v1312_v45  ;;  %v1328_v60 = vmul.f32 15.0, %v1312_v45  ;;  %v955_v28 = vadd.f32 %v953_v39, %v941_v53 }
 0x130   : > { %6996 = vst [vmem:[#allocation18_spill] sm:$0xff] %v5194_v59  ;;  %3869 = vst.msk [vmem:[%s5196_s1 + $0x4] sm:$0xf] %vm1823_vm0, %v5194_v59  ;;  %v1314_v4 = vsub.f32 %v955_v28, %v829_v61  ;;  %1330 = vrot.lane.b32.xlu0 %v1328_v60, %s6880_s23  ;;  %v1317_v6 = vmul.f32 %v5194_v59, %v5194_v59  ;;  %v1335_v29 = vmul.f32 4.0, %v5194_v59 }
 0x131   : > { %v5202_v24 = vpop.permute.xlu1 %962  ;;  %v957_v1 = vpop.permute.xlu0 %956 }
 0x132   : > { %v1316_v5 = vmul.f32 0.11111111, %v1314_v4  ;;  %v959_v26 = vadd.f32 %v957_v1, %v945_v34 }
 0x134   : > { %v1318_v35 = vsub.f32 %v1316_v5, %v1317_v6  ;;  %1337 = vrot.lane.b32.xlu0 %v1335_v29, %s6880_s23 }
 0x135   : > { %v971_v7 = vpop.permute.xlu1 %970  ;;  %v967_v13 = vpop.permute.xlu0 %966 }
 0x136   : > { %v5208_v36 = vmax.f32 %v1318_v35, 0.0  ;;  %v973_v31 = vadd.f32 %v971_v7, %v959_v26  ;;  %v969_v53 = vadd.f32 %v967_v13, %v955_v28 }
 0x138   : > { %6998 = vst [vmem:[#allocation20_spill] sm:$0xff] %v5208_v36  ;;  %4501 = vrsqrt.f32 %v5208_v36  ;;  %vm1322_vm1 = vcmp.eq.f32.partialorder %v5208_v36, inf  ;;  %v1325_v12 = vand.u32 2147483648, %v5208_v36  ;;  %vm1324_vm2 = vcmp.eq.f32.partialorder %v5208_v36, 0.0 }
 0x139   : > { %v981_v61 = vpop.permute.xlu1 %980  ;;  %v5211_v43 = vpop.permute.xlu0 %976 }
 0x13a   : > { %6999 = vst [vmem:[#allocation21_spill] sm:$0xff] %v5211_v43  ;;  %v983_v4 = vadd.f32 %v981_v61, %v969_v53 }
 0x13d   : > { %v5213_v18 = vpop.permute.xlu1 %990  ;;  %v985_v14 = vpop.permute.xlu0 %984 }
 0x13e   : > { %7000 = vst [vmem:[#allocation22_spill] sm:$0xff] %v5213_v18  ;;  %v987_v39 = vadd.f32 %v985_v14, %v973_v31 }
 0x141   : > { %v999_v22 = vpop.permute.xlu1 %998  ;;  %v995_v16 = vpop.permute.xlu0 %994 }
 0x142   : > { %v4502_v42 = vpop.eup %4501  ;;  %v1001_v1 = vadd.f32 %v999_v22, %v987_v39  ;;  %v997_v29 = vadd.f32 %v995_v16, %v983_v4 }
 0x143   : > { %v1321_v47 = vmul.f32 %v4502_v42, %v5208_v36 }
 0x145   : > { %v1323_v58 = vsel %vm1322_vm1, %v5208_v36, %v1321_v47  ;;  %v1009_v23 = vpop.permute.xlu1 %1008  ;;  %v5220_v45 = vpop.permute.xlu0 %1004 }
 0x146   : > { %7001 = vst [vmem:[#allocation23_spill] sm:$0xff] %v5220_v45  ;;  %v1326_v60 = vsel %vm1324_vm2, %v1325_v12, %v1323_v58  ;;  %v1011_v7 = vadd.f32 %v1009_v23, %v997_v29 }
 0x147   : > { %v5222_v34 = vmul.f32 3.0, %v1326_v60 }
 0x149   : > { %v5224_v5 = vpop.permute.xlu1 %1018  ;;  %v1013_v6 = vpop.permute.xlu0 %1012  ;;  %1824 = vst.msk [vmem:[%s5196_s1] sm:$0xf] %vm1823_vm0, %v5222_v34  ;;  %vm1364_vm6 = vcmp.gt.f32.partialorder %v5222_v34, 0.0 }
 0x14a   : > { %7002 = vst [vmem:[#allocation24_spill] sm:$0xff] %v5224_v5  ;;  %v1015_v35 = vadd.f32 %v1013_v6, %v1001_v1 }
 0x14c   : > { %v1837_v42 = vsub.f32 %v1015_v35, %v5136_v37 }
 0x14d   : > { %v1027_v26 = vpop.permute.xlu1 %1026  ;;  %v1023_v28 = vpop.permute.xlu0 %1022 }
 0x14e   : > { %v5230_v13 = vmul.f32 0.05263158, %v1837_v42  ;;  %v1853_v14 = vmul.f32 10.0, %v1837_v42  ;;  %v1025_v47 = vadd.f32 %v1023_v28, %v1011_v7 }
 0x150   : > { %7003 = vst [vmem:[#allocation25_spill] sm:$0xff] %v5230_v13  ;;  %3879 = vst.msk [vmem:[%s5196_s1 + $0x18] sm:$0xf] %vm1823_vm0, %v5230_v13  ;;  %v1839_v61 = vsub.f32 %v1025_v47, %v5147_v51  ;;  %1855 = vrot.lane.b32.xlu1 %v1853_v14, %s6880_s23  ;;  %v1842_v16 = vmul.f32 %v5230_v13, %v5230_v13  ;;  %v1860_v31 = vmul.f32 9.0, %v5230_v13 }
 0x151   : > { %v1037_v22 = vpop.permute.xlu1 %1036  ;;  %v5237_v12 = vpop.permute.xlu0 %1032 }
 0x152   : > { %7004 = vst [vmem:[#allocation26_spill] sm:$0xff] %v5237_v12  ;;  %v1841_v37 = vmul.f32 0.05263158, %v1839_v61 }
 0x154   : > { %v1843_v58 = vsub.f32 %v1841_v37, %v1842_v16  ;;  %1862 = vrot.lane.b32.xlu1 %v1860_v31, %s6880_s23  ;;  %s7013_s23 = smov 112  }
 0x155   : > { %v5243_v23 = vpop.permute.xlu1 %1046  ;;  %v1041_v53 = vpop.permute.xlu0 %1040 }
 0x156   : > { %7005 = vst [vmem:[#allocation27_spill] sm:$0xff] %v5243_v23  ;;  %v5245_v39 = vmax.f32 %v1843_v58, 0.0 }
 0x158   : > { %7006 = vst [vmem:[#allocation28_spill] sm:$0xff] %v5245_v39  ;;  %4503 = vrsqrt.f32 %v5245_v39  ;;  %1185 = vrot.lane.b32.xlu1 %v5152_v52, %s7007_s28  ;;  %vm1847_vm3 = vcmp.eq.f32.partialorder %v5245_v39, inf  ;;  %v1850_v28 = vand.u32 2147483648, %v5245_v39  ;;  %vm1849_vm4 = vcmp.eq.f32.partialorder %v5245_v39, 0.0  ;;  %s7063_s28 = smov 13  }
 0x159   : > { %v1055_v51 = vpop.permute.xlu1 %1054  ;;  %v1051_v60 = vpop.permute.xlu0 %1050 }
 0x15d   : > { %v1065_v4 = vpop.permute.xlu1 %1064  ;;  %v5250_v1 = vpop.permute.xlu0 %1060 }
 0x15e   : > { %7008 = vst [vmem:[#allocation29_spill] sm:$0xff] %v5250_v1  ;;  %v1039_v1 = vadd.f32 %v1037_v22, %v1025_v47 }
 0x160   : > { %v1053_v23 = vadd.f32 %v1051_v60, %v1039_v1 }
 0x161   : > { %v5252_v6 = vpop.permute.xlu1 %1074  ;;  %v1069_v29 = vpop.permute.xlu0 %1068 }
 0x162   : > { %7009 = vst [vmem:[#allocation30_spill] sm:$0xff] %v5252_v6  ;;  %v4504_v7 = vpop.eup %4503  ;;  %v1029_v6 = vadd.f32 %v1027_v26, %v1015_v35  ;;  %v1067_v3 = vadd.f32 %v1065_v4, %v1053_v23  ;;  %v657_v35 = vadd.f32 %v4981_v27, %v4856_v0 }
 0x163   : > { %v1846_v42 = vmul.f32 %v4504_v7, %v5245_v39 }
 0x164   : > { %v671_v23 = vadd.f32 %v4988_v30, %v657_v35 }
 0x165   : > { %v1848_v14 = vsel %vm1847_vm3, %v5245_v39, %v1846_v42  ;;  %v1083_v52 = vpop.permute.xlu1 %1082  ;;  %v1079_v61 = vpop.permute.xlu0 %1078  ;;  %v1043_v39 = vadd.f32 %v1041_v53, %v1029_v6  ;;  %vm1474_vm3 = vcmask 1041408  }
 0x166   : > { %v1851_v16 = vsel %vm1849_vm4, %v1850_v28, %v1848_v14  ;;  %vm1521_vm4 = vcmask 31744  }
 0x167   : > { %v5259_v37 = vmul.f32 4.358899, %v1851_v16  ;;  %v1057_v28 = vadd.f32 %v1055_v51, %v1043_v39 }
 0x169   : > { %3878 = vst.msk [vmem:[%s5196_s1 + $0x14] sm:$0xf] %vm1823_vm0, %v5259_v37  ;;  %v1093_v31 = vpop.permute.xlu1 %1092  ;;  %v5264_v58 = vpop.permute.xlu0 %1088  ;;  %v1071_v12 = vadd.f32 %v1069_v29, %v1057_v28  ;;  %vm1889_vm9 = vcmp.gt.f32.partialorder %v5259_v37, 0.0 }
 0x16a   : > { %7010 = vst [vmem:[#allocation31_spill] sm:$0xff] %v5264_v58 }
 0x16b   : > { %v1085_v11 = vadd.f32 %v1083_v52, %v1071_v12 }
 0x16d   : > { %v5266_v7 = vpop.permute.xlu1 %1102  ;;  %v1097_v19 = vpop.permute.xlu0 %1096 }
 0x16e   : > { %7011 = vst [vmem:[#allocation32_spill] sm:$0xff] %v5266_v7  ;;  %v1081_v7 = vadd.f32 %v1079_v61, %v1067_v3  ;;  %v1099_v45 = vadd.f32 %v1097_v19, %v1085_v11  ;;  %v685_v19 = vadd.f32 %v4993_v32, %v671_v23 }
 0x170   : > { %v1095_v18 = vadd.f32 %v1093_v31, %v1081_v7  ;;  %v699_v27 = vadd.f32 %v5006_v38, %v685_v19  ;;  %v1309_v19 = vld [vmem:[%s7016_s19] sm:$0xff]  ;;  %s7047_s19 = smov 19  }
 0x171   : > { %v1111_v36 = vpop.permute.xlu1 %1110  ;;  %v1107_v13 = vpop.permute.xlu0 %1106 }
 0x172   : > { %v1113_v43 = vadd.f32 %v1111_v36, %v1099_v45  ;;  %v1109_v47 = vadd.f32 %v1107_v13, %v1095_v18  ;;  %v713_v30 = vadd.f32 %v5011_v40, %v699_v27 }
 0x174   : > { %v727_v1 = vadd.f32 %v5024_v46, %v713_v30  ;;  %v7014_v46 = vmov 0  }
 0x175   : > { %v1121_v42 = vpop.permute.xlu1 %1120  ;;  %v5268_v59 = vpop.permute.xlu0 %1116 }
 0x176   : > { %v1123_v39 = vadd.f32 %v1121_v42, %v1109_v47  ;;  %v741_v52 = vadd.f32 %v5029_v48, %v727_v1 }
 0x179   : > { %v5270_v14 = vpop.permute.xlu1 %1130  ;;  %v1125_v16 = vpop.permute.xlu0 %1124 }
 0x17a   : > { %v1127_v22 = vadd.f32 %v1125_v16, %v1113_v43 }
 0x17d   : > { %v1139_v58 = vpop.permute.xlu1 %1138  ;;  %v1135_v5 = vpop.permute.xlu0 %1134 }
 0x17e   : > { %v1141_v51 = vadd.f32 %v1139_v58, %v1127_v22  ;;  %v1137_v3 = vadd.f32 %v1135_v5, %v1123_v39 }
 0x181   : > { %v1149_v26 = vpop.permute.xlu1 %1148  ;;  %v5274_v53 = vpop.permute.xlu0 %1144 }
 0x182   : > { %v1151_v36 = vadd.f32 %v1149_v26, %v1137_v3 }
 0x185   : > { %v5277_v12 = vpop.permute.xlu1 %1158  ;;  %v1153_v60 = vpop.permute.xlu0 %1152 }
 0x186   : > { %v1155_v11 = vadd.f32 %v1153_v60, %v1141_v51 }
 0x188   : > { %v5280_v45 = vmul.f32 0.025641026, %v1155_v11 }
 0x189   : > { %v1163_v4 = vpop.permute.xlu0 %1162  ;;  %v1168_v43 = vpop.permute.xlu1 %1167 }
 0x18a   : > { %7012 = vst [vmem:[#allocation33_spill] sm:$0xff] %v5280_v45  ;;  %3891 = vst.msk [vmem:[%s5196_s1 + $0x2c] sm:$0xf] %vm1823_vm0, %v5280_v45  ;;  %v1165_v18 = vadd.f32 %v1163_v4, %v1151_v36  ;;  %v1192_v5 = vsel %vm1191_vm5, %v4856_v0, %v1168_v43  ;;  %v2564_v32 = vmul.f32 %v5280_v45, %v5280_v45 }
 0x18b   : > { %v5298_v0 = vadd.f32 %v5042_v54, %v741_v52  ;;  %v7020_v52 = vld [vmem:[#allocation23_spill] sm:$0xff] }
 0x18c   : > { %v2563_v13 = vmul.f32 0.025641026, %v1165_v18 }
 0x18d   : > { %v1171_v6 = vpop.permute.xlu0 %1170  ;;  %v1174_v40 = vpop.permute.xlu1 %1173 }
 0x18e   : > { %v2565_v38 = vsub.f32 %v2563_v13, %v2564_v32  ;;  %v1193_v29 = vsel %vm1191_vm5, %v4968_v21, %v1171_v6  ;;  %v769_v21 = vadd.f32 %v5047_v56, %v5298_v0  ;;  %v5307_v48 = vsel %vm1191_vm5, %v4995_v33, %v1174_v40  ;;  %v7021_v40 = vld [vmem:[#allocation24_spill] sm:$0xff] }
 0x18f   : > { %v4177_v61 = vpack.i.bf16 %v1193_v29, %v1192_v5  ;;  %v1244_v31 = vpack.c.bf16 %v1193_v29, %v1192_v5  ;;  %v1365_v33 = vsel %vm1364_vm6, %v5222_v34, 1.0  ;;  %v7017_v5 = vld [vmem:[#allocation21_spill] sm:$0xff]  ;;  %v2576_v13 = vmul.f32 19.0, %v5280_v45 }
 0x190   : > { %v5295_v58 = vmax.f32 %v2565_v38, 0.0  ;;  %v783_v16 = vadd.f32 %v5060_v62, %v769_v21  ;;  %v7018_v38 = vld [vmem:[#allocation22_spill] sm:$0xff] }
 0x191   : > { %4178 = vrot.lane.b32.xlu1 %v4177_v61, %s7013_s23  ;;  %1270 = vmatpush1.bf16.msra.mxu0 %v1244_v31  ;;  %v1177_v7 = vpop.permute.xlu0 %1176 }
 0x192   : > { %4505 = vrsqrt.f32 %v5295_v58  ;;  %1271 = vmatprep.subr.bf16.mxu0 %v7014_v46  ;;  %v1195_v42 = vsel %vm1191_vm5, %v5013_v41, %v1177_v7  ;;  %v797_v56 = vadd.f32 %v5065_v2, %v783_v16  ;;  %vm2569_vm7 = vcmp.eq.f32.partialorder %v5295_v58, inf }
 0x193   : > { %v4182_v54 = vpack.i.bf16 %v1195_v42, %v5307_v48  ;;  %v1245_v28 = vpack.c.bf16 %v1195_v42, %v5307_v48  ;;  %4507 = vrcp.f32 %v1365_v33  ;;  %vm2571_vm8 = vcmp.eq.f32.partialorder %v5295_v58, 0.0 }
 0x194   : > { %v811_v26 = vadd.f32 %v5079_v8, %v797_v56 }
 0x195   : > { %v1180_v35 = vpop.permute.xlu0 %1179  ;;  %4183 = vrot.lane.b32.xlu1 %v4182_v54, %s7013_s23  ;;  %1272 = vmatpush1.bf16.msra.mxu0 %v1245_v28 }
 0x196   : > { %1273 = vmatprep.subr.bf16.mxu0 %v7014_v46  ;;  %v1196_v62 = vsel %vm1191_vm5, %v5031_v49, %v1180_v35  ;;  %v825_v39 = vadd.f32 %v5085_v10, %v811_v26  ;;  %v2572_v49 = vand.u32 2147483648, %v5295_v58  ;;  %v7023_v26 = vld [vmem:[#allocation17_spill] sm:$0xff] }
 0x198   : > { %v839_v60 = vadd.f32 %v5101_v17, %v825_v39 }
 0x199   : > { %v1183_v47 = vpop.permute.xlu0 %1182 }
 0x19a   : > { %v1197_v22 = vsel %vm1191_vm5, %v5049_v57, %v1183_v47  ;;  %v853_v57 = vadd.f32 %v5107_v20, %v839_v60 }
 0x19b   : > { %v4187_v51 = vpack.i.bf16 %v1197_v22, %v1196_v62  ;;  %v1246_v23 = vpack.c.bf16 %v1197_v22, %v1196_v62 }
 0x19c   : > { %v4506_v2 = vpop.eup %4505  ;;  %v867_v17 = vadd.f32 %v5123_v63, %v853_v57 }
 0x19d   : > { %v2568_v3 = vmul.f32 %v4506_v2, %v5295_v58  ;;  %4188 = vrot.lane.b32.xlu1 %v4187_v51, %s7013_s23  ;;  %1274 = vmatpush1.bf16.msra.mxu0 %v1246_v23  ;;  %v4508_v20 = vpop.eup %4507  ;;  %v5404_v23 = vld [vmem:[%s7025_s17] sm:$0x77]  ;;  %s6919_s17 = smov 17  }
 0x19e   : > { %1275 = vmatprep.subr.bf16.mxu0 %v7014_v46  ;;  %v881_v36 = vadd.f32 %v5132_v9, %v867_v17  ;;  %v5351_v63 = vsel %vm1364_vm6, %v4508_v20, 0.0  ;;  %v1189_v9 = vpop.permute.xlu0 %1188  ;;  %v3862_v2 = vcombine.high %v5404_v23, %v5404_v23 }
 0x19f   : > { %v2570_v8 = vsel %vm2569_vm7, %v5295_v58, %v2568_v3  ;;  %v1199_v47 = vsel %vm1191_vm5, %v7023_v26, %v1189_v9 }
 0x1a0   : > { %v2573_v10 = vsel %vm2571_vm8, %v2572_v49, %v2570_v8  ;;  %v895_v27 = vadd.f32 %v5157_v50, %v881_v36  ;;  %v1890_v50 = vsel %vm1889_vm9, %v5259_v37, 1.0  ;;  %v4202_v49 = vpack.i.bf16 %v5013_v41, %v5307_v48  ;;  %3863 = vmatprep.mubr.msk.bf16.mxu0 %vm1261_vm10, %v3862_v2 }
 0x1a1   : > { %v5337_v11 = vmul.f32 6.244998, %v2573_v10  ;;  %4198 = vrot.lane.b32.xlu1 %v4177_v61, %s7015_s20  ;;  %4509 = vrcp.f32 %v1890_v50 }
 0x1a2   : > { %v909_v4 = vadd.f32 %v5166_v25, %v895_v27 }
 0x1a3   : > { %3890 = vst.msk [vmem:[%s5196_s1 + $0x28] sm:$0xf] %vm1823_vm0, %v5337_v11  ;;  %vm2605_vm6 = vcmp.gt.f32.partialorder %v5337_v11, 0.0 }
 0x1a4   : > { %v923_v43 = vadd.f32 %v5179_v15, %v909_v4  ;;  %v1331_v15 = vpop.permute.xlu0 %1330 }
 0x1a5   : > { %1374 = vperm.xlu1 %4207, %v1309_v19  }
 0x1a6   : > { %v937_v18 = vadd.f32 %v5183_v44, %v923_v43  ;;  %v6942_v43 = vmov 0.0  }
 0x1a7   : > { %3936 = vmatprep.subr.bf16.mxu1 %v6942_v43  ;;  %3942 = vmatprep.mubr.msk.bf16.mxu1 %vm4665_vm11, %v6942_v43 }
 0x1a8   : > { %v951_v25 = vadd.f32 %v5192_v55, %v937_v18  ;;  %v1338_v1 = vpop.permute.xlu0 %1337 }
 0x1a9   : > { %1383 = vrot.lane.b32.xlu1 %v5351_v63, %s6889_s0  ;;  %s6893_s0 = smov 22  }
 0x1aa   : > { %v1313_v34 = vsub.f32 %v951_v25, %v825_v39  ;;  %v965_v44 = vadd.f32 %v5202_v24, %v951_v25 }
 0x1ab   : > { %v4510_v6 = vpop.eup %4509 }
 0x1ac   : > { %v1333_v30 = vsub.f32 %v1313_v34, %v1331_v15  ;;  %v979_v55 = vadd.f32 %v7017_v5, %v965_v44  ;;  %v5376_v24 = vsel %vm1889_vm9, %v4510_v6, 0.0 }
 0x1ad   : > { %1391 = vrot.lane.b32.xlu1 %v5351_v63, %s6891_s22  ;;  %s7019_s22 = smov 1  }
 0x1ae   : > { %v1334_v32 = vmul.f32 0.11111111, %v1333_v30  ;;  %v993_v29 = vadd.f32 %v7018_v38, %v979_v55 }
 0x1b0   : > { %v1007_v61 = vadd.f32 %v7020_v52, %v993_v29  ;;  %v1340_v31 = vsub.f32 %v1334_v32, %v1338_v1  ;;  %v7028_v1 = vld [vmem:[#allocation26_spill] sm:$0xff] }
 0x1b1   : > { %1399 = vrot.lane.b32.xlu1 %v5351_v63, %s6895_s3  ;;  %s6899_s3 = smov 13  }
 0x1b2   : > { %v5379_v7 = vadd.f32 %v7021_v40, %v1007_v61  ;;  %v5383_v21 = vmul.f32 0.15, %v1340_v31  ;;  %v7029_v31 = vld [vmem:[#allocation27_spill] sm:$0xff] }
 0x1b4   : > { %v1838_v42 = vsub.f32 %v5379_v7, %v5298_v0  ;;  %v1342_v28 = vmul.f32 4.0, %v5383_v21  ;;  %v7024_v0 = vld [vmem:[#allocation16_spill] sm:$0xff]  ;;  %v1348_v41 = vmul.f32 %v5383_v21, %v5383_v21  ;;  %v1035_v6 = vadd.f32 %v7028_v1, %v5379_v7 }
 0x1b5   : > { %1407 = vrot.lane.b32.xlu1 %v5351_v63, %s6893_s0  ;;  %s6901_s0 = smov 11  }
 0x1b6   : > { %v1349_v48 = vmul.f32 6.6666665, %v1348_v41  ;;  %v1049_v40 = vadd.f32 %v7029_v31, %v1035_v6 }
 0x1b9   : > { %2578 = vrot.lane.b32.xlu1 %v2576_v13, %s7019_s22 }
 0x1bd   : > { %1903 = vrot.lane.b32.xlu1 %v5376_v24, %s6901_s0  ;;  %s6909_s0 = smov 19  }
 0x1c1   : > { %1911 = vrot.lane.b32.xlu1 %v5376_v24, %s6899_s3  ;;  %s6903_s3 = smov 27  }
 0x1c2   : > { %v1856_v54 = vpop.permute.xlu1 %1855 }
 0x1c3   : > { %v1858_v37 = vsub.f32 %v1838_v42, %v1856_v54 }
 0x1c5   : > { %v1859_v16 = vmul.f32 0.05263158, %v1858_v37  ;;  %1344 = vrot.lane.b32.xlu1 %v1342_v28, %s7022_s30  ;;  %v7030_v28 = vld [vmem:[#allocation29_spill] sm:$0xff] }
 0x1c6   : > { %v1863_v35 = vpop.permute.xlu1 %1862 }
 0x1c7   : > { %v1865_v56 = vsub.f32 %v1859_v16, %v1863_v35  ;;  %v1063_v16 = vadd.f32 %v7030_v28, %v1049_v40 }
 0x1c9   : > { %1919 = vrot.lane.b32.xlu1 %v5376_v24, %s6905_s21  ;;  %v5395_v62 = vmul.f32 0.033333335, %v1865_v56 }
 0x1ca   : > { %v1186_v33 = vpop.permute.xlu1 %1185 }
 0x1cb   : > { %v1198_v22 = vsel %vm1191_vm5, %v7024_v0, %v1186_v33  ;;  %v1867_v60 = vmul.f32 9.0, %v5395_v62  ;;  %v1873_v3 = vmul.f32 %v5395_v62, %v5395_v62  ;;  %v7031_v33 = vld [vmem:[#allocation18_spill] sm:$0xff]  ;;  %v7032_v0 = vld [vmem:[#allocation30_spill] sm:$0xff] }
 0x1cc   : > { %v4192_v39 = vpack.i.bf16 %v1199_v47, %v1198_v22  ;;  %v1247_v51 = vpack.c.bf16 %v1199_v47, %v1198_v22  ;;  %v1077_v22 = vadd.f32 %v7032_v0, %v1063_v16 }
 0x1cd   : > { %1967 = vrot.lane.b32.xlu1 %v5376_v24, %s6903_s3  ;;  %v1874_v57 = vmul.f32 30.0, %v1873_v3  ;;  %s6921_s3 = smov 21  }
 0x1ce   : > { %4193 = vrot.lane.b32.xlu0 %v4192_v39, %s7013_s23  ;;  %1276 = vmatpush1.bf16.msra.mxu0 %v1247_v51  ;;  %v7033_v51 = vld [vmem:[#allocation31_spill] sm:$0xff] }
 0x1cf   : > { %1277 = vmatprep.subr.bf16.mxu0 %v7014_v46  ;;  %v1091_v2 = vadd.f32 %v7033_v51, %v1077_v22 }
 0x1d1   : > { %1869 = vrot.lane.b32.xlu1 %v1867_v60, %s7022_s30 }
 0x1d2   : > { %4203 = vrot.lane.b32.xlu0 %v4202_v49, %s7015_s20  ;;  %s6928_s20 = smov 24  }
 0x1d5   : > { %1876 = vrot.lane.b32.xlu1 %v1874_v57, %s7022_s30  ;;  %v7034_v57 = vld [vmem:[#allocation32_spill] sm:$0xff] }
 0x1d6   : > { %1379 = vrot.lane.b32.xlu0 %v5351_v63, %s6905_s21  ;;  %s6913_s21 = smov 10   ;;  %v1105_v41 = vadd.f32 %v7034_v57, %v1091_v2 }
 0x1d9   : > { %1971 = vrot.lane.b32.xlu1 %v5376_v24, %s6907_s16  ;;  %s6917_s16 = smov 12  }
 0x1da   : > { %1387 = vrot.lane.b32.xlu0 %v5351_v63, %s6919_s17 }
 0x1de   : > { %1395 = vrot.lane.b32.xlu0 %v5351_v63, %s6909_s0  ;;  %s6915_s0 = smov 14  }
 0x1e2   : > { %1403 = vrot.lane.b32.xlu0 %v5351_v63, %s6921_s3  ;;  %s7041_s3 = smov 123  }
 0x1e6   : > { %1411 = vrot.lane.b32.xlu0 %v5351_v63, %s6911_s9  ;;  %s7026_s9 = smov 16  }
 0x1ea   : > { %1899 = vrot.lane.b32.xlu0 %v5376_v24, %s6913_s21  ;;  %s7027_s21 = smov 18  }
 0x1ee   : > { %1907 = vrot.lane.b32.xlu0 %v5376_v24, %s6917_s16  ;;  %s7038_s16 = smov 125  }
 0x1f2   : > { %1830 = vrot.lane.b32.xlu0 %v5383_v21, %s7022_s30 }
 0x1f6   : > { %1351 = vrot.lane.b32.xlu0 %v1349_v48, %s7022_s30  ;;  %v1119_v48 = vadd.f32 %v5268_v59, %v1105_v41 }
 0x1fa   : > { %1915 = vrot.lane.b32.xlu0 %v5376_v24, %s6915_s0  ;;  %s7035_s0 = smov 126  }
 0x1fe   : > { %1923 = vrot.lane.b32.xlu0 %v5376_v24, %s7026_s9 }
 0x202   : > { %1927 = vrot.lane.b32.xlu0 %v5376_v24, %s6919_s17  ;;  %s7039_s17 = smov 124  }
 0x203   : > { %v4179_v8 = vpop.permute.xlu1 %4178 }
 0x204   : > { %v4181_v10 = vunpack.i.h.bf16 %v4179_v8  ;;  %v4180_v17 = vunpack.i.l.bf16 %v4179_v8 }
 0x206   : > { %1931 = vrot.lane.b32.xlu0 %v5376_v24, %s7027_s21  ;;  %v1248_v19 = vpack.c.bf16 %v4181_v10, %v4180_v17 }
 0x207   : > { %v4184_v36 = vpop.permute.xlu1 %4183 }
 0x208   : > { %1278 = vmatpush1.bf16.msra.mxu0 %v1248_v19  ;;  %v4186_v20 = vunpack.i.h.bf16 %v4184_v36  ;;  %v4185_v27 = vunpack.i.l.bf16 %v4184_v36  ;;  %v3861_v19 = vcombine.low %v5404_v23, %v5404_v23  ;;  %v5488_v36 = vld [vmem:[%s4853_s26] sm:$0xf]  ;;  %s7058_s26 = smov 15  }
 0x209   : > { %1279 = vmatprep.subr.bf16.mxu0 %v7014_v46 }
 0x20a   : > { %v1249_v4 = vpack.c.bf16 %v4186_v20, %v4185_v27 }
 0x20c   : > { %1280 = vmatpush1.bf16.msra.mxu0 %v1249_v4  ;;  %v1133_v4 = vadd.f32 %v5270_v14, %v1119_v48 }
 0x20d   : > { %1281 = vmatprep.subr.bf16.mxu0 %v7014_v46 }
 0x20e   : > { %v1147_v59 = vadd.f32 %v5274_v53, %v1133_v4 }
 0x20f   : > { %v4189_v9 = vpop.permute.xlu1 %4188 }
 0x210   : > { %v4191_v18 = vunpack.i.h.bf16 %v4189_v9  ;;  %v4190_v50 = vunpack.i.l.bf16 %v4189_v9  ;;  %v1161_v14 = vadd.f32 %v5277_v12, %v1147_v59 }
 0x212   : > { %v1250_v25 = vpack.c.bf16 %v4191_v18, %v4190_v50  ;;  %v2575_v31 = vmul.f32 0.025641026, %v1161_v14 }
 0x213   : > { %v4199_v15 = vpop.permute.xlu1 %4198 }
 0x214   : > { %1282 = vmatpush1.bf16.msra.mxu0 %v1250_v25  ;;  %v4201_v42 = vunpack.i.h.bf16 %v4199_v15  ;;  %v4200_v54 = vunpack.i.l.bf16 %v4199_v15  ;;  %v7036_v25 = vld [vmem:[#allocation25_spill] sm:$0xff] }
 0x215   : > { %1283 = vmatprep.subr.bf16.mxu0 %v7014_v46 }
 0x216   : > { %v1252_v39 = vpack.c.bf16 %v4201_v42, %v4200_v54 }
 0x224   : > { %v5454_v34 = vpop.permute.xlu1 %1374 }
 0x228   : > { %v5456_v30 = vpop.permute.xlu1 %1383 }
 0x229   : > { %v1386_v12 = vmul.f32 %v5488_v36, %v5456_v30 }
 0x22c   : > { %v1392_v44 = vpop.permute.xlu1 %1391 }
 0x22d   : > { %v1394_v20 = vmul.f32 %v5488_v36, %v1392_v44 }
 0x22f   : > { %v1425_v23 = vrot.slane %v1394_v20, 4 }
 0x230   : > { %v1400_v5 = vpop.permute.xlu1 %1399 }
 0x231   : > { %v1402_v50 = vmul.f32 %v5488_v36, %v1400_v5 }
 0x233   : > { %v1434_v5 = vrot.slane %v1402_v50, 4 }
 0x234   : > { %v1408_v55 = vpop.permute.xlu1 %1407 }
 0x235   : > { %v1410_v6 = vmul.f32 %v5488_v36, %v1408_v55 }
 0x237   : > { %v1443_v54 = vrot.slane %v1410_v6, 4 }
 0x238   : > { %v5458_v32 = vpop.permute.xlu1 %2578 }
 0x23c   : > { %v5460_v13 = vpop.permute.xlu1 %1903 }
 0x240   : > { %v5464_v38 = vpop.permute.xlu1 %1911  ;;  %v4194_v29 = vpop.permute.xlu0 %4193 }
 0x241   : > { %v4196_v52 = vunpack.i.h.bf16 %v4194_v29  ;;  %v4195_v61 = vunpack.i.l.bf16 %v4194_v29  ;;  %v7040_v29 = vld [vmem:[#allocation28_spill] sm:$0xff]  ;;  %v1914_v48 = vmul.f32 %v5488_v36, %v5464_v38 }
 0x243   : > { %v1251_v37 = vpack.c.bf16 %v4196_v52, %v4195_v61  ;;  %v1985_v4 = vrot.slane %v1914_v48, 4 }
 0x244   : > { %v1345_v35 = vpop.permute.xlu1 %1344  ;;  %v4204_v56 = vpop.permute.xlu0 %4203 }
 0x245   : > { %v5469_v26 = vsub.f32 %v7031_v33, %v1345_v35  ;;  %v4206_v47 = vunpack.i.h.bf16 %v4204_v56  ;;  %v4205_v7 = vunpack.i.l.bf16 %v4204_v56  ;;  %1284 = vmatpush1.bf16.msra.mxu0 %v1251_v37  ;;  %v2581_v37 = vsub.f32 %v2575_v31, %v5458_v32 }
 0x246   : > { %1285 = vmatprep.subr.bf16.mxu0 %v7014_v46  ;;  %v1416_v35 = vrot.slane %v1386_v12, 4 }
 0x247   : > { %3872 = vst.msk [vmem:[%s5196_s1 + $0x10] sm:$0xf] %vm1823_vm0, %v5469_v26  ;;  %v1253_v49 = vpack.c.bf16 %v4206_v47, %v4205_v7  ;;  %v5522_v56 = vmul.f32 0.007894737, %v2581_v37  ;;  %v1906_v7 = vmul.f32 %v5488_v36, %v5460_v13 }
 0x248   : > { %v5477_v60 = vpop.permute.xlu1 %1919  ;;  %v5479_v3 = vpop.permute.xlu0 %1379 }
 0x249   : > { %1286 = vmatpush1.bf16.msra.mxu0 %v1252_v39  ;;  %v1267_v17 = vsel %vm1265_vm12, %v1253_v49, 0  ;;  %7044 = vst [vmem:[#allocation22_spill] sm:$0xff] %v5522_v56  ;;  %v2589_v47 = vmul.f32 %v5522_v56, %v5522_v56  ;;  %v1976_v49 = vrot.slane %v1906_v7, 4  ;;  %v1922_v59 = vmul.f32 %v5488_v36, %v5477_v60  ;;  %v1766_v7 = vld [vmem:[%s7051_s6] sm:$0x1]  ;;  %s7054_s6 = smov 25  }
 0x24a   : > { %1287 = vmatprep.subr.bf16.mxu0 %v7014_v46 }
 0x24b   : > { %v2590_v51 = vmul.f32 126.666664, %v2589_v47 }
 0x24c   : > { %v1968_v8 = vpop.permute.xlu1 %1967  ;;  %v1388_v10 = vpop.permute.xlu0 %1387 }
 0x24d   : > { %v1390_v27 = vmul.f32 %v5488_v36, %v1388_v10  ;;  %1288 = vmatpush1.bf16.msra.mxu0 %v1267_v17  ;;  %v1970_v32 = vmul.f32 %v5488_v36, %v1968_v8  ;;  %v7048_v17 = vld [vmem:[#allocation20_spill] sm:$0xff] }
 0x24e   : > { %3968 = vmatprep.subr.bf16.mxu0 %v6942_v43 }
 0x24f   : > { %1421 = vrot.lane.b32.xlu0 %v1390_v27, %s7035_s0  ;;  %v2052_v39 = vrot.slane %v1970_v32, 4 }
 0x250   : > { %v1870_v9 = vpop.permute.xlu1 %1869  ;;  %v1396_v18 = vpop.permute.xlu0 %1395  ;;  %1302 = vmatmul.mubr.bf16.vlgmr.msra.gmra.mrb[0].mxu0 %v3861_v19 }
 0x251   : > { %v5498_v15 = vsub.f32 %v7036_v25, %v1870_v9  ;;  %v1398_v44 = vmul.f32 %v5488_v36, %v1396_v18  ;;  %3970 = vmatprep.mubr.msk.bf16.mxu0 %vm4665_vm11, %v6942_v43  ;;  %v4208_v8 = vpack.i.bf16 %v2052_v39, %v1976_v49  ;;  %v1994_v18 = vrot.slane %v1922_v59, 4 }
 0x252   : > { %v2606_v49 = vsel %vm2605_vm6, %v5337_v11, 1.0 }
 0x253   : > { %7037 = vst [vmem:[#allocation21_spill] sm:$0xff] %v5498_v15  ;;  %3882 = vst.msk [vmem:[%s5196_s1 + $0x24] sm:$0xf] %vm1823_vm0, %v5498_v15  ;;  %1426 = vrot.lane.b32.xlu0 %v1425_v23, %s7038_s16  ;;  %1430 = vrot.lane.b32.xlu1 %v1398_v44, %s7039_s17 }
 0x254   : > { %v1877_v53 = vpop.permute.xlu1 %1876  ;;  %v1404_v1 = vpop.permute.xlu0 %1403 }
 0x255   : > { %v1879_v52 = vsub.f32 %v7040_v29, %v1877_v53  ;;  %v1406_v61 = vmul.f32 %v5488_v36, %v1404_v1 }
 0x257   : > { %v1880_v40 = vmul.f32 19.0, %v1879_v52  ;;  %1435 = vrot.lane.b32.xlu0 %v1434_v5, %s7041_s3  ;;  %1439 = vrot.lane.b32.xlu1 %v1406_v61, %s7042_s13 }
 0x258   : > { %v1412_v42 = vpop.permute.xlu0 %1411  ;;  %v1972_v23 = vpop.permute.xlu1 %1971 }
 0x259   : > { %v1881_v28 = vmax.f32 %v1880_v40, 0.0  ;;  %v1414_v55 = vmul.f32 %v5488_v36, %v1412_v42  ;;  %v1974_v14 = vmul.f32 %v5488_v36, %v1972_v23 }
 0x25b   : > { %4511 = vrsqrt.f32 %v1881_v28  ;;  %1444 = vrot.lane.b32.xlu0 %v1443_v54, %s6992_s27  ;;  %1448 = vrot.lane.b32.xlu1 %v1414_v55, %s7043_s15  ;;  %vm1884_vm13 = vcmp.eq.f32.partialorder %v1881_v28, inf  ;;  %v1887_v57 = vand.u32 2147483648, %v1881_v28  ;;  %vm1886_vm14 = vcmp.eq.f32.partialorder %v1881_v28, 0.0 }
 0x25c   : > { %v5520_v16 = vpop.permute.xlu0 %1899 }
 0x25f   : > { %1943 = vrot.lane.b32.xlu0 %v5376_v24, %s7045_s11  ;;  %1417 = vrot.lane.b32.xlu1 %v1416_v35, %s7022_s30  ;;  %v2140_v35 = vmul.f32 %v5376_v24, %v7036_v25 }
 0x260   : > { %v1908_v30 = vpop.permute.xlu0 %1907 }
 0x261   : > { %v1910_v44 = vmul.f32 %v5488_v36, %v1908_v30  ;;  %v2141_v47 = vpack.c.bf16 %v2140_v35, %v2140_v35 }
 0x263   : > { %1951 = vrot.lane.b32.xlu0 %v5376_v24, %s7046_s12  ;;  %1935 = vrot.lane.b32.xlu1 %v5376_v24, %s7047_s19  ;;  %v4213_v5 = vpack.i.bf16 %v1974_v14, %v1910_v44  ;;  %v1382_v14 = vmul.f32 %v5488_v36, %v5479_v3 }
 0x264   : > { %v1831_v0 = vpop.permute.xlu0 %1830 }
 0x265   : > { %v4512_v22 = vpop.eup %4511  ;;  %3871 = vst.msk [vmem:[%s5196_s1 + $0xc] sm:$0xf] %vm1823_vm0, %v1831_v0 }
 0x266   : > { %v1883_v2 = vmul.f32 %v4512_v22, %v1881_v28 }
 0x267   : > { %1959 = vrot.lane.b32.xlu0 %v5376_v24, %s6923_s14  ;;  %2592 = vrot.lane.b32.xlu1 %v2590_v51, %s7022_s30  ;;  %s7049_s14 = smov 20  }
 0x268   : > { %v1885_v13 = vsel %vm1884_vm13, %v1881_v28, %v1883_v2  ;;  %v1352_v41 = vpop.permute.xlu0 %1351  ;;  %vm1819_vm13 = vcmask 123904  }
 0x269   : > { %v5543_v10 = vsel %vm1886_vm14, %v1887_v57, %v1885_v13  ;;  %v1354_v19 = vsub.f32 %v7048_v17, %v1352_v41  ;;  %vm2544_vm14 = vcmask 125954  }
 0x26a   : > { %3880 = vst.msk [vmem:[%s5196_s1 + $0x1c] sm:$0xf] %vm1823_vm0, %v5543_v10  ;;  %vm1893_vm9 = vcmp.gt.f32.partialorder %v5543_v10, 0.0 }
 0x26b   : > { %v1355_v20 = vmul.f32 9.0, %v1354_v19  ;;  %4209 = vrot.lane.b32.xlu0 %v4208_v8, %s7022_s30  ;;  %1939 = vrot.lane.b32.xlu1 %v5376_v24, %s7049_s14  ;;  %v1894_v3 = vsel %vm1893_vm9, %v5543_v10, 1.0 }
 0x26c   : > { %v1916_v27 = vpop.permute.xlu0 %1915 }
 0x26d   : > { %v1356_v38 = vmax.f32 %v1355_v20, 0.0  ;;  %v1918_v31 = vmul.f32 %v5488_v36, %v1916_v27 }
 0x26f   : > { %4513 = vrsqrt.f32 %v1356_v38  ;;  %1986 = vrot.lane.b32.xlu0 %v1985_v4, %s7038_s16  ;;  %1947 = vrot.lane.b32.xlu1 %v5376_v24, %s7050_s8  ;;  %vm1359_vm15 = vcmp.eq.f32.partialorder %v1356_v38, inf  ;;  %v1362_v29 = vand.u32 2147483648, %v1356_v38  ;;  %vm1361_vm1 = vcmp.eq.f32.partialorder %v1356_v38, 0.0 }
 0x270   : > { %v1924_v9 = vpop.permute.xlu0 %1923 }
 0x271   : > { %v1926_v12 = vmul.f32 %v5488_v36, %v1924_v9 }
 0x273   : > { %1995 = vrot.lane.b32.xlu0 %v1994_v18, %s7041_s3  ;;  %1955 = vrot.lane.b32.xlu1 %v5376_v24, %s6928_s20  ;;  %s7053_s20 = smov 17  }
 0x274   : > { %v1928_v50 = vpop.permute.xlu0 %1927 }
 0x275   : > { %v1930_v60 = vmul.f32 %v5488_v36, %v1928_v50 }
 0x277   : > { %v2003_v53 = vrot.slane %v1930_v60, 4  ;;  %1963 = vrot.lane.b32.xlu1 %v5376_v24, %s6926_s7  ;;  %s7052_s7 = smov 118  }
 0x278   : > { %v1932_v42 = vpop.permute.xlu0 %1931 }
 0x279   : > { %v4514_v1 = vpop.eup %4513  ;;  %2004 = vrot.lane.b32.xlu0 %v2003_v53, %s6992_s27  ;;  %v1934_v54 = vmul.f32 %v5488_v36, %v1932_v42 }
 0x27a   : > { %v1358_v6 = vmul.f32 %v4514_v1, %v1356_v38 }
 0x27b   : > { %4214 = vrot.lane.b32.xlu1 %v4213_v5, %s7035_s0 }
 0x27c   : > { %v1360_v52 = vsel %vm1359_vm15, %v1356_v38, %v1358_v6 }
 0x27d   : > { %v1363_v61 = vsel %vm1361_vm1, %v1362_v29, %v1360_v52  ;;  %vm1470_vm1 = vcmask 293888  }
 0x27e   : > { %vm1368_vm2 = vcmp.gt.f32.partialorder %v1363_v61, 0.0  ;;  %3870 = vst.msk [vmem:[%s5196_s1 + $0x8] sm:$0xf] %vm1823_vm0, %v1363_v61 }
 0x27f   : > { %v1369_v40 = vsel %vm1368_vm2, %v1363_v61, 1.0  ;;  %1990 = vrot.lane.b32.xlu1 %v1918_v31, %s7039_s17 }
 0x280   : > { %4515 = vrcp.f32 %v1369_v40  ;;  %v6941_v40 = vrot.slane %v5454_v34, 4 }
 0x281   : > { %4517 = vrcp.f32 %v2606_v49 }
 0x283   : > { %1999 = vrot.lane.b32.xlu1 %v1926_v12, %s7042_s13 }
 0x287   : > { %2008 = vrot.lane.b32.xlu1 %v1934_v54, %s7043_s15 }
 0x28a   : > { %v4516_v37 = vpop.eup %4515 }
 0x28b   : > { %v5575_v28 = vsel %vm1368_vm2, %v4516_v37, 0.0  ;;  %v4518_v38 = vpop.eup %4517  ;;  %vm2092_vm2 = vcmask 621568  }
 0x28c   : > { %v1767_v55 = vmul.f32 %v5575_v28, %v5469_v26  ;;  %v2146_v26 = vsel %vm1474_vm3, %v2141_v47, 0  ;;  %v5604_v23 = vsel %vm2605_vm6, %v4518_v38, 0.0 }
 0x28e   : > { %v1768_v30 = vpack.c.bf16 %v1767_v55, %v1767_v55 }
 0x290   : > { %v1773_v32 = vsel %vm1474_vm3, %v1768_v30, 0 }
 0x291   : > { %3969 = vmatpush3.bf16.msra.mxu0 %v1773_v32 }
 0x292   : > { %3988 = vmatprep.subr.bf16.mxu0 %v6942_v43 }
 0x294   : > { %3971 = vmatmul.mubr.msk.bf16.vlgmr.msra.gmra.mrb[4].mxu0 %vm1521_vm4, %v1766_v7 }
 0x295   : > { %3989 = vmatpush3.bf16.msra.mxu0 %v2146_v26  ;;  %3990 = vmatprep.mubr.msk.bf16.mxu0 %vm4665_vm11, %v6942_v43 }
 0x296   : > { %3994 = vmatprep.subr.bf16.mxu0 %v6942_v43 }
 0x2c1   : > { %v1422_v24 = vpop.permute.xlu0 %1421 }
 0x2c5   : > { %v1431_v25 = vpop.permute.xlu1 %1430  ;;  %v1427_v0 = vpop.permute.xlu0 %1426 }
 0x2c6   : > { %v1452_v5 = vsel %vm1191_vm5, %v1422_v24, %v1427_v0 }
 0x2c9   : > { %v1440_v22 = vpop.permute.xlu1 %1439  ;;  %v1436_v39 = vpop.permute.xlu0 %1435 }
 0x2ca   : > { %v1453_v52 = vsel %vm1191_vm5, %v1431_v25, %v1436_v39 }
 0x2cd   : > { %v1449_v51 = vpop.permute.xlu1 %1448  ;;  %v1445_v2 = vpop.permute.xlu0 %1444 }
 0x2ce   : > { %v1457_v53 = vpack.c.bf16 %v1449_v51, %v1449_v51  ;;  %v1454_v6 = vsel %vm1191_vm5, %v1440_v22, %v1445_v2 }
 0x2cf   : > { %v1456_v61 = vpack.c.bf16 %v1454_v6, %v1453_v52 }
 0x2d1   : > { %v1418_v57 = vpop.permute.xlu1 %1417  ;;  %v1944_v13 = vpop.permute.xlu0 %1943 }
 0x2d2   : > { %v1946_v8 = vmul.f32 %v5488_v36, %v1944_v13  ;;  %v1451_v1 = vsel %vm1191_vm5, %v1382_v14, %v1418_v57 }
 0x2d3   : > { %v1455_v29 = vpack.c.bf16 %v1452_v5, %v1451_v1  ;;  %v1519_v5 = vmul.f32 %v5351_v63, %v7031_v33 }
 0x2d4   : > { %v2021_v27 = vrot.slane %v1946_v8, 4 }
 0x2d5   : > { %v1936_v41 = vpop.permute.xlu1 %1935  ;;  %v5715_v32 = vpop.permute.xlu0 %1951 }
 0x2d6   : > { %v1938_v48 = vmul.f32 %v5488_v36, %v1936_v41 }
 0x2d8   : > { %v2012_v17 = vrot.slane %v1938_v48, 4 }
 0x2d9   : > { %v2593_v19 = vpop.permute.xlu1 %2592  ;;  %v5725_v7 = vpop.permute.xlu0 %1959 }
 0x2da   : > { %v2595_v20 = vsub.f32 %v5295_v58, %v2593_v19  ;;  %2013 = vrot.lane.b32.xlu0 %v2012_v17, %s6993_s2  ;;  %s7061_s2 = smov 12  }
 0x2dc   : > { %v2596_v4 = vmul.f32 39.0, %v2595_v20 }
 0x2dd   : > { %v1940_v59 = vpop.permute.xlu1 %1939  ;;  %v5735_v25 = vpop.permute.xlu0 %4209 }
 0x2de   : > { %v2597_v9 = vmax.f32 %v2596_v4, 0.0  ;;  %v1942_v18 = vmul.f32 %v5488_v36, %v1940_v59  ;;  %2022 = vrot.lane.b32.xlu0 %v2021_v27, %s6994_s24  ;;  %s7060_s24 = smov 11   ;;  %v4212_v6 = vunpack.i.h.bf16 %v5735_v25 }
 0x2e0   : > { %4519 = vrsqrt.f32 %v2597_v9  ;;  %2017 = vrot.lane.b32.xlu1 %v1942_v18, %s7052_s7  ;;  %vm2600_vm7 = vcmp.eq.f32.partialorder %v2597_v9, inf  ;;  %v2603_v50 = vand.u32 2147483648, %v2597_v9  ;;  %vm2602_vm8 = vcmp.eq.f32.partialorder %v2597_v9, 0.0  ;;  %s6940_s7 = smov 35  }
 0x2e1   : > { %4521 = vrcp.f32 %v1894_v3  ;;  %v5708_v35 = vpop.permute.xlu1 %1947  ;;  %v5749_v39 = vpop.permute.xlu0 %1986 }
 0x2e2   : > { %2688 = vrot.lane.b32.xlu0 %v5604_v23, %s7047_s19 }
 0x2e4   : > { %2680 = vrot.lane.b32.xlu1 %v5604_v23, %s7053_s20 }
 0x2e5   : > { %v5721_v47 = vpop.permute.xlu1 %1955  ;;  %v5759_v2 = vpop.permute.xlu0 %1995 }
 0x2e6   : > { %2696 = vrot.lane.b32.xlu0 %v5604_v23, %s7045_s11 }
 0x2e8   : > { %2684 = vrot.lane.b32.xlu1 %v5604_v23, %s7027_s21 }
 0x2e9   : > { %v5731_v26 = vpop.permute.xlu1 %1963 }
 0x2ea   : > { %v4520_v58 = vpop.eup %4519  ;;  %2692 = vrot.lane.b32.xlu0 %v5604_v23, %s7049_s14  ;;  %v1966_v14 = vmul.f32 %v5488_v36, %v5731_v26 }
 0x2eb   : > { %v2599_v11 = vmul.f32 %v4520_v58, %v2597_v9  ;;  %v4522_v10 = vpop.eup %4521  ;;  %v5765_v49 = vpop.permute.xlu0 %2004 }
 0x2ec   : > { %2704 = vrot.lane.b32.xlu1 %v5604_v23, %s7046_s12  ;;  %v5662_v31 = vsel %vm1893_vm9, %v4522_v10, 0.0  ;;  %v1520_v10 = vpack.c.bf16 %v1519_v5, %v1519_v5 }
 0x2ed   : > { %v2601_v44 = vsel %vm2600_vm7, %v2597_v9, %v2599_v11  ;;  %7059 = vst [vmem:[#allocation23_spill] sm:$0xff] %v5662_v31  ;;  %v5745_v22 = vpop.permute.xlu1 %4214 }
 0x2ee   : > { %v5618_v60 = vsel %vm2602_vm8, %v2603_v50, %v2601_v44  ;;  %2712 = vrot.lane.b32.xlu0 %v5604_v23, %s7054_s6 }
 0x2ef   : > { %3892 = vst.msk [vmem:[%s5196_s1 + $0x30] sm:$0xf] %vm1823_vm0, %v5618_v60  ;;  %s7057_s1 = smov 26   ;;  %vm2609_vm15 = vcmp.gt.f32.partialorder %v5618_v60, 0.0 }
 0x2f0   : > { %2700 = vrot.lane.b32.xlu1 %v5604_v23, %s7050_s8  ;;  %v2610_v30 = vsel %vm2609_vm15, %v5618_v60, 1.0 }
 0x2f1   : > { %4523 = vrcp.f32 %v2610_v30  ;;  %v5755_v51 = vpop.permute.xlu1 %1990  ;;  %v1526_v30 = vsel %vm1474_vm3, %v1520_v10, 0 }
 0x2f2   : > { %2708 = vrot.lane.b32.xlu0 %v5604_v23, %s7055_s4 }
 0x2f4   : > { %2720 = vrot.lane.b32.xlu1 %v5604_v23, %s7056_s10 }
 0x2f5   : > { %v5767_v57 = vpop.permute.xlu1 %1999 }
 0x2f6   : > { %1466 = vrot.lane.b32.xlu0 %v1457_v53, %s6995_s25  ;;  %v4217_v53 = vunpack.i.h.bf16 %v5745_v22 }
 0x2f8   : > { %2716 = vrot.lane.b32.xlu1 %v5604_v23, %s7057_s1 }
 0x2f9   : > { %v5777_v41 = vpop.permute.xlu1 %2008 }
 0x2fa   : > { %1462 = vrot.lane.b32.xlu0 %v1455_v29, %s6995_s25 }
 0x2fb   : > { %v4524_v24 = vpop.eup %4523 }
 0x2fc   : > { %1464 = vrot.lane.b32.xlu1 %v1456_v61, %s6995_s25  ;;  %s7062_s25 = smov 28   ;;  %v5743_v0 = vsel %vm2609_vm15, %v4524_v24, 0.0  ;;  %v2059_v61 = vsel %vm1191_vm5, %v1966_v14, %v4212_v6  ;;  %v1518_v14 = vld [vmem:[%s6816_s5] sm:$0x1] }
 0x2fd   : > { %v4218_v3 = vpack.i.bf16 %v4217_v53, %v2059_v61 }
 0x2fe   : > { %1577 = vrot.lane.b32.xlu0 %v5575_v28, %s7026_s9 }
 0x300   : > { %1573 = vrot.lane.b32.xlu1 %v5575_v28, %s7058_s26 }
 0x302   : > { %1585 = vrot.lane.b32.xlu0 %v5575_v28, %s7027_s21 }
 0x304   : > { %1581 = vrot.lane.b32.xlu1 %v5575_v28, %s7053_s20 }
 0x306   : > { %1589 = vrot.lane.b32.xlu0 %v5575_v28, %s7047_s19 }
 0x308   : > { %1593 = vrot.lane.b32.xlu1 %v5575_v28, %s7049_s14 }
 0x30a   : > { %1597 = vrot.lane.b32.xlu0 %v5575_v28, %s7045_s11 }
 0x30c   : > { %1601 = vrot.lane.b32.xlu1 %v5575_v28, %s7050_s8 }
 0x30e   : > { %1605 = vrot.lane.b32.xlu0 %v5575_v28, %s7046_s12 }
 0x310   : > { %2200 = vrot.lane.b32.xlu1 %v5662_v31, %s7060_s24  ;;  %s4039_s24 = smul.u32 24, %s4847_s29  ;;  %s7065_s29 = smov 14  }
 0x312   : > { %1711 = vrot.lane.b32.xlu0 %v5575_v28, %s7019_s22  ;;  %s5689_s15 = scalar_lea.vmem %s6829_s18, %s4039_s24  ;;  %s6939_s24 = smov 31  }
 0x314   : > { %2204 = vrot.lane.b32.xlu1 %v5662_v31, %s7061_s2  ;;  %s6938_s2 = smov 30  }
 0x316   : > { %2264 = vrot.lane.b32.xlu0 %v5662_v31, %s7056_s10 }
 0x318   : > { %2224 = vrot.lane.b32.xlu1 %v5662_v31, %s7053_s20 }
 0x31a   : > { %2268 = vrot.lane.b32.xlu0 %v5662_v31, %s7062_s25 }
 0x31c   : > { %2220 = vrot.lane.b32.xlu1 %v5662_v31, %s7026_s9 }
 0x31e   : > { %2208 = vrot.lane.b32.xlu0 %v5662_v31, %s7063_s28 }
 0x320   : > { %2240 = vrot.lane.b32.xlu1 %v5662_v31, %s7045_s11 }
 0x322   : > { %2216 = vrot.lane.b32.xlu0 %v5662_v31, %s7058_s26 }
 0x323   : > { %v5691_v12 = vpop.f32.mrb[0].mxu0 }
 0x324   : > { %7064 = vst [vmem:[#allocation24_spill] sm:$0xff] %v5691_v12  ;;  %v1377_v42 = vadd.f32 %v5454_v34, %v5691_v12  ;;  %v1897_v54 = vadd.f32 %v6941_v40, %v5691_v12  ;;  %2236 = vrot.lane.b32.xlu1 %v5662_v31, %s7049_s14  ;;  %v1305_v37 = vpop.f32.mrb[1].mxu0 }
 0x325   : > { %v1306_v28 = vpop.f32.mrb[2].mxu0 }
 0x326   : > { %1820 = vst.msk [vmem:[%s5689_s15] sm:$0x3] %vm1819_vm13, %v1377_v42  ;;  %2212 = vrot.lane.b32.xlu0 %v5662_v31, %s7065_s29  ;;  %v1307_v55 = vpop.f32.mrb[3].mxu0 }
 0x327   : > { %2545 = vst.msk [vmem:[%s5689_s15 + $0x4] sm:$0xc] %vm2544_vm14, %v1897_v54 }
 0x328   : > { %2256 = vrot.lane.b32.xlu1 %v5662_v31, %s7054_s6 }
 0x32a   : > { %2232 = vrot.lane.b32.xlu0 %v5662_v31, %s7047_s19 }
 0x32c   : > { %2252 = vrot.lane.b32.xlu1 %v5662_v31, %s7055_s4 }
 0x32e   : > { %2228 = vrot.lane.b32.xlu0 %v5662_v31, %s7027_s21 }
 0x330   : > { %2736 = vrot.lane.b32.xlu1 %v5604_v23, %s6939_s24  ;;  %s4673_s24 = smov 34  }
 0x332   : > { %2248 = vrot.lane.b32.xlu0 %v5662_v31, %s7046_s12 }
 0x334   : > { %2732 = vrot.lane.b32.xlu1 %v5604_v23, %s6938_s2  ;;  %s4672_s2 = smov 29  }
 0x336   : > { %2244 = vrot.lane.b32.xlu0 %v5662_v31, %s7050_s8 }
 0x338   : > { %2752 = vrot.lane.b32.xlu1 %v5604_v23, %s6940_s7  ;;  %s4675_s7 = smov 36  }
 0x33a   : > { %2260 = vrot.lane.b32.xlu0 %v5662_v31, %s7057_s1 }
 0x33c   : > { %3204 = vrot.lane.b32.xlu1 %v5743_v0, %s7047_s19  ;;  %s4674_s19 = smov 33  }
 0x33e   : > { %2728 = vrot.lane.b32.xlu0 %v5604_v23, %s4672_s2 }
 0x340   : > { %2748 = vrot.lane.b32.xlu1 %v5604_v23, %s4673_s24 }
 0x342   : > { %2724 = vrot.lane.b32.xlu0 %v5604_v23, %s7062_s25 }
 0x344   : > { %3220 = vrot.lane.b32.xlu1 %v5743_v0, %s7046_s12  ;;  %s7066_s12 = smov 10  }
 0x346   : > { %2744 = vrot.lane.b32.xlu0 %v5604_v23, %s4674_s19 }
 0x348   : > { %3208 = vrot.lane.b32.xlu1 %v5743_v0, %s7049_s14  ;;  %s4676_s14 = smov 37  }
 0x34a   : > { %3196 = vrot.lane.b32.xlu0 %v5743_v0, %s7053_s20  ;;  %s6947_s20 = smov 6  }
 0x34c   : > { %2756 = vrot.lane.b32.xlu1 %v5604_v23, %s4675_s7  ;;  %v5775_v13 = vpop.permute.xlu0 %2013 }
 0x34e   : > { %3200 = vrot.lane.b32.xlu0 %v5743_v0, %s7027_s21  ;;  %s6944_s21 = smov 4  }
 0x350   : > { %3228 = vrot.lane.b32.xlu1 %v5743_v0, %s7054_s6  ;;  %v5783_v48 = vpop.permute.xlu0 %2022  ;;  %s4677_s6 = smov 38  }
 0x352   : > { %v5785_v8 = vpop.permute.xlu1 %2017  ;;  %3212 = vrot.lane.b32.xlu0 %v5743_v0, %s7045_s11  ;;  %s4678_s11 = smov 3  }
 0x354   : > { %2196 = vrot.lane.b32.xlu1 %v5662_v31, %s7066_s12  ;;  %v5791_v17 = vpop.permute.xlu0 %2688 }
 0x356   : > { %v5793_v19 = vpop.permute.xlu1 %2680  ;;  %2760 = vrot.lane.b32.xlu0 %v5604_v23, %s4676_s14 }
 0x358   : > { %3232 = vrot.lane.b32.xlu1 %v5743_v0, %s7057_s1  ;;  %v5798_v20 = vpop.permute.xlu0 %2696  ;;  %s7070_s1 = sld [smem:[#allocation37_spill]] }
 0x35a   : > { %v5800_v27 = vpop.permute.xlu1 %2684  ;;  %3216 = vrot.lane.b32.xlu0 %v5743_v0, %s7050_s8  ;;  %s7067_s8 = smov 31  }
 0x35c   : > { %3244 = vrot.lane.b32.xlu1 %v5743_v0, %s4672_s2  ;;  %v5806_v4 = vpop.permute.xlu0 %2692  ;;  %s7071_s2 = smov 120  }
 0x35e   : > { %v5808_v59 = vpop.permute.xlu1 %2704  ;;  %2764 = vrot.lane.b32.xlu0 %v5604_v23, %s4677_s6  ;;  %v1458_v42 = vld [vmem:[%s7070_s1] sm:$0x1]  ;;  %s7077_s1 = smov 119  }
 0x360   : > { %3240 = vrot.lane.b32.xlu1 %v5743_v0, %s7062_s25  ;;  %v5813_v38 = vpop.permute.xlu0 %2712  ;;  %s6948_s25 = smov 7  }
 0x362   : > { %v5815_v9 = vpop.permute.xlu1 %2700  ;;  %3236 = vrot.lane.b32.xlu0 %v5743_v0, %s7056_s10  ;;  %s7068_s10 = smov 30  }
 0x364   : > { %3260 = vrot.lane.b32.xlu1 %v5743_v0, %s4674_s19  ;;  %v5821_v18 = vpop.permute.xlu0 %2708  ;;  %s7073_s19 = smov 116  }
 0x366   : > { %v5823_v58 = vpop.permute.xlu1 %2720  ;;  %3224 = vrot.lane.b32.xlu0 %v5743_v0, %s7055_s4  ;;  %s7069_s4 = smov 35  }
 0x368   : > { %3264 = vrot.lane.b32.xlu1 %v5743_v0, %s4673_s24  ;;  %v1467_v11 = vpop.permute.xlu0 %1466  ;;  %s7078_s24 = smov 117  }
 0x369   : > { %v1476_v33 = vsel %vm1474_vm3, %v1467_v11, 0 }
 0x36a   : > { %v5829_v50 = vpop.permute.xlu1 %2716  ;;  %3252 = vrot.lane.b32.xlu0 %v5743_v0, %s7067_s8  ;;  %s7076_s8 = smov 113  }
 0x36c   : > { %3276 = vrot.lane.b32.xlu1 %v5743_v0, %s4676_s14  ;;  %v1463_v44 = vpop.permute.xlu0 %1462  ;;  %s7074_s14 = smov 114  }
 0x36d   : > { %3937 = vmatpush3.bf16.msra.mxu1 %v1463_v44 }
 0x36e   : > { %v1465_v60 = vpop.permute.xlu1 %1464  ;;  %3248 = vrot.lane.b32.xlu0 %v5743_v0, %s7068_s10  ;;  %3938 = vmatprep.subr.bf16.mxu1 %v6942_v43  ;;  %s6946_s10 = smov 5  }
 0x370   : > { %3280 = vrot.lane.b32.xlu1 %v5743_v0, %s4677_s6  ;;  %v1578_v1 = vpop.permute.xlu0 %1577  ;;  %s7075_s6 = smov 115  }
 0x371   : > { %3939 = vmatpush3.bf16.msra.mxu1 %v1465_v60  ;;  %v1580_v29 = vmul.f32 %v5488_v36, %v1578_v1 }
 0x372   : > { %v5845_v52 = vpop.permute.xlu1 %1573  ;;  %3268 = vrot.lane.b32.xlu0 %v5743_v0, %s7069_s4  ;;  %3940 = vmatprep.subr.bf16.mxu1 %v6942_v43  ;;  %s4680_s4 = smov 2  }
 0x373   : > { %v1610_v54 = vrot.slane %v1580_v29, 4 }
 0x374   : > { %2624 = vrot.lane.b32.xlu1 %v5604_v23, %s4678_s11  ;;  %v1586_v63 = vpop.permute.xlu0 %1585 }
 0x375   : > { %3941 = vmatpush3.bf16.msra.mxu1 %v1476_v33  ;;  %v1588_v37 = vmul.f32 %v5488_v36, %v1586_v63 }
 0x376   : > { %v1582_v28 = vpop.permute.xlu1 %1581  ;;  %4219 = vrot.lane.b32.xlu0 %v4218_v3, %s7013_s23  ;;  %3946 = vmatprep.subr.bf16.mxu1 %v6942_v43 }
 0x377   : > { %v1619_v26 = vrot.slane %v1588_v37, 4  ;;  %v1584_v61 = vmul.f32 %v5488_v36, %v1582_v28 }
 0x378   : > { %3943 = vmatmul.mubr.msk.bf16.vlgmr.msra.gmra.mrb[0].mxu1 %vm1470_vm1, %v1458_v42  ;;  %1611 = vrot.lane.b32.xlu1 %v1610_v54, %s7022_s30  ;;  %v1590_v55 = vpop.permute.xlu0 %1589 }
 0x379   : > { %3947 = vmatpush3.bf16.msra.mxu1 %v1526_v30  ;;  %3948 = vmatprep.mubr.msk.bf16.mxu1 %vm4665_vm11, %v6942_v43  ;;  %v1592_v42 = vmul.f32 %v5488_v36, %v1590_v55 }
 0x37a   : > { %v1594_v24 = vpop.permute.xlu1 %1593  ;;  %3272 = vrot.lane.b32.xlu0 %v5743_v0, %s4675_s7  ;;  %3952 = vmatprep.subr.bf16.mxu1 %v6942_v43  ;;  %s7072_s7 = smov 118  }
 0x37b   : > { %v1596_v11 = vmul.f32 %v5488_v36, %v1594_v24 }
 0x37c   : > { %1620 = vrot.lane.b32.xlu1 %v1619_v26, %s7038_s16  ;;  %v1598_v44 = vpop.permute.xlu0 %1597 }
 0x37d   : > { %v1628_v60 = vrot.slane %v1596_v11, 4  ;;  %v1600_v28 = vmul.f32 %v5488_v36, %v1598_v44 }
 0x37e   : > { %v1602_v53 = vpop.permute.xlu1 %1601  ;;  %2436 = vrot.lane.b32.xlu0 %v5662_v31, %s7019_s22 }
 0x37f   : > { %v1604_v1 = vmul.f32 %v5488_v36, %v1602_v53 }
 0x380   : > { %3949 = vmatmul.mubr.msk.bf16.vlgmr.msra.gmra.mrb[4].mxu1 %vm1521_vm4, %v1518_v14  ;;  %1629 = vrot.lane.b32.xlu1 %v1628_v60, %s7041_s3  ;;  %v1606_v5 = vpop.permute.xlu0 %1605 }
 0x381   : > { %v1637_v6 = vrot.slane %v1604_v1, 4  ;;  %3958 = vmatprep.mubr.msk.bf16.mxu1 %vm4665_vm11, %v6942_v43 }
 0x382   : > { %v5880_v29 = vpop.permute.xlu1 %2200  ;;  %2616 = vrot.lane.b32.xlu0 %v5604_v23, %s7019_s22 }
 0x384   : > { %1638 = vrot.lane.b32.xlu1 %v1637_v6, %s6992_s27  ;;  %v1712_v3 = vpop.permute.xlu0 %1711 }
 0x385   : > { %v1714_v63 = vmul.f32 %v1712_v3, %v5383_v21  ;;  %v1608_v21 = vmul.f32 %v5488_v36, %v1606_v5 }
 0x386   : > { %v2205_v33 = vpop.permute.xlu1 %2204  ;;  %1615 = vrot.lane.b32.xlu0 %v1584_v61, %s7035_s0 }
 0x387   : > { %v1715_v10 = vpack.c.bf16 %v1714_v63, %v1714_v63  ;;  %v2207_v11 = vmul.f32 %v5488_v36, %v2205_v33  ;;  %v2711_v63 = vmul.f32 %v5488_v36, %v5821_v18 }
 0x388   : > { %v5889_v54 = vpop.permute.xlu0 %2264 }
 0x389   : > { %1717 = vrot.lane.b32.xlu1 %v1715_v10, %s7022_s30 }
 0x38a   : > { %v5892_v37 = vpop.permute.xlu1 %2224  ;;  %1624 = vrot.lane.b32.xlu0 %v1592_v42, %s7039_s17 }
 0x38c   : > { %v2269_v30 = vpop.permute.xlu0 %2268 }
 0x38d   : > { %v2271_v24 = vmul.f32 %v5488_v36, %v2269_v30 }
 0x38e   : > { %v5896_v26 = vpop.permute.xlu1 %2220  ;;  %1633 = vrot.lane.b32.xlu0 %v1600_v28, %s7042_s13 }
 0x38f   : > { %v4223_v14 = vpack.i.bf16 %v2207_v11, %v2271_v24  ;;  %v2719_v11 = vmul.f32 %v5488_v36, %v5829_v50 }
 0x390   : > { %v2209_v55 = vpop.permute.xlu0 %2208 }
 0x391   : > { %v2211_v10 = vmul.f32 %v5488_v36, %v2209_v55 }
 0x392   : > { %v5902_v60 = vpop.permute.xlu1 %2240  ;;  %1642 = vrot.lane.b32.xlu0 %v1608_v21, %s7071_s2  ;;  %v2691_v21 = vmul.f32 %v5488_v36, %v5791_v17  ;;  %v1950_v17 = vmul.f32 %v5488_v36, %v5708_v35 }
 0x394   : > { %v2217_v53 = vpop.permute.xlu0 %2216  ;;  %v2854_v40 = vrot.slane %v2691_v21, 4 }
 0x396   : > { %v2237_v1 = vpop.permute.xlu1 %2236  ;;  %4224 = vrot.lane.b32.xlu0 %v4223_v14, %s7035_s0  ;;  %v2282_v14 = vrot.slane %v2211_v10, 4 }
 0x397   : > { %v2239_v28 = vmul.f32 %v5488_v36, %v2237_v1  ;;  %v1954_v1 = vmul.f32 %v5488_v36, %v5715_v32  ;;  %v1962_v32 = vmul.f32 %v5488_v36, %v5725_v7  ;;  %v2699_v7 = vmul.f32 %v5488_v36, %v5798_v20 }
 0x398   : > { %v2213_v44 = vpop.permute.xlu0 %2212  ;;  %v4263_v50 = vpack.i.bf16 %v2854_v40, %v2282_v14  ;;  %v2219_v40 = vmul.f32 %v5488_v36, %v2217_v53  ;;  %v2267_v53 = vmul.f32 %v5488_v36, %v5889_v54  ;;  %v2703_v54 = vmul.f32 %v5488_v36, %v5815_v9 }
 0x39a   : > { %v2257_v6 = vpop.permute.xlu1 %2256 }
 0x39b   : > { %v2259_v10 = vmul.f32 %v5488_v36, %v2257_v6  ;;  %v2215_v6 = vmul.f32 %v5488_v36, %v2213_v44  ;;  %v2227_v44 = vmul.f32 %v5488_v36, %v5892_v37  ;;  %v2203_v37 = vmul.f32 %v5488_v36, %v5880_v29 }
 0x39c   : > { %v5906_v61 = vpop.permute.xlu0 %2232 }
 0x39e   : > { %v2253_v3 = vpop.permute.xlu1 %2252 }
 0x3a0   : > { %v2229_v5 = vpop.permute.xlu0 %2228 }
 0x3a1   : > { %v2231_v33 = vmul.f32 %v5488_v36, %v2229_v5  ;;  %v4253_v5 = vpack.i.bf16 %v2719_v11, %v2239_v28  ;;  %v2255_v28 = vmul.f32 %v5488_v36, %v2253_v3  ;;  %v2030_v11 = vrot.slane %v1954_v1, 4 }
 0x3a2   : > { %v5912_v42 = vpop.permute.xlu1 %2736  ;;  %v2336_v3 = vrot.slane %v2259_v10, 4  ;;  %v2039_v1 = vrot.slane %v1962_v32, 4 }
 0x3a3   : > { %v4248_v30 = vpack.i.bf16 %v2711_v63, %v2231_v33 }
 0x3a4   : > { %v2249_v24 = vpop.permute.xlu0 %2248  ;;  %v4273_v10 = vpack.i.bf16 %v2336_v3, %v2039_v1  ;;  %v2235_v1 = vmul.f32 %v5488_v36, %v5906_v61 }
 0x3a5   : > { %4249 = vrot.lane.b32.xlu0 %v4248_v30, %s7071_s2  ;;  %v2251_v55 = vmul.f32 %v5488_v36, %v2249_v24 }
 0x3a6   : > { %v5920_v18 = vpop.permute.xlu1 %2732 }
 0x3a7   : > { %v2327_v30 = vrot.slane %v2251_v55, 4 }
 0x3a8   : > { %v2245_v43 = vpop.permute.xlu0 %2244 }
 0x3a9   : > { %v2247_v63 = vmul.f32 %v5488_v36, %v2245_v43  ;;  %4254 = vrot.lane.b32.xlu0 %v4253_v5, %s7072_s7  ;;  %v1958_v43 = vmul.f32 %v5488_v36, %v5721_v47  ;;  %v4268_v5 = vpack.i.bf16 %v2327_v30, %v2030_v11  ;;  %v2695_v47 = vmul.f32 %v5488_v36, %v5806_v4 }
 0x3aa   : > { %v5929_v33 = vpop.permute.xlu1 %2752  ;;  %v2863_v4 = vrot.slane %v2699_v7, 4  ;;  %v2707_v30 = vmul.f32 %v5488_v36, %v5808_v59  ;;  %v2300_v11 = vrot.slane %v2227_v44, 4  ;;  %v2273_v59 = vrot.slane %v2203_v37, 4 }
 0x3ab   : > { %v4228_v21 = vpack.i.bf16 %v2247_v63, %v1950_v17  ;;  %v4233_v14 = vpack.i.bf16 %v2255_v28, %v1958_v43  ;;  %v2223_v63 = vmul.f32 %v5488_v36, %v5896_v26  ;;  %v4238_v20 = vpack.i.bf16 %v2695_v47, %v2215_v6 }
 0x3ac   : > { %v5933_v24 = vpop.permute.xlu0 %2260  ;;  %v2872_v6 = vrot.slane %v2707_v30, 4  ;;  %v2715_v47 = vmul.f32 %v5488_v36, %v5813_v38  ;;  %v2243_v44 = vmul.f32 %v5488_v36, %v5902_v60  ;;  %v2723_v38 = vmul.f32 %v5488_v36, %v5823_v58 }
 0x3ad   : > { %4229 = vrot.lane.b32.xlu1 %v4228_v21, %s7073_s19  ;;  %4264 = vrot.lane.b32.xlu0 %v4263_v50, %s7038_s16  ;;  %v2291_v50 = vrot.slane %v2219_v40, 4  ;;  %v2349_v21 = vrot.slane %v2267_v53, 4  ;;  %v4243_v32 = vpack.i.bf16 %v2703_v54, %v2223_v63  ;;  %v2309_v63 = vrot.slane %v2235_v1, 4 }
 0x3ae   : > { %v5942_v35 = vpop.permute.xlu1 %3204  ;;  %v4283_v3 = vpack.i.bf16 %v2872_v6, %v2300_v11  ;;  %v2881_v61 = vrot.slane %v2715_v47, 4  ;;  %v2890_v30 = vrot.slane %v2723_v38, 4 }
 0x3af   : > { %v4278_v43 = vpack.i.bf16 %v2863_v4, %v2291_v50  ;;  %v4258_v29 = vpack.i.bf16 %v2273_v59, %v2349_v21 }
 0x3b0   : > { %v5945_v55 = vpop.permute.xlu0 %2728  ;;  %v4288_v4 = vpack.i.bf16 %v2881_v61, %v2309_v63 }
 0x3b1   : > { %4234 = vrot.lane.b32.xlu1 %v4233_v14, %s7074_s14  ;;  %4269 = vrot.lane.b32.xlu0 %v4268_v5, %s7075_s6 }
 0x3b2   : > { %v5957_v17 = vpop.permute.xlu1 %2748 }
 0x3b4   : > { %v5961_v28 = vpop.permute.xlu0 %2724 }
 0x3b5   : > { %4239 = vrot.lane.b32.xlu1 %v4238_v20, %s7039_s17  ;;  %4274 = vrot.lane.b32.xlu0 %v4273_v10, %s7076_s8  ;;  %v2318_v10 = vrot.slane %v2243_v44, 4 }
 0x3b6   : > { %v5971_v26 = vpop.permute.xlu1 %3220 }
 0x3b7   : > { %v4293_v58 = vpack.i.bf16 %v2890_v30, %v2318_v10 }
 0x3b8   : > { %v5973_v40 = vpop.permute.xlu0 %2744 }
 0x3b9   : > { %4244 = vrot.lane.b32.xlu1 %v4243_v32, %s7042_s13  ;;  %4279 = vrot.lane.b32.xlu0 %v4278_v43, %s7041_s3 }
 0x3ba   : > { %v5977_v9 = vpop.permute.xlu1 %3208 }
 0x3bc   : > { %v3197_v14 = vpop.permute.xlu0 %3196 }
 0x3bd   : > { %4259 = vrot.lane.b32.xlu1 %v4258_v29, %s7022_s30  ;;  %4284 = vrot.lane.b32.xlu0 %v4283_v3, %s6992_s27 }
 0x3be   : > { %v5981_v5 = vpop.permute.xlu1 %2756 }
 0x3c0   : > { %v3201_v7 = vpop.permute.xlu0 %3200 }
 0x3c1   : > { %2632 = vrot.lane.b32.xlu1 %v5604_v23, %s6946_s10  ;;  %2620 = vrot.lane.b32.xlu0 %v5604_v23, %s4680_s4  ;;  %s6949_s10 = smov 9  }
 0x3c2   : > { %v5991_v53 = vpop.permute.xlu1 %3228 }
 0x3c4   : > { %v5995_v50 = vpop.permute.xlu0 %3212 }
 0x3c5   : > { %2628 = vrot.lane.b32.xlu1 %v5604_v23, %s6944_s21  ;;  %2640 = vrot.lane.b32.xlu0 %v5604_v23, %s6948_s25  ;;  %s7079_s21 = smov 11   ;;  %s4685_s25 = smov 8  }
 0x3c6   : > { %v6003_v20 = vpop.permute.xlu1 %2196 }
 0x3c8   : > { %v6005_v60 = vpop.permute.xlu0 %2760 }
 0x3c9   : > { %4289 = vrot.lane.b32.xlu1 %v4288_v4, %s7077_s1  ;;  %2636 = vrot.lane.b32.xlu0 %v5604_v23, %s6947_s20  ;;  %s7080_s20 = sld [smem:[#allocation15_spill]] }
 0x3ca   : > { %v6010_v36 = vpop.permute.xlu1 %3232 }
 0x3cc   : > { %v6012_v54 = vpop.permute.xlu0 %3216 }
 0x3cd   : > { %4294 = vrot.lane.b32.xlu1 %v4293_v58, %s7078_s24  ;;  %2656 = vrot.lane.b32.xlu0 %v5604_v23, %s7079_s21 }
 0x3ce   : > { %v3245_v37 = vpop.permute.xlu1 %3244 }
 0x3cf   : > { %v6048_v1 = vld [vmem:[%s7080_s20] sm:$0xf] }
 0x3d0   : > { %v6017_v21 = vpop.permute.xlu0 %2764  ;;  %v3199_v47 = vmul.f32 %v6048_v1, %v3197_v14  ;;  %v3203_v44 = vmul.f32 %v6048_v1, %v3201_v7  ;;  %v2683_v61 = vmul.f32 %v6048_v1, %v5793_v19  ;;  %v2687_v38 = vmul.f32 %v6048_v1, %v5800_v27 }
 0x3d1   : > { %2648 = vrot.lane.b32.xlu1 %v5604_v23, %s6949_s10  ;;  %2652 = vrot.lane.b32.xlu0 %v5604_v23, %s7066_s12  ;;  %s7081_s10 = smov 12   ;;  %v2739_v46 = vmul.f32 %v6048_v1, %v5912_v42 }
 0x3d2   : > { %v3241_v32 = vpop.permute.xlu1 %3240  ;;  %v3361_v10 = vrot.slane %v3199_v47, 4  ;;  %v4303_v4 = vpack.i.bf16 %v3203_v44, %v2687_v38  ;;  %v2845_v7 = vrot.slane %v2683_v61, 4  ;;  %v3247_v38 = vmul.f32 %v6048_v1, %v3245_v37 }
 0x3d3   : > { %v3243_v37 = vmul.f32 %v6048_v1, %v3241_v32  ;;  %v2908_v56 = vrot.slane %v2739_v46, 4  ;;  %v2735_v32 = vmul.f32 %v6048_v1, %v5920_v18  ;;  %v4211_v46 = vunpack.i.l.bf16 %v5735_v25 }
 0x3d4   : > { %v6023_v11 = vpop.permute.xlu0 %3236  ;;  %v4298_v19 = vpack.i.bf16 %v3361_v10, %v2845_v7  ;;  %v2731_v10 = vmul.f32 %v6048_v1, %v5945_v55  ;;  %v3415_v7 = vrot.slane %v3247_v38, 4 }
 0x3d5   : > { %2644 = vrot.lane.b32.xlu1 %v5604_v23, %s4685_s25  ;;  %2672 = vrot.lane.b32.xlu0 %v5604_v23, %s7058_s26 }
 0x3d6   : > { %v6035_v6 = vpop.permute.xlu1 %3260  ;;  %v2899_v45 = vrot.slane %v2731_v10, 4 }
 0x3d8   : > { %v6029_v43 = vpop.permute.xlu0 %3224  ;;  %v4313_v55 = vpack.i.bf16 %v3415_v7, %v2899_v45  ;;  %v4216_v45 = vunpack.i.l.bf16 %v5745_v22  ;;  %v2755_v22 = vmul.f32 %v6048_v1, %v5929_v33 }
 0x3d9   : > { %2664 = vrot.lane.b32.xlu1 %v5604_v23, %s7063_s28  ;;  %2668 = vrot.lane.b32.xlu0 %v5604_v23, %s7065_s29 }
 0x3da   : > { %v6041_v3 = vpop.permute.xlu1 %3264 }
 0x3dc   : > { %v3253_v59 = vpop.permute.xlu0 %3252 }
 0x3dd   : > { %2660 = vrot.lane.b32.xlu1 %v5604_v23, %s7081_s10  ;;  %3140 = vrot.lane.b32.xlu0 %v5743_v0, %s4678_s11  ;;  %s7083_s11 = smov 5  }
 0x3de   : > { %v6062_v30 = vpop.permute.xlu1 %3276 }
 0x3e0   : > { %v3249_v29 = vpop.permute.xlu0 %3248 }
 0x3e1   : > { %3132 = vrot.lane.b32.xlu1 %v5743_v0, %s7019_s22  ;;  %2676 = vrot.lane.b32.xlu0 %v5604_v23, %s7026_s9  ;;  %s7082_s22 = smov 7  }
 0x3e2   : > { %v6071_v58 = vpop.permute.xlu1 %3280 }
 0x3e4   : > { %v6052_v63 = vpop.permute.xlu0 %3268 }
 0x3e5   : > { %3136 = vrot.lane.b32.xlu1 %v5743_v0, %s4680_s4  ;;  %3156 = vrot.lane.b32.xlu0 %v5743_v0, %s7082_s22  ;;  %s7084_s4 = smov 6   ;;  %s7085_s22 = smov 4  }
 0x3e6   : > { %v6082_v44 = vpop.permute.xlu1 %2624 }
 0x3e8   : > { %v6064_v14 = vpop.permute.xlu0 %4219 }
 0x3e9   : > { %3148 = vrot.lane.b32.xlu1 %v5743_v0, %s7083_s11  ;;  %4304 = vrot.lane.b32.xlu0 %v4303_v4, %s7035_s0  ;;  %s7087_s11 = smov 9  }
 0x3ea   : > { %v6093_v4 = vpop.permute.xlu1 %1611 }
 0x3ec   : > { %v6069_v27 = vpop.permute.xlu0 %3272 }
 0x3ed   : > { %4299 = vrot.lane.b32.xlu1 %v4298_v19, %s7022_s30  ;;  %3152 = vrot.lane.b32.xlu0 %v5743_v0, %s7084_s4  ;;  %v3255_v19 = vmul.f32 %v6048_v1, %v3253_v59  ;;  %v2727_v59 = vmul.f32 %v6048_v1, %v5961_v28  ;;  %v3207_v28 = vmul.f32 %v6048_v1, %v5942_v35  ;;  %s7101_s4 = sld [smem:[#allocation45_spill]] }
 0x3ee   : > { %v1621_v15 = vpop.permute.xlu1 %1620 }
 0x3ef   : > { %v3424_v31 = vrot.slane %v3255_v19, 4  ;;  %v4308_v42 = vpack.i.bf16 %v3243_v37, %v2727_v59  ;;  %v3370_v18 = vrot.slane %v3207_v28, 4  ;;  %v2763_v59 = vmul.f32 %v6048_v1, %v6005_v60 }
 0x3f0   : > { %v6076_v47 = vpop.permute.xlu0 %2436  ;;  %v1576_v60 = vmul.f32 %v6048_v1, %v5845_v52 }
 0x3f1   : > { %3144 = vrot.lane.b32.xlu1 %v5743_v0, %s7085_s22  ;;  %3172 = vrot.lane.b32.xlu0 %v5743_v0, %s7079_s21  ;;  %v4323_v10 = vpack.i.bf16 %v3424_v31, %v2908_v56  ;;  %v1902_v56 = vmul.f32 %v6048_v1, %v5520_v16  ;;  %v2044_v31 = vsel %vm1191_vm5, %v4216_v45, %v5749_v39  ;;  %v2930_v16 = vrot.slane %v2755_v22, 4  ;;  %s7099_s21 = sld [smem:[#allocation36_spill]] }
 0x3f2   : > { %v1630_v7 = vpop.permute.xlu1 %1629  ;;  %v2751_v45 = vmul.f32 %v6048_v1, %v5957_v17  ;;  %v1645_v17 = vsel %vm1191_vm5, %v1576_v60, %v6093_v4 }
 0x3f3   : > { %v2043_v25 = vsel %vm1191_vm5, %v1902_v56, %v4211_v46  ;;  %v4328_v33 = vpack.i.bf16 %v2930_v16, %v3370_v18  ;;  %v2939_v46 = vrot.slane %v2763_v59, 4  ;;  %v2747_v59 = vmul.f32 %v6048_v1, %v5973_v40 }
 0x3f4   : > { %v6084_v61 = vpop.permute.xlu0 %2616 }
 0x3f5   : > { %7086 = vst [vmem:[#allocation17_spill] sm:$0xff] %v6084_v61  ;;  %3164 = vrot.lane.b32.xlu1 %v5743_v0, %s7087_s11  ;;  %3168 = vrot.lane.b32.xlu0 %v5743_v0, %s7066_s12  ;;  %v3251_v61 = vmul.f32 %v6048_v1, %v3249_v29  ;;  %v2067_v29 = vpack.c.bf16 %v2044_v31, %v2043_v25  ;;  %s7107_s12 = sld [smem:[#allocation42_spill]] }
 0x3f6   : > { %v1639_v35 = vpop.permute.xlu1 %1638 }
 0x3f7   : > { %v4318_v19 = vpack.i.bf16 %v3251_v61, %v2735_v32  ;;  %v3215_v32 = vmul.f32 %v6048_v1, %v5995_v50 }
 0x3f8   : > { %v1616_v12 = vpop.permute.xlu0 %1615 }
 0x3f9   : > { %3160 = vrot.lane.b32.xlu1 %v5743_v0, %s4685_s25  ;;  %3188 = vrot.lane.b32.xlu0 %v5743_v0, %s7058_s26  ;;  %s4686_s26 = smov 32   ;;  %s7100_s25 = smov %s7099_s21 }
 0x3fb   : > { %v6159_v31 = vpop.permute.xlu1 %1717 }
 0x3fc   : > { %v1625_v38 = vpop.permute.xlu0 %1624 }
 0x3fd   : > { %3180 = vrot.lane.b32.xlu1 %v5743_v0, %s7063_s28  ;;  %3184 = vrot.lane.b32.xlu0 %v5743_v0, %s7065_s29  ;;  %v1647_v39 = vsel %vm1191_vm5, %v1625_v38, %v1630_v7  ;;  %s7088_s29 = sld [smem:[#allocation43_spill]] }
 0x401   : > { %3176 = vrot.lane.b32.xlu1 %v5743_v0, %s7081_s10  ;;  %4314 = vrot.lane.b32.xlu0 %v4313_v55, %s7075_s6  ;;  %v1634_v55 = vpop.permute.xlu0 %1633  ;;  %s7112_s10 = sld [smem:[#allocation8_spill]] }
 0x402   : > { %v1648_v61 = vsel %vm1191_vm5, %v1634_v55, %v1639_v35 }
 0x405   : > { %4309 = vrot.lane.b32.xlu1 %v4308_v42, %s7073_s19  ;;  %4324 = vrot.lane.b32.xlu0 %v4323_v10, %s7076_s8  ;;  %v1643_v37 = vpop.permute.xlu0 %1642  ;;  %v3267_v42 = vmul.f32 %v6048_v1, %v6041_v3  ;;  %v1650_v10 = vpack.c.bf16 %v1648_v61, %v1647_v39  ;;  %v1646_v3 = vsel %vm1191_vm5, %v1616_v12, %v1621_v15 }
 0x406   : > { %v1651_v7 = vpack.c.bf16 %v1643_v37, %v1643_v37  ;;  %v1649_v55 = vpack.c.bf16 %v1646_v3, %v1645_v17  ;;  %v3263_v61 = vmul.f32 %v6048_v1, %v6035_v6  ;;  %v2263_v39 = vmul.f32 %v6048_v1, %v5933_v24 }
 0x407   : > { %v4343_v38 = vpack.i.bf16 %v3267_v42, %v2751_v45  ;;  %v3223_v24 = vmul.f32 %v6048_v1, %v5971_v26  ;;  %v3211_v17 = vmul.f32 %v6048_v1, %v5977_v9  ;;  %v2767_v26 = vmul.f32 %v6048_v1, %v6017_v21 }
 0x408   : > { %v3437_v45 = vrot.slane %v3263_v61, 4  ;;  %v2046_v21 = vsel %vm1191_vm5, %v5767_v57, %v5765_v49  ;;  %v3239_v49 = vmul.f32 %v6048_v1, %v6023_v11 }
 0x409   : > { %4319 = vrot.lane.b32.xlu1 %v4318_v19, %s7074_s14  ;;  %2740 = vrot.lane.b32.xlu0 %v5604_v23, %s4686_s26  ;;  %v6146_v28 = vpop.permute.xlu0 %4224  ;;  %v3379_v19 = vrot.slane %v3215_v32, 4 }
 0x40a   : > { %v4226_v42 = vunpack.i.l.bf16 %v6146_v28 }
 0x40b   : > { %v4353_v50 = vpack.i.bf16 %v2939_v46, %v3379_v19 }
 0x40d   : > { %3192 = vrot.lane.b32.xlu1 %v5743_v0, %s7026_s9  ;;  %2078 = vrot.lane.b32.xlu0 %v2067_v29, %s7072_s7  ;;  %s7103_s9 = sld [smem:[#allocation44_spill]] }
 0x411   : > { %4329 = vrot.lane.b32.xlu1 %v4328_v33, %s7038_s16  ;;  %1658 = vrot.lane.b32.xlu0 %v1650_v10, %s7076_s8 }
 0x415   : > { %1660 = vrot.lane.b32.xlu1 %v1651_v7, %s7076_s8  ;;  %4344 = vrot.lane.b32.xlu0 %v4343_v38, %s7035_s0  ;;  %v2921_v38 = vrot.slane %v2747_v59, 4  ;;  %v2759_v7 = vmul.f32 %v6048_v1, %v5981_v5  ;;  %v3219_v59 = vmul.f32 %v6048_v1, %v6012_v54  ;;  %v3231_v54 = vmul.f32 %v6048_v1, %v5991_v53 }
 0x417   : > { %v6155_v56 = vpop.permute.xlu0 %4249  ;;  %v4338_v40 = vpack.i.bf16 %v3437_v45, %v2921_v38  ;;  %v4348_v61 = vpack.i.bf16 %v2759_v7, %v3211_v17  ;;  %v4358_v9 = vpack.i.bf16 %v2767_v26, %v3219_v59  ;;  %v2045_v45 = vsel %vm1191_vm5, %v5755_v51, %v5759_v2 }
 0x418   : > { %v3227_v51 = vmul.f32 %v6048_v1, %v6029_v43  ;;  %v3235_v59 = vmul.f32 %v6048_v1, %v6010_v36  ;;  %v2627_v43 = vmul.f32 %v6048_v1, %v6082_v44  ;;  %v2048_v44 = vsel %vm1191_vm5, %v5785_v8, %v5783_v48 }
 0x419   : > { %1656 = vrot.lane.b32.xlu1 %v1649_v55, %s7076_s8  ;;  %4354 = vrot.lane.b32.xlu0 %v4353_v50, %s7041_s3  ;;  %v3388_v50 = vrot.slane %v3223_v24, 4 }
 0x41b   : > { %v6161_v52 = vpop.permute.xlu0 %4254 }
 0x41f   : > { %v6163_v15 = vpop.permute.xlu1 %4229  ;;  %v6165_v12 = vpop.permute.xlu0 %4264 }
 0x423   : > { %v6167_v22 = vpop.permute.xlu1 %4234  ;;  %v6169_v25 = vpop.permute.xlu0 %4269 }
 0x427   : > { %v6171_v4 = vpop.permute.xlu1 %4239  ;;  %v6173_v18 = vpop.permute.xlu0 %4274 }
 0x42b   : > { %v6175_v35 = vpop.permute.xlu1 %4244  ;;  %v6177_v29 = vpop.permute.xlu0 %4279 }
 0x42f   : > { %v6181_v16 = vpop.permute.xlu1 %4259  ;;  %v6183_v37 = vpop.permute.xlu0 %4284 }
 0x430   : > { %v4261_v33 = vunpack.i.l.bf16 %v6181_v16  ;;  %v4262_v48 = vunpack.i.h.bf16 %v6181_v16  ;;  %v1569_v16 = vrot.slane %v5454_v34, 2 }
 0x432   : > { %v2356_v10 = vsel %vm1191_vm5, %v2263_v39, %v4261_v33 }
 0x433   : > { %v6192_v32 = vpop.permute.xlu1 %2632  ;;  %v6194_v6 = vpop.permute.xlu0 %2620  ;;  %v4333_v46 = vpack.i.bf16 %v4226_v42, %v2356_v10 }
 0x435   : > { %4334 = vrot.lane.b32.xlu1 %v4333_v46, %s7013_s23  ;;  %v2068_v46 = vpack.c.bf16 %v2046_v21, %v2045_v45  ;;  %v2139_v21 = vld [vmem:[%s7088_s29] sm:$0x1]  ;;  %s7105_s29 = sld [smem:[#allocation48_spill]] }
 0x436   : > { %3991 = vmatmul.mubr.msk.bf16.vlgmr.msra.gmra.mrb[8].mxu0 %vm1521_vm4, %v2139_v21 }
 0x437   : > { %v6201_v60 = vpop.permute.xlu1 %2628  ;;  %v2641_v3 = vpop.permute.xlu0 %2640 }
 0x438   : > { %v2643_v19 = vmul.f32 %v6048_v1, %v2641_v3  ;;  %v3397_v3 = vrot.slane %v3231_v54, 4  ;;  %v3271_v54 = vmul.f32 %v6048_v1, %v6052_v63 }
 0x439   : > { %4339 = vrot.lane.b32.xlu1 %v4338_v40, %s7022_s30 }
 0x43a   : > { %v2796_v55 = vrot.slane %v2643_v19, 4 }
 0x43b   : > { %v6209_v39 = vpop.permute.xlu1 %4289  ;;  %v6211_v5 = vpop.permute.xlu0 %2636 }
 0x43c   : > { %v4363_v33 = vpack.i.bf16 %v2796_v55, %v3388_v50  ;;  %v3406_v55 = vrot.slane %v3239_v49, 4  ;;  %v2047_v49 = vsel %vm1191_vm5, %v5777_v41, %v5775_v13 }
 0x43d   : > { %4349 = vrot.lane.b32.xlu1 %v4348_v61, %s7039_s17  ;;  %v2069_v8 = vpack.c.bf16 %v2048_v44, %v2047_v49  ;;  %v4291_v49 = vunpack.i.l.bf16 %v6209_v39 }
 0x43e   : > { %4364 = vrot.lane.b32.xlu0 %v4363_v33, %s6992_s27 }
 0x43f   : > { %v6217_v42 = vpop.permute.xlu1 %4294  ;;  %v2657_v10 = vpop.permute.xlu0 %2656 }
 0x440   : > { %v2659_v7 = vmul.f32 %v6048_v1, %v2657_v10 }
 0x441   : > { %4359 = vrot.lane.b32.xlu1 %v4358_v9, %s7042_s13 }
 0x442   : > { %v2814_v2 = vrot.slane %v2659_v7, 4 }
 0x443   : > { %v2649_v38 = vpop.permute.xlu1 %2648  ;;  %v2653_v24 = vpop.permute.xlu0 %2652 }
 0x444   : > { %v2651_v40 = vmul.f32 %v6048_v1, %v2649_v38  ;;  %v2655_v61 = vmul.f32 %v6048_v1, %v2653_v24  ;;  %v4383_v9 = vpack.i.bf16 %v2814_v2, %v3406_v55  ;;  %v7089_v38 = vmov 0.0  }
 0x445   : > { %2080 = vrot.lane.b32.xlu1 %v2068_v46, %s7072_s7  ;;  %4004 = vmatprep.mubr.msk.bf16.mxu0 %vm4665_vm11, %v7089_v38  ;;  %v4276_v24 = vunpack.i.l.bf16 %v6173_v18  ;;  %v2199_v2 = vmul.f32 %v6048_v1, %v6003_v20 }
 0x446   : > { %v2805_v57 = vrot.slane %v2651_v40, 4  ;;  %v4378_v46 = vpack.i.bf16 %v2655_v61, %v3235_v59 }
 0x447   : > { %v2645_v19 = vpop.permute.xlu1 %2644  ;;  %v6233_v17 = vpop.permute.xlu0 %2672  ;;  %v2340_v21 = vsel %vm1191_vm5, %v2199_v2, %v4262_v48  ;;  %v4281_v2 = vunpack.i.l.bf16 %v6177_v29 }
 0x448   : > { %v4373_v53 = vpack.i.bf16 %v2805_v57, %v3397_v3  ;;  %v2647_v50 = vmul.f32 %v6048_v1, %v2645_v19  ;;  %v2778_v3 = vrot.slane %v2627_v43, 4  ;;  %v4236_v57 = vunpack.i.l.bf16 %v6167_v22 }
 0x449   : > { %v4271_v19 = vunpack.i.l.bf16 %v6169_v25 }
 0x44a   : > { %v4368_v26 = vpack.i.bf16 %v2647_v50, %v3227_v51  ;;  %4374 = vrot.lane.b32.xlu1 %v4373_v53, %s7077_s1  ;;  %v3446_v51 = vrot.slane %v3271_v54, 4  ;;  %v4231_v53 = vunpack.i.l.bf16 %v6163_v15  ;;  %v4266_v50 = vunpack.i.l.bf16 %v6165_v12 }
 0x44b   : > { %v6240_v33 = vpop.permute.xlu1 %2664  ;;  %v6242_v11 = vpop.permute.xlu0 %2668  ;;  %v2050_v13 = vsel %vm1191_vm5, %v4236_v57, %v4276_v24 }
 0x44c   : > { %4369 = vrot.lane.b32.xlu0 %v4368_v26, %s7071_s2  ;;  %v1512_v10 = vpop.f32.mrb[0].mxu1  ;;  %v4388_v61 = vpack.i.bf16 %v2778_v3, %v3446_v51  ;;  %v2049_v20 = vsel %vm1191_vm5, %v4231_v53, %v4271_v19  ;;  %v4256_v3 = vunpack.i.l.bf16 %v6161_v52  ;;  %v2635_v19 = vmul.f32 %v6048_v1, %v6192_v32 }
 0x44d   : > { %v3944_v45 = vpop.f32.mrb[1].mxu1  ;;  %v2070_v44 = vpack.c.bf16 %v2050_v13, %v2049_v20  ;;  %v4246_v51 = vunpack.i.l.bf16 %v6175_v35  ;;  %v4241_v32 = vunpack.i.l.bf16 %v6171_v4  ;;  %v4277_v20 = vunpack.i.h.bf16 %v6173_v18 }
 0x44e   : > { %4384 = vrot.lane.b32.xlu1 %v4383_v9, %s7078_s24  ;;  %v1515_v36 = vpop.f32.mrb[2].mxu1  ;;  %v4227_v9 = vunpack.i.h.bf16 %v6146_v28  ;;  %v4296_v45 = vunpack.i.l.bf16 %v6217_v42  ;;  %v4267_v18 = vunpack.i.h.bf16 %v6165_v12 }
 0x44f   : > { %v6262_v7 = vpop.permute.xlu1 %2660  ;;  %v6264_v40 = vpop.permute.xlu0 %3140 }
 0x450   : > { %4379 = vrot.lane.b32.xlu0 %v4378_v46, %s7072_s7  ;;  %v3945_v63 = vpop.f32.mrb[3].mxu1  ;;  %v4222_v46 = vunpack.i.h.bf16 %v6064_v14  ;;  %v2341_v28 = vsel %vm1191_vm5, %v4227_v9, %v4266_v50  ;;  %v2345_v53 = vsel %vm1191_vm5, %v4256_v3, %v4296_v45  ;;  %v3279_v50 = vmul.f32 %v6048_v1, %v6062_v30 }
 0x451   : > { %v4286_v63 = vunpack.i.l.bf16 %v6183_v37  ;;  %v2364_v48 = vpack.c.bf16 %v2341_v28, %v2340_v21  ;;  %v2342_v30 = vsel %vm1191_vm5, %v4241_v32, %v4281_v2  ;;  %v2631_v45 = vmul.f32 %v6048_v1, %v6201_v60 }
 0x452   : > { %3256 = vrot.lane.b32.xlu1 %v5743_v0, %s4686_s26  ;;  %v3455_v21 = vrot.slane %v3279_v50, 4  ;;  %v2623_v50 = vmul.f32 %v6048_v1, %v6194_v6 }
 0x453   : > { %v1562_v41 = vpop.f32.mrb[4].mxu1  ;;  %v6280_v55 = vpop.permute.xlu1 %3132 }
 0x454   : > { %v1568_v26 = vsub.f32 %v1512_v10, %v1562_v41  ;;  %v2677_v59 = vpop.permute.xlu0 %2676  ;;  %2082 = vrot.lane.b32.xlu0 %v2069_v8, %s7072_s7  ;;  %v3950_v43 = vpop.f32.mrb[5].mxu1  ;;  %v4221_v10 = vunpack.i.l.bf16 %v6064_v14  ;;  %v4251_v8 = vunpack.i.l.bf16 %v6155_v56  ;;  %v2343_v41 = vsel %vm1191_vm5, %v4246_v51, %v4286_v63 }
 0x455   : > { %v1565_v54 = vpop.f32.mrb[6].mxu1  ;;  %v2679_v28 = vmul.f32 %v6048_v1, %v2677_v59  ;;  %v3135_v32 = vmul.f32 %v6048_v1, %v6280_v55 }
 0x456   : > { %v1571_v36 = vadd.f32 %v1569_v16, %v1568_v26  ;;  %4389 = vrot.lane.b32.xlu1 %v4388_v61, %s7038_s16  ;;  %v3951_v24 = vpop.f32.mrb[7].mxu1  ;;  %v2071_v13 = vpack.c.bf16 %v4222_v46, %v4221_v10  ;;  %v2344_v61 = vsel %vm1191_vm5, %v4251_v8, %v4291_v49  ;;  %v2787_v16 = vrot.slane %v2635_v19, 4 }
 0x457   : > { %v3137_v57 = vpop.permute.xlu1 %3136  ;;  %v2366_v9 = vpack.c.bf16 %v2345_v53, %v2344_v61  ;;  %v2365_v46 = vpack.c.bf16 %v2343_v41, %v2342_v30  ;;  %v3275_v10 = vmul.f32 %v6048_v1, %v6069_v27  ;;  %v4232_v49 = vunpack.i.h.bf16 %v6163_v15  ;;  %v7090_v41 = vld [vmem:[#allocation17_spill] sm:$0xff] }
 0x458   : > { %1821 = vst.msk [vmem:[%s5689_s15 + $0x2] sm:$0x3] %vm1819_vm13, %v1571_v36  ;;  %v6299_v14 = vpop.permute.xlu0 %3156  ;;  %2084 = vrot.lane.b32.xlu0 %v2070_v44, %s7072_s7  ;;  %v4237_v36 = vunpack.i.h.bf16 %v6167_v22  ;;  %v4272_v44 = vunpack.i.h.bf16 %v6169_v25  ;;  %v4398_v3 = vpack.i.bf16 %v2787_v16, %v3455_v21  ;;  %v2639_v25 = vmul.f32 %v6048_v1, %v6211_v5 }
 0x459   : > { %v4393_v22 = vpack.i.bf16 %v2631_v45, %v3275_v10  ;;  %v3283_v8 = vmul.f32 %v6048_v1, %v6071_v58  ;;  %v3139_v51 = vmul.f32 %v6048_v1, %v3137_v57  ;;  %v2439_v53 = vmul.f32 %v6076_v47, %v5395_v62 }
 0x45a   : > { %2375 = vrot.lane.b32.xlu1 %v2364_v48, %s7072_s7  ;;  %v2347_v27 = vsel %vm1191_vm5, %v4237_v36, %v4277_v20  ;;  %v2346_v59 = vsel %vm1191_vm5, %v4232_v49, %v4272_v44  ;;  %v2619_v57 = vmul.f32 %v6048_v1, %v7090_v41  ;;  %v3285_v47 = vrot.slane %v3135_v32, 4 }
 0x45b   : > { %v6312_v26 = vpop.permute.xlu1 %3148  ;;  %v2367_v2 = vpack.c.bf16 %v2347_v27, %v2346_v59  ;;  %v4413_v61 = vpack.i.bf16 %v3139_v51, %v2623_v50  ;;  %v2667_v21 = vmul.f32 %v6048_v1, %v6240_v33 }
 0x45c   : > { %v6314_v43 = vpop.permute.xlu0 %4304  ;;  %2086 = vrot.lane.b32.xlu0 %v2071_v13, %s7072_s7  ;;  %v4403_v13 = vpack.i.bf16 %v2639_v25, %v3283_v8  ;;  %v2769_v20 = vrot.slane %v2619_v57, 4  ;;  %v2671_v25 = vmul.f32 %v6048_v1, %v6242_v11 }
 0x45d   : > { %v4306_v54 = vunpack.i.l.bf16 %v6314_v43  ;;  %v2823_v36 = vrot.slane %v2667_v21, 4 }
 0x45e   : > { %2379 = vrot.lane.b32.xlu1 %v2366_v9, %s7072_s7  ;;  %v2440_v9 = vpack.c.bf16 %v2439_v53, %v2439_v53  ;;  %v4408_v45 = vpack.i.bf16 %v3285_v47, %v2769_v20  ;;  %v4282_v47 = vunpack.i.h.bf16 %v6177_v29 }
 0x45f   : > { %v6327_v24 = vpop.permute.xlu1 %4299  ;;  %v6340_v19 = vsel %vm1191_vm5, %v4306_v54, %v4267_v18 }
 0x460   : > { %v4301_v60 = vunpack.i.l.bf16 %v6327_v24  ;;  %v6332_v63 = vpop.permute.xlu0 %3152  ;;  %2377 = vrot.lane.b32.xlu0 %v2365_v46, %s7072_s7  ;;  %v4302_v50 = vunpack.i.h.bf16 %v6327_v24  ;;  %v4247_v24 = vunpack.i.h.bf16 %v6175_v35 }
 0x462   : > { %v6343_v12 = vsel %vm1191_vm5, %v2679_v28, %v4301_v60  ;;  %4399 = vrot.lane.b32.xlu1 %v4398_v3, %s7041_s3  ;;  %v2663_v3 = vmul.f32 %v6048_v1, %v6262_v7  ;;  %v3143_v7 = vmul.f32 %v6048_v1, %v6264_v40  ;;  %v4287_v40 = vunpack.i.h.bf16 %v6183_v37 }
 0x463   : > { %v4438_v48 = vpack.i.bf16 %v6340_v19, %v6343_v12  ;;  %v3145_v15 = vpop.permute.xlu1 %3144  ;;  %v4242_v37 = vunpack.i.h.bf16 %v6171_v4 }
 0x464   : > { %v6352_v5 = vpop.permute.xlu0 %3172  ;;  %4394 = vrot.lane.b32.xlu0 %v4393_v22, %s7039_s17  ;;  %v3147_v11 = vmul.f32 %v6048_v1, %v3145_v15  ;;  %v3155_v15 = vmul.f32 %v6048_v1, %v6332_v63  ;;  %v2915_v21 = vsel %vm1191_vm5, %v4247_v24, %v4287_v40 }
 0x465   : > { %v2914_v35 = vsel %vm1191_vm5, %v4242_v37, %v4282_v47  ;;  %v3175_v4 = vmul.f32 %v6048_v1, %v6352_v5 }
 0x466   : > { %2381 = vrot.lane.b32.xlu1 %v2367_v2, %s7072_s7  ;;  %v3294_v2 = vrot.slane %v3143_v7, 4  ;;  %v1723_v7 = vsel %vm1474_vm3, %v6159_v31, 0 }
 0x467   : > { %v3165_v58 = vpop.permute.xlu1 %3164 }
 0x468   : > { %v6364_v16 = vpop.permute.xlu0 %3168  ;;  %4404 = vrot.lane.b32.xlu0 %v4403_v13, %s7042_s13  ;;  %v3167_v29 = vmul.f32 %v6048_v1, %v3165_v58 }
 0x46a   : > { %4414 = vrot.lane.b32.xlu1 %v4413_v61, %s7035_s0  ;;  %v4307_v61 = vunpack.i.h.bf16 %v6314_v43 }
 0x46b   : > { %v6368_v6 = vpop.permute.xlu1 %3160 }
 0x46c   : > { %v6370_v30 = vpop.permute.xlu0 %3188  ;;  %2442 = vrot.lane.b32.xlu0 %v2440_v9, %s7022_s30 }
 0x46d   : > { %v3191_v31 = vmul.f32 %v6048_v1, %v6370_v30 }
 0x46f   : > { %v3181_v54 = vpop.permute.xlu1 %3180  ;;  %v3348_v40 = vrot.slane %v3191_v31, 4 }
 0x470   : > { %v3183_v46 = vmul.f32 %v6048_v1, %v3181_v54  ;;  %4409 = vrot.lane.b32.xlu0 %v4408_v45, %s7022_s30  ;;  %v3185_v10 = vpop.permute.xlu0 %3184 }
 0x471   : > { %v3187_v49 = vmul.f32 %v6048_v1, %v3185_v10  ;;  %v3321_v10 = vrot.slane %v3167_v29, 4 }
 0x472   : > { %v3339_v44 = vrot.slane %v3183_v46, 4  ;;  %v4443_v46 = vpack.i.bf16 %v2915_v21, %v2914_v35 }
 0x473   : > { %v3177_v18 = vpop.permute.xlu1 %3176  ;;  %v4428_v59 = vpack.i.bf16 %v3187_v49, %v2671_v25 }
 0x474   : > { %v4423_v28 = vpack.i.bf16 %v3339_v44, %v2823_v36  ;;  %v3179_v60 = vmul.f32 %v6048_v1, %v3177_v18  ;;  %v6382_v33 = vpop.permute.xlu0 %4314 }
 0x476   : > { %v4418_v27 = vpack.i.bf16 %v3179_v60, %v2663_v3  ;;  %4424 = vrot.lane.b32.xlu1 %v4423_v28, %s7075_s6  ;;  %v3330_v3 = vrot.slane %v3175_v4, 4  ;;  %v4316_v28 = vunpack.i.l.bf16 %v6382_v33 }
 0x477   : > { %v6384_v22 = vpop.permute.xlu1 %4309 }
 0x478   : > { %4419 = vrot.lane.b32.xlu0 %v4418_v27, %s7073_s19  ;;  %v6394_v51 = vpop.permute.xlu0 %4324  ;;  %v4311_v18 = vunpack.i.l.bf16 %v6384_v22  ;;  %s7092_s19 = sld [smem:[#allocation40_spill]] }
 0x479   : > { %v4326_v58 = vunpack.i.l.bf16 %v6394_v51 }
 0x47a   : > { %v2918_v27 = vsel %vm1191_vm5, %v4311_v18, %v4316_v28 }
 0x47b   : > { %v6391_v8 = vpop.permute.xlu1 %4319 }
 0x47c   : > { %4429 = vrot.lane.b32.xlu0 %v4428_v59, %s7074_s14  ;;  %v6404_v41 = vpop.permute.xlu0 %2740  ;;  %v4321_v36 = vunpack.i.l.bf16 %v6391_v8  ;;  %s7093_s14 = smov 96   ;;  %v4322_v4 = vunpack.i.h.bf16 %v6391_v8  ;;  %v4317_v8 = vunpack.i.h.bf16 %v6382_v33  ;;  %v3163_v33 = vmul.f32 %v6048_v1, %v6368_v6 }
 0x47d   : > { %v3171_v6 = vmul.f32 %v6048_v1, %v6364_v16 }
 0x47e   : > { %v2919_v60 = vsel %vm1191_vm5, %v4321_v36, %v4326_v58  ;;  %v1710_v59 = vld [vmem:[%s7092_s19] sm:$0x1]  ;;  %v3159_v36 = vmul.f32 %v6048_v1, %v6299_v14  ;;  %v4312_v58 = vunpack.i.h.bf16 %v6384_v22 }
 0x47f   : > { %v3193_v53 = vpop.permute.xlu1 %3192  ;;  %v4453_v25 = vpack.i.bf16 %v2919_v60, %v2918_v27 }
 0x480   : > { %v3195_v13 = vmul.f32 %v6048_v1, %v3193_v53  ;;  %3295 = vrot.lane.b32.xlu0 %v3294_v2, %s7038_s16  ;;  %v2079_v54 = vpop.permute.xlu0 %2078  ;;  %v3312_v14 = vrot.slane %v3159_v36, 4  ;;  %v3434_v19 = vsel %vm1191_vm5, %v4312_v58, %v4317_v8  ;;  %s7106_s16 = sld [smem:[#allocation46_spill]] }
 0x482   : > { %v6401_v32 = vsel %vm1191_vm5, %v3195_v13, %v4302_v50  ;;  %v2675_v50 = vmul.f32 %v6048_v1, %v6233_v17 }
 0x483   : > { %v6406_v57 = vpop.permute.xlu1 %4329 }
 0x484   : > { %v4331_v9 = vunpack.i.l.bf16 %v6406_v57  ;;  %3299 = vrot.lane.b32.xlu0 %v3147_v11, %s7039_s17  ;;  %v1659_v44 = vpop.permute.xlu0 %1658  ;;  %s7091_s17 = sld [smem:[#allocation38_spill]]  ;;  %v2832_v47 = vrot.slane %v2675_v50, 4  ;;  %v4332_v30 = vunpack.i.h.bf16 %v6406_v57  ;;  %v3151_v57 = vmul.f32 %v6048_v1, %v6312_v26 }
 0x485   : > { %v4327_v26 = vunpack.i.h.bf16 %v6394_v51 }
 0x486   : > { %v6416_v20 = vsel %vm1191_vm5, %v4307_v61, %v4331_v9  ;;  %v4433_v21 = vpack.i.bf16 %v3348_v40, %v2832_v47  ;;  %v3303_v18 = vrot.slane %v3151_v57, 4 }
 0x487   : > { %v4458_v43 = vpack.i.bf16 %v6416_v20, %v6401_v32  ;;  %v1661_v45 = vpop.permute.xlu1 %1660  ;;  %v3435_v60 = vsel %vm1191_vm5, %v4322_v4, %v4327_v26 }
 0x488   : > { %3308 = vrot.lane.b32.xlu0 %v3155_v15, %s7042_s13  ;;  %v1668_v5 = vsel %vm1474_vm3, %v1661_v45, 0  ;;  %v6459_v2 = vpop.permute.xlu0 %4344  ;;  %v2743_v15 = vmul.f32 %v6048_v1, %v6404_v41  ;;  %s4688_s13 = smov [#allocation2]  }
 0x489   : > { %v4346_v61 = vunpack.i.l.bf16 %v6459_v2 }
 0x48a   : > { %v1652_v49 = vld [vmem:[%s7091_s17] sm:$0x1] }
 0x48b   : > { %v1657_v63 = vpop.permute.xlu1 %1656  ;;  %v2947_v17 = vsel %vm1191_vm5, %v4346_v61, %v4332_v30 }
 0x48c   : > { %3953 = vmatpush3.bf16.msra.mxu1 %v1657_v63  ;;  %4444 = vrot.lane.b32.xlu0 %v4443_v46, %s7013_s23  ;;  %v6475_v29 = vpop.permute.xlu0 %4354 }
 0x48d   : > { %3954 = vmatprep.subr.bf16.mxu1 %v7089_v38  ;;  %v4357_v46 = vunpack.i.h.bf16 %v6475_v29 }
 0x490   : > { %3322 = vrot.lane.b32.xlu0 %v3321_v10, %s7077_s1  ;;  %3955 = vmatpush3.bf16.msra.mxu1 %v1659_v44 }
 0x491   : > { %3956 = vmatprep.subr.bf16.mxu1 %v7089_v38 }
 0x494   : > { %3331 = vrot.lane.b32.xlu0 %v3330_v3, %s7078_s24  ;;  %3957 = vmatpush3.bf16.msra.mxu1 %v1668_v5  ;;  %v4297_v5 = vunpack.i.h.bf16 %v6217_v42  ;;  %v4252_v42 = vunpack.i.h.bf16 %v6155_v56  ;;  %s4040_s24 = smul.u32 960, %s7112_s10 }
 0x495   : > { %3962 = vmatprep.subr.bf16.mxu1 %v7089_v38 }
 0x497   : > { %3959 = vmatmul.mubr.msk.bf16.vlgmr.msra.gmra.mrb[8].mxu1 %vm1470_vm1, %v1652_v49 }
 0x498   : > { %4454 = vrot.lane.b32.xlu0 %v4453_v25, %s7013_s23  ;;  %3963 = vmatpush3.bf16.msra.mxu1 %v1723_v7  ;;  %v4257_v7 = vunpack.i.h.bf16 %v6161_v52 }
 0x499   : > { %3964 = vmatprep.mubr.msk.bf16.mxu1 %vm4665_vm11, %v7089_v38  ;;  %3974 = vmatprep.subr.bf16.mxu1 %v7089_v38 }
 0x49a   : > { %v2917_v50 = vsel %vm1191_vm5, %v4257_v7, %v4297_v5 }
 0x49f   : > { %3965 = vmatmul.mubr.msk.bf16.vlgmr.msra.gmra.mrb[12].mxu1 %vm1521_vm4, %v1710_v59  ;;  %v4292_v59 = vunpack.i.h.bf16 %v6209_v39 }
 0x4a0   : > { %3975 = vmatpush3.bf16.msra.mxu1 %v2079_v54  ;;  %3984 = vmatprep.mubr.msk.bf16.mxu1 %vm4665_vm11, %v7089_v38 }
 0x4a1   : > { %3976 = vmatprep.subr.bf16.mxu1 %v7089_v38  ;;  %v2916_v52 = vsel %vm1191_vm5, %v4252_v42, %v4292_v59 }
 0x4a2   : > { %v4448_v16 = vpack.i.bf16 %v2917_v50, %v2916_v52 }
 0x4a7   : > { %v4335_v53 = vpop.permute.xlu1 %4334 }
 0x4a8   : > { %v4337_v13 = vunpack.i.h.bf16 %v4335_v53  ;;  %v4336_v11 = vunpack.i.l.bf16 %v4335_v53 }
 0x4aa   : > { %v2368_v9 = vpack.c.bf16 %v4337_v13, %v4336_v11 }
 0x4ab   : > { %v6464_v24 = vpop.permute.xlu1 %4339 }
 0x4ac   : > { %v4341_v37 = vunpack.i.l.bf16 %v6464_v24  ;;  %2383 = vrot.lane.b32.xlu1 %v2368_v9, %s7072_s7 }
 0x4ae   : > { %v2946_v45 = vsel %vm1191_vm5, %v2743_v15, %v4341_v37  ;;  %v4347_v37 = vunpack.i.h.bf16 %v6459_v2 }
 0x4af   : > { %v4463_v35 = vpack.i.bf16 %v2947_v17, %v2946_v45  ;;  %v6473_v54 = vpop.permute.xlu1 %4349 }
 0x4b0   : > { %4434 = vrot.lane.b32.xlu1 %v4433_v21, %s7076_s8  ;;  %v4352_v41 = vunpack.i.h.bf16 %v6473_v54  ;;  %v6499_v12 = vpop.permute.xlu0 %4364  ;;  %v4351_v15 = vunpack.i.l.bf16 %v6473_v54  ;;  %v4342_v21 = vunpack.i.h.bf16 %v6464_v24  ;;  %s7096_s8 = sld [smem:[#allocation47_spill]] }
 0x4b1   : > { %4464 = vrot.lane.b32.xlu0 %v4463_v35, %s7093_s14  ;;  %v4366_v17 = vunpack.i.l.bf16 %v6499_v12  ;;  %v4356_v35 = vunpack.i.l.bf16 %v6475_v29 }
 0x4b2   : > { %v2948_v44 = vsel %vm1191_vm5, %v4352_v41, %v4357_v46 }
 0x4b3   : > { %v4360_v63 = vpop.permute.xlu1 %4359 }
 0x4b4   : > { %v4362_v10 = vunpack.i.h.bf16 %v4360_v63  ;;  %4439 = vrot.lane.b32.xlu1 %v4438_v48, %s7013_s23  ;;  %v4483_v48 = vpack.i.bf16 %v3435_v60, %v3434_v19  ;;  %v4361_v47 = vunpack.i.l.bf16 %v4360_v63  ;;  %v3430_v63 = vsel %vm1191_vm5, %v4351_v15, %v4356_v35 }
 0x4b6   : > { %v4473_v3 = vpack.i.bf16 %v4362_v10, %v2948_v44  ;;  %v3431_v41 = vsel %vm1191_vm5, %v4361_v47, %v4366_v17  ;;  %v4687_v10 = vmov 1966171168   ;;  %v3019_v44 = vlaneseq }
 0x4b7   : > { %v2081_v28 = vpop.permute.xlu1 %2080  ;;  %v3017_v36 = vunpack.c.l.s4 %v4687_v10 }
 0x4b8   : > { %3304 = vrot.lane.b32.xlu1 %v3303_v18, %s7041_s3  ;;  %3977 = vmatpush3.bf16.msra.mxu1 %v2081_v28  ;;  %v4468_v18 = vpack.i.bf16 %v3431_v41, %v3430_v63  ;;  %v3020_v60 = vshrl.u32 %v3019_v44, 7  ;;  %s7108_s3 = sld [smem:[#allocation19_spill]] }
 0x4b9   : > { %4474 = vrot.lane.b32.xlu0 %v4473_v3, %s7093_s14  ;;  %3978 = vmatprep.subr.bf16.mxu1 %v7089_v38  ;;  %v3018_v8 = vunpack.c.0.s8 %v3017_v36 }
 0x4bc   : > { %v6501_v22 = vpop.permute.xlu1 %4374  ;;  %3313 = vrot.lane.b32.xlu1 %v3312_v14, %s6992_s27  ;;  %v7095_v14 = vld [vmem:[#allocation22_spill] sm:$0xff] }
 0x4bd   : > { %4484 = vrot.lane.b32.xlu0 %v4483_v48, %s7013_s23  ;;  %v4377_v49 = vunpack.i.h.bf16 %v6501_v22  ;;  %v4376_v26 = vunpack.i.l.bf16 %v6501_v22  ;;  %v3594_v19 = vmul.f32 %v6280_v55, %v7095_v14  ;;  %v6573_v55 = vld.sshfl [vmem:[%s7096_s8] sm:$0x11 pattern:$0x75316420] }
 0x4be   : > { %v6507_v51 = vpop.permute.xlu0 %4369 }
 0x4bf   : > { %v4372_v27 = vunpack.i.h.bf16 %v6507_v51  ;;  %v4371_v24 = vunpack.i.l.bf16 %v6507_v51  ;;  %v6568_v51 = vsub.s32 %v3018_v8, %v3020_v60  ;;  %v3595_v5 = vpack.c.bf16 %v3594_v19, %v3594_v19  ;;  %v6637_v8 = vpop.f32.mrb[4].mxu0 }
 0x4c0   : > { %v4385_v25 = vpop.permute.xlu1 %4384  ;;  %3317 = vrot.lane.b32.xlu1 %v3163_v33, %s7071_s2  ;;  %s7094_s2 = sld [smem:[#allocation41_spill]] }
 0x4c1   : > { %v6516_v31 = vsel %vm1191_vm5, %v4372_v27, %v4377_v49  ;;  %v4387_v13 = vunpack.i.h.bf16 %v4385_v25  ;;  %v4386_v29 = vunpack.i.l.bf16 %v4385_v25  ;;  %v3432_v28 = vsel %vm1191_vm5, %v4371_v24, %v4376_v26 }
 0x4c2   : > { %v4380_v53 = vpop.permute.xlu0 %4379  ;;  %v3538_v7 = vrot.slane %v6573_v55, %v6568_v51  ;;  %v3531_v24 = vcombine.high %v6573_v55, %v6573_v55 }
 0x4c3   : > { %v4382_v11 = vunpack.i.h.bf16 %v4380_v53  ;;  %v4381_v54 = vunpack.i.l.bf16 %v4380_v53 }
 0x4c4   : > { %v3257_v40 = vpop.permute.xlu1 %3256  ;;  %3326 = vrot.lane.b32.xlu1 %v3171_v6, %s7072_s7  ;;  %s7109_s7 = sld [smem:[#allocation50_spill]] }
 0x4c5   : > { %v6525_v39 = vsel %vm1191_vm5, %v4382_v11, %v4387_v13  ;;  %v3259_v56 = vmul.f32 %v6048_v1, %v3257_v40  ;;  %v3433_v32 = vsel %vm1191_vm5, %v4381_v54, %v4386_v29  ;;  %v2583_v13 = vmul.f32 19.0, %v7095_v14  ;;  %v7102_v54 = vld [vmem:[#allocation33_spill] sm:$0xff] }
 0x4c6   : > { %v2998_v61 = vpack.c.bf16 %v6525_v39, %v6516_v31  ;;  %v2083_v9 = vpop.permute.xlu0 %2082  ;;  %v2072_v3 = vld [vmem:[%s7094_s2] sm:$0x1]  ;;  %v4478_v48 = vpack.i.bf16 %v3433_v32, %v3432_v28  ;;  %v4367_v11 = vunpack.i.h.bf16 %v6499_v12  ;;  %v1310_v12 = vld [vmem:[%s7099_s21 + $0x8] sm:$0xff]  ;;  %v7104_v29 = vmov 0   ;;  %s7114_s21 = sld [smem:[#allocation6_spill]] }
 0x4c7   : > { %3979 = vmatpush3.bf16.msra.mxu1 %v2083_v9  ;;  %v3462_v57 = vsel %vm1191_vm5, %v3259_v56, %v4342_v21  ;;  %v7097_v9 = vld [vmem:[#allocation21_spill] sm:$0xff]  ;;  %v4527_v32 = vld [vmem:[%s7080_s20] sm:$0xf] }
 0x4c8   : > { %v6531_v30 = vpop.permute.xlu1 %4389  ;;  %4449 = vrot.lane.b32.xlu1 %v4448_v16, %s7013_s23  ;;  %3980 = vmatprep.subr.bf16.mxu1 %v7089_v38  ;;  %v7098_v16 = vld [vmem:[#allocation23_spill] sm:$0xff] }
 0x4c9   : > { %v4391_v45 = vunpack.i.l.bf16 %v6531_v30  ;;  %v2492_v47 = vmul.f32 %v7098_v16, %v7097_v9 }
 0x4ca   : > { %v2085_v1 = vpop.permute.xlu0 %2084 }
 0x4cb   : > { %v3463_v46 = vsel %vm1191_vm5, %v4347_v37, %v4391_v45  ;;  %3981 = vmatpush3.bf16.msra.mxu1 %v2085_v1  ;;  %v2493_v35 = vpack.c.bf16 %v2492_v47, %v2492_v47  ;;  %v2435_v1 = vld [vmem:[%s7101_s4] sm:$0x1]  ;;  %s3746_s4 = sshll.u32 %s7108_s3, 4  ;;  %s6752_s4 = int_to_ptr.vmem [resolvable:$true] %s3746_s4 }
 0x4cc   : > { %v4488_v2 = vpack.i.bf16 %v3463_v46, %v3462_v57  ;;  %v2376_v4 = vpop.permute.xlu1 %2375  ;;  %4459 = vrot.lane.b32.xlu1 %v4458_v43, %s7013_s23  ;;  %3982 = vmatprep.subr.bf16.mxu1 %v7089_v38  ;;  %v3078_v57 = vmul.f32 %v5604_v23, %v7102_v54  ;;  %s7117_s28 = sand.u32 1, %s7114_s21   ;;  %s4528_s20 = scalar_lea.vmem %s6752_s4, 960 }
 0x4cd   : > { %3995 = vmatpush3.bf16.msra.mxu0 %v2376_v4  ;;  %v2498_v41 = vsel %vm1474_vm3, %v2493_v35, 0  ;;  %p4529_p12 = scmp.ne.s32.totalorder %s6752_s4, %s4528_s20 }
 0x4ce   : > { %v2087_v58 = vpop.permute.xlu0 %2086  ;;  %4489 = vrot.lane.b32.xlu0 %v4488_v2, %s7093_s14  ;;  %3996 = vmatprep.subr.bf16.mxu0 %v7089_v38  ;;  %v3079_v63 = vpack.c.bf16 %v3078_v57, %v3078_v57  ;;  %v2491_v2 = vld [vmem:[%s7103_s9] sm:$0x1]  ;;  %s7116_s9 = sld [smem:[#allocation51_spill]] }
 0x4cf   : > { %v2097_v20 = vsel %vm1265_vm12, %v2087_v58, 0  ;;  %v3545_v58 = vrot.slane %v3531_v24, %v6568_v51  ;;  %p4530_p13 = pnand %p4529_p12, %p4830_p4 }
 0x4d0   : > { %v2380_v43 = vpop.permute.xlu1 %2379  ;;  %3983 = vmatpush3.bf16.msra.mxu1 %v2097_v20  ;;  %4469 = vrot.lane.b32.xlu1 %v4468_v18, %s7013_s23  ;;  %v3077_v18 = vld [vmem:[%s7105_s29] sm:$0x1]  ;;  %v3130_v20 = vmul.f32 %v4527_v32, %v5743_v0  ;;  %s6756_s29 = scalar_lea.sflag [#allocation3], %s7117_s28 }
 0x4d1   : > { %4008 = vmatprep.subr.bf16.mxu1 %v7089_v38  ;;  %p4531_p0 = pneg %p4530_p13 }
 0x4d2   : > { %v2378_v22 = vpop.permute.xlu0 %2377 }
 0x4d3   : > { %3985 = vmatmul.mubr.msk.bf16.vlgmr.msra.gmra.mrb[16].mxu1 %vm2092_vm2, %v2072_v3  ;;  %3997 = vmatpush3.bf16.msra.mxu0 %v2378_v22 }
 0x4d4   : > { %v4400_v33 = vpop.permute.xlu1 %4399  ;;  %4479 = vrot.lane.b32.xlu1 %v4478_v48, %s7013_s23  ;;  %3998 = vmatprep.subr.bf16.mxu0 %v7089_v38  ;;  %s7110_s23 = sld [smem:[#allocation49_spill]] }
 0x4d5   : > { %4010 = vmatprep.mubr.msk.bf16.mxu1 %vm4665_vm11, %v7089_v38  ;;  %v4402_v27 = vunpack.i.h.bf16 %v4400_v33  ;;  %v4401_v53 = vunpack.i.l.bf16 %v4400_v33  ;;  %v6644_v33 = vld.sshfl [vmem:[%s7106_s16] sm:$0x11 pattern:$0x75316420]  ;;  %s4532_s16 = sshll.u32 %s4688_s13, 4  ;;  %s4533_s16 = int_to_ptr.vmem [resolvable:$false] %s4532_s16 }
 0x4d6   : > { %v4395_v49 = vpop.permute.xlu0 %4394  ;;  %s4534_s17 = scalar_lea.vmem %s4533_s16, 1920  ;;  %p4535_p1 = scmp.lt.s32.totalorder %s6752_s4, %s4533_s16 }
 0x4d7   : > { %v4397_v25 = vunpack.i.h.bf16 %v4395_v49  ;;  %3999 = vmatpush3.bf16.msra.mxu0 %v2380_v43  ;;  %v4396_v59 = vunpack.i.l.bf16 %v4395_v49  ;;  %p4536_p2 = scmp.lt.s32.totalorder %s4534_s17, %s4528_s20 }
 0x4d8   : > { %3597 = vrot.lane.b32.xlu1 %v3595_v5, %s7022_s30  ;;  %4000 = vmatprep.subr.bf16.mxu0 %v7089_v38  ;;  %v2382_v42 = vpop.permute.xlu1 %2381 }
 0x4d9   : > { %v6580_v6 = vsel %vm1191_vm5, %v4397_v25, %v4402_v27  ;;  %v3464_v56 = vsel %vm1191_vm5, %v4396_v59, %v4401_v53  ;;  %v3015_v27 = vcombine.high %v6644_v33, %v6644_v33  ;;  %v2614_v59 = vmul.f32 %v4527_v32, %v5604_v23  ;;  %p4537_p3 = por %p4536_p2, %p4535_p1 }
 0x4da   : > { %v4405_v50 = vpop.permute.xlu0 %4404 }
 0x4db   : > { %v4407_v40 = vunpack.i.h.bf16 %v4405_v50  ;;  %v4406_v52 = vunpack.i.l.bf16 %v4405_v50  ;;  %4001 = vmatpush3.bf16.msra.mxu0 %v2382_v42  ;;  %v4392_v42 = vunpack.i.h.bf16 %v6531_v30  ;;  %p4538_p5 = pnand %p4537_p3, %p4531_p0 }
 0x4dc   : > { %2585 = vrot.lane.b32.xlu1 %v2583_v13, %s7022_s30  ;;  %4002 = vmatprep.subr.bf16.mxu0 %v7089_v38  ;;  %v4415_v10 = vpop.permute.xlu1 %4414 }
 0x4dd   : > { %v4493_v15 = vpack.i.bf16 %v4406_v52, %v3464_v56  ;;  %v6590_v37 = vsel %vm1191_vm5, %v4407_v40, %v4367_v11  ;;  %v4417_v26 = vunpack.i.h.bf16 %v4415_v10  ;;  %v4416_v25 = vunpack.i.l.bf16 %v4415_v10  ;;  %v2369_v40 = vld [vmem:[%s7107_s12] sm:$0x1] }
 0x4de   : > { %v2997_v21 = vpack.c.bf16 %v6590_v37, %v6580_v6  ;;  %v2443_v17 = vpop.permute.xlu0 %2442  ;;  %v3029_v52 = vrot.slane %v3015_v27, %v6568_v51 }
 0x4df   : > { %v2448_v45 = vsel %vm1474_vm3, %v2443_v17, 0  ;;  %4494 = vrot.lane.b32.xlu0 %v4493_v15, %s7093_s14  ;;  %v2837_v9 = vsel %vm1191_vm5, %v4416_v25, %v4392_v42 }
 0x4e0   : > { %4009 = vmatpush3.bf16.msra.mxu1 %v2448_v45  ;;  %2191 = vperm.xlu1 %4207, %v1310_v12  }
 0x4e1   : > { %4014 = vmatprep.subr.bf16.mxu1 %v7089_v38 }
 0x4e2   : > { %v4410_v46 = vpop.permute.xlu0 %4409 }
 0x4e3   : > { %4011 = vmatmul.mubr.msk.bf16.vlgmr.msra.gmra.mrb[20].mxu1 %vm1521_vm4, %v2435_v1  ;;  %v4412_v44 = vunpack.i.h.bf16 %v4410_v46  ;;  %v4411_v49 = vunpack.i.l.bf16 %v4410_v46 }
 0x4e4   : > { %4015 = vmatpush3.bf16.msra.mxu1 %v2498_v41  ;;  %2555 = vrot.lane.b32.xlu1 %v5395_v62, %s7022_s30  ;;  %v3084_v62 = vsel %vm1474_vm3, %v3079_v63, 0 }
 0x4e5   : > { %4016 = vmatprep.mubr.msk.bf16.mxu1 %vm4665_vm11, %v7089_v38  ;;  %4020 = vmatprep.subr.bf16.mxu1 %v7089_v38  ;;  %v3352_v3 = vsel %vm1191_vm5, %v3130_v20, %v4412_v44  ;;  %v2836_v50 = vsel %vm1191_vm5, %v2614_v59, %v4411_v49 }
 0x4e6   : > { %v2996_v23 = vpack.c.bf16 %v2837_v9, %v2836_v50 }
 0x4e8   : > { %3713 = vrot.lane.b32.xlu1 %v7095_v14, %s7022_s30  ;;  %v3972_v14 = vpop.f32.mrb[5].mxu0  ;;  %v4425_v5 = vpop.permute.xlu1 %4424  ;;  %s6750_s30 = scalar_lea.hbm %s7116_s9, %s4040_s24 }
 0x4e9   : > { %v1812_v19 = vpop.f32.mrb[6].mxu0  ;;  %v4427_v47 = vunpack.i.h.bf16 %v4425_v5  ;;  %v4426_v44 = vunpack.i.l.bf16 %v4425_v5 }
 0x4ea   : > { %v6617_v4 = vpop.permute.xlu0 %4419  ;;  %v3973_v48 = vpop.f32.mrb[7].mxu0 }
 0x4eb   : > { %4017 = vmatmul.mubr.msk.bf16.vlgmr.msra.gmra.mrb[24].mxu1 %vm1521_vm4, %v2491_v2  ;;  %v4422_v16 = vunpack.i.h.bf16 %v6617_v4  ;;  %v4421_v2 = vunpack.i.l.bf16 %v6617_v4 }
 0x4ec   : > { %4021 = vmatpush3.bf16.msra.mxu1 %v3084_v62  ;;  %4022 = vmatprep.mubr.msk.bf16.mxu1 %vm4665_vm11, %v7089_v38 }
 0x4ed   : > { %3553 = vmatprep.subr.bf16.mxu1 %v7104_v29  ;;  %v3358_v12 = vsel %vm1191_vm5, %v4422_v16, %v4427_v47  ;;  %v2842_v6 = vsel %vm1191_vm5, %v4421_v2, %v4426_v44 }
 0x4ee   : > { %v6626_v36 = vpop.permute.xlu0 %4429 }
 0x4ef   : > { %v4432_v56 = vunpack.i.h.bf16 %v6626_v36  ;;  %v4431_v62 = vunpack.i.l.bf16 %v6626_v36 }
 0x4f2   : > { %v3296_v43 = vpop.permute.xlu0 %3295 }
 0x4f3   : > { %v3353_v28 = vsel %vm1191_vm5, %v4417_v26, %v3296_v43  ;;  %4023 = vmatmul.mubr.msk.bf16.vlgmr.msra.gmra.mrb[28].mxu1 %vm1521_vm4, %v3077_v18  ;;  %v1311_v26 = vld [vmem:[%s7100_s25 + $0x10] sm:$0x3] }
 0x4f4   : > { %v3512_v60 = vpack.c.bf16 %v3353_v28, %v3352_v3  ;;  %3887 = vmatprep.mubr.msk.bf16.mxu1 %vm1261_vm10, %v3545_v58  ;;  %3698 = vperm.xlu0 %4498, %v1311_v26   ;;  %v3022_v26 = vrot.slane %v6644_v33, %v6568_v51 }
 0x4f6   : > { %3554 = vmatpush1.bf16.msra.mxu1 %v3512_v60  ;;  %v3300_v22 = vpop.permute.xlu0 %3299 }
 0x4f7   : > { %3555 = vmatprep.subr.bf16.mxu1 %v7104_v29 }
 0x4fa   : > { %v3309_v13 = vpop.permute.xlu0 %3308 }
 0x4fe   : > { %v4445_v17 = vpop.permute.xlu0 %4444 }
 0x4ff   : > { %v4447_v31 = vunpack.i.h.bf16 %v4445_v17  ;;  %v4446_v39 = vunpack.i.l.bf16 %v4445_v17 }
 0x501   : > { %v3001_v60 = vpack.c.bf16 %v4447_v31, %v4446_v39 }
 0x502   : > { %v3323_v18 = vpop.permute.xlu0 %3322 }
 0x506   : > { %v3332_v3 = vpop.permute.xlu0 %3331 }
 0x509   : > { %v6665_v41 = vpop.f32.mrb[8].mxu0 }
 0x50a   : > { %v3992_v46 = vpop.f32.mrb[9].mxu0  ;;  %v4455_v19 = vpop.permute.xlu0 %4454 }
 0x50b   : > { %v2185_v63 = vpop.f32.mrb[10].mxu0  ;;  %v4456_v42 = vunpack.i.l.bf16 %v4455_v19 }
 0x50c   : > { %v3993_v24 = vpop.f32.mrb[11].mxu0 }
 0x51e   : > { %v2384_v53 = vpop.permute.xlu1 %2383 }
 0x51f   : > { %v2393_v11 = vsel %vm1265_vm12, %v2384_v53, 0  ;;  %v4457_v53 = vunpack.i.h.bf16 %v4455_v19 }
 0x520   : > { %4003 = vmatpush3.bf16.msra.mxu0 %v2393_v11 }
 0x521   : > { %3037 = vmatprep.subr.bf16.mxu0 %v7104_v29  ;;  %v3003_v9 = vpack.c.bf16 %v4457_v53, %v4456_v42  ;;  %v7113_v42 = vrot.slane %v5454_v34, 4 }
 0x522   : > { %v4435_v30 = vpop.permute.xlu1 %4434 }
 0x523   : > { %v4437_v15 = vunpack.i.h.bf16 %v4435_v30  ;;  %4005 = vmatmul.mubr.msk.bf16.vlgmr.msra.gmra.mrb[12].mxu0 %vm2092_vm2, %v2369_v40  ;;  %v4436_v57 = vunpack.i.l.bf16 %v4435_v30  ;;  %v4465_v27 = vpop.permute.xlu0 %4464 }
 0x524   : > { %3038 = vmatpush1.bf16.msra.mxu0 %v2996_v23  ;;  %3884 = vmatprep.mubr.msk.bf16.mxu0 %vm1261_vm10, %v3029_v52  ;;  %v4467_v16 = vunpack.i.h.bf16 %v4465_v27  ;;  %v4466_v23 = vunpack.i.l.bf16 %v4465_v27 }
 0x525   : > { %v3359_v45 = vsel %vm1191_vm5, %v4432_v56, %v4437_v15  ;;  %3039 = vmatprep.subr.bf16.mxu0 %v7104_v29  ;;  %v2843_v58 = vsel %vm1191_vm5, %v4431_v62, %v4436_v57 }
 0x526   : > { %v3515_v35 = vpack.c.bf16 %v3359_v45, %v3358_v12  ;;  %v4440_v1 = vpop.permute.xlu1 %4439  ;;  %v2999_v37 = vpack.c.bf16 %v2843_v58, %v2842_v6  ;;  %v3004_v45 = vpack.c.bf16 %v4467_v16, %v4466_v23 }
 0x527   : > { %v4441_v4 = vunpack.i.l.bf16 %v4440_v1 }
 0x528   : > { %3040 = vmatpush1.bf16.msra.mxu0 %v2997_v21  ;;  %v4442_v21 = vunpack.i.h.bf16 %v4440_v1 }
 0x529   : > { %3041 = vmatprep.subr.bf16.mxu0 %v7104_v29 }
 0x52a   : > { %v3305_v10 = vpop.permute.xlu1 %3304 }
 0x52b   : > { %v3354_v32 = vsel %vm1191_vm5, %v3300_v22, %v3305_v10  ;;  %v4475_v11 = vpop.permute.xlu0 %4474 }
 0x52c   : > { %3042 = vmatpush1.bf16.msra.mxu0 %v2998_v61  ;;  %v3000_v61 = vpack.c.bf16 %v4442_v21, %v4441_v4  ;;  %v4477_v47 = vunpack.i.h.bf16 %v4475_v11  ;;  %v4476_v56 = vunpack.i.l.bf16 %v4475_v11 }
 0x52d   : > { %3043 = vmatprep.subr.bf16.mxu0 %v7104_v29 }
 0x52e   : > { %v3314_v36 = vpop.permute.xlu1 %3313  ;;  %v3005_v1 = vpack.c.bf16 %v4477_v47, %v4476_v56 }
 0x52f   : > { %v3355_v20 = vsel %vm1191_vm5, %v3309_v13, %v3314_v36  ;;  %v4485_v57 = vpop.permute.xlu0 %4484 }
 0x530   : > { %v3513_v43 = vpack.c.bf16 %v3355_v20, %v3354_v32  ;;  %3044 = vmatpush1.bf16.msra.mxu0 %v2999_v37  ;;  %v4487_v62 = vunpack.i.h.bf16 %v4485_v57  ;;  %v4486_v24 = vunpack.i.l.bf16 %v4485_v57  ;;  %v3035_v58 = vsel %vm1265_vm12, %v3005_v1, 0 }
 0x531   : > { %3045 = vmatprep.subr.bf16.mxu0 %v7104_v29 }
 0x532   : > { %v3318_v28 = vpop.permute.xlu1 %3317  ;;  %3556 = vmatpush1.bf16.msra.mxu1 %v3513_v43  ;;  %v3519_v6 = vpack.c.bf16 %v4487_v62, %v4486_v24 }
 0x533   : > { %3557 = vmatprep.subr.bf16.mxu1 %v7104_v29  ;;  %v3356_v48 = vsel %vm1191_vm5, %v3318_v28, %v3323_v18 }
 0x534   : > { %3046 = vmatpush1.bf16.msra.mxu0 %v3000_v61 }
 0x535   : > { %3047 = vmatprep.subr.bf16.mxu0 %v7104_v29 }
 0x536   : > { %v3327_v14 = vpop.permute.xlu1 %3326 }
 0x537   : > { %v3357_v22 = vsel %vm1191_vm5, %v3327_v14, %v3332_v3  ;;  %vm3702_vm5 = vcmask 128004   ;;  %v7111_v14 = vld [vmem:[#allocation24_spill] sm:$0xff] }
 0x538   : > { %v3514_v5 = vpack.c.bf16 %v3357_v22, %v3356_v48  ;;  %3048 = vmatpush1.bf16.msra.mxu0 %v3001_v60 }
 0x539   : > { %3049 = vmatprep.subr.bf16.mxu0 %v7104_v29 }
 0x53a   : > { %v4450_v49 = vpop.permute.xlu1 %4449  ;;  %3558 = vmatpush1.bf16.msra.mxu1 %v3514_v5 }
 0x53b   : > { %v4452_v25 = vunpack.i.h.bf16 %v4450_v49  ;;  %v4451_v59 = vunpack.i.l.bf16 %v4450_v49  ;;  %3559 = vmatprep.subr.bf16.mxu1 %v7104_v29 }
 0x53d   : > { %v3002_v50 = vpack.c.bf16 %v4452_v25, %v4451_v59 }
 0x53e   : > { %v4460_v13 = vpop.permute.xlu1 %4459  ;;  %3560 = vmatpush1.bf16.msra.mxu1 %v3515_v35 }
 0x53f   : > { %v4462_v40 = vunpack.i.h.bf16 %v4460_v13  ;;  %v4461_v52 = vunpack.i.l.bf16 %v4460_v13  ;;  %3050 = vmatpush1.bf16.msra.mxu0 %v3002_v50  ;;  %3561 = vmatprep.subr.bf16.mxu1 %v7104_v29 }
 0x540   : > { %3051 = vmatprep.subr.bf16.mxu0 %v7104_v29  ;;  %v4490_v44 = vpop.permute.xlu0 %4489 }
 0x541   : > { %v3516_v30 = vpack.c.bf16 %v4462_v40, %v4461_v52  ;;  %v4492_v37 = vunpack.i.h.bf16 %v4490_v44  ;;  %v4491_v21 = vunpack.i.l.bf16 %v4490_v44 }
 0x542   : > { %v4470_v15 = vpop.permute.xlu1 %4469 }
 0x543   : > { %v4472_v12 = vunpack.i.h.bf16 %v4470_v15  ;;  %v4471_v17 = vunpack.i.l.bf16 %v4470_v15  ;;  %3052 = vmatpush1.bf16.msra.mxu0 %v3003_v9  ;;  %3562 = vmatpush1.bf16.msra.mxu1 %v3516_v30  ;;  %v3520_v33 = vpack.c.bf16 %v4492_v37, %v4491_v21 }
 0x544   : > { %3563 = vmatprep.subr.bf16.mxu1 %v7104_v29  ;;  %3053 = vmatprep.subr.bf16.mxu0 %v7104_v29 }
 0x545   : > { %v3517_v35 = vpack.c.bf16 %v4472_v12, %v4471_v17 }
 0x546   : > { %v4480_v46 = vpop.permute.xlu1 %4479 }
 0x547   : > { %v4482_v63 = vunpack.i.h.bf16 %v4480_v46  ;;  %v4481_v2 = vunpack.i.l.bf16 %v4480_v46  ;;  %3054 = vmatpush1.bf16.msra.mxu0 %v3004_v45  ;;  %3564 = vmatpush1.bf16.msra.mxu1 %v3517_v35 }
 0x548   : > { %3055 = vmatprep.subr.bf16.mxu0 %v7104_v29  ;;  %3565 = vmatprep.subr.bf16.mxu1 %v7104_v29 }
 0x549   : > { %v3518_v10 = vpack.c.bf16 %v4482_v63, %v4481_v2 }
 0x54a   : > { %v3598_v18 = vpop.permute.xlu1 %3597 }
 0x54b   : > { %3056 = vmatpush1.bf16.msra.mxu0 %v3035_v58  ;;  %3566 = vmatpush1.bf16.msra.mxu1 %v3518_v10  ;;  %v3603_v4 = vsel %vm1474_vm3, %v3598_v18, 0 }
 0x54c   : > { %3567 = vmatprep.subr.bf16.mxu1 %v7104_v29  ;;  %4026 = vmatprep.subr.bf16.mxu0 %v7089_v38 }
 0x54e   : > { %v2586_v36 = vpop.permute.xlu1 %2585  ;;  %3070 = vmatmul.mubr.bf16.vlgmr.msra.gmra.mrb[16].mxu0 %v3022_v26 }
 0x54f   : > { %v2588_v32 = vsub.f32 %v7102_v54, %v2586_v36  ;;  %3568 = vmatpush1.bf16.msra.mxu1 %v3519_v6  ;;  %4027 = vmatpush3.bf16.msra.mxu0 %v3603_v4  ;;  %v3593_v54 = vld [vmem:[%s7109_s7] sm:$0x1] }
 0x550   : > { %3569 = vmatprep.subr.bf16.mxu1 %v7104_v29  ;;  %4028 = vmatprep.mubr.msk.bf16.mxu0 %vm4665_vm11, %v7089_v38 }
 0x551   : > { %v3647_v20 = vmul.f32 %v5743_v0, %v2588_v32  ;;  %3894 = vst.msk [vmem:[%s7108_s3 + $0x38] sm:$0xf] %vm1823_vm0, %v2588_v32  ;;  %v4495_v43 = vpop.permute.xlu0 %4494  ;;  %4032 = vmatprep.subr.bf16.mxu0 %v7089_v38 }
 0x552   : > { %v4497_v3 = vunpack.i.h.bf16 %v4495_v43  ;;  %v4496_v31 = vunpack.i.l.bf16 %v4495_v43 }
 0x553   : > { %v3648_v39 = vpack.c.bf16 %v3647_v20, %v3647_v20  ;;  %3570 = vmatpush1.bf16.msra.mxu1 %v3520_v33 }
 0x554   : > { %v3521_v61 = vpack.c.bf16 %v4497_v3, %v4496_v31  ;;  %3571 = vmatprep.subr.bf16.mxu1 %v7104_v29  ;;  %v3646_v29 = vld [vmem:[%s7110_s23] sm:$0x1] }
 0x555   : > { %v3653_v0 = vsel %vm1474_vm3, %v3648_v39, 0 }
 0x556   : > { %4029 = vmatmul.mubr.msk.bf16.vlgmr.msra.gmra.mrb[20].mxu0 %vm1521_vm4, %v3593_v54  ;;  %v3551_v28 = vsel %vm1265_vm12, %v3521_v61, 0 }
 0x557   : > { %4033 = vmatpush3.bf16.msra.mxu0 %v3653_v0  ;;  %3572 = vmatpush1.bf16.msra.mxu1 %v3551_v28 }
 0x558   : > { %4034 = vmatprep.mubr.msk.bf16.mxu0 %vm4665_vm11, %v7089_v38 }
 0x55a   : > { %3586 = vmatmul.mubr.bf16.vlgmr.msra.gmra.mrb[32].mxu1 %v3538_v7 }
 0x55e   : > { %4035 = vmatmul.mubr.msk.bf16.vlgmr.msra.gmra.mrb[24].mxu0 %vm1521_vm4, %v3646_v29 }
 0x55f   : > { %v6727_v60 = vpop.permute.xlu1 %2191 }
 0x560   : > { %v2613_v19 = vadd.f32 %v6727_v60, %v7111_v14 }
 0x562   : > { %3703 = vst.msk [vmem:[%s5689_s15 + $0x8] sm:$0x30] %vm3702_vm5, %v2613_v19 }
 0x563   : > { %v2556_v48 = vpop.permute.xlu1 %2555 }
 0x564   : > { %3881 = vst.msk [vmem:[%s7108_s3 + $0x20] sm:$0xf] %vm1823_vm0, %v2556_v48 }
 0x567   : > { %v3714_v38 = vpop.permute.xlu1 %3713 }
 0x568   : > { %3893 = vst.msk [vmem:[%s7108_s3 + $0x34] sm:$0xf] %vm1823_vm0, %v3714_v38 }
 0x56a   : > { %v1704_v51 = vpop.f32.mrb[8].mxu1 }
 0x56b   : > { %v3960_v55 = vpop.f32.mrb[9].mxu1 }
 0x56c   : > { %v1707_v7 = vpop.f32.mrb[10].mxu1 }
 0x56d   : > { %v3961_v22 = vpop.f32.mrb[11].mxu1 }
 0x572   : > { %v1759_v5 = vpop.f32.mrb[12].mxu1 }
 0x573   : > { %v1765_v49 = vsub.f32 %v1704_v51, %v1759_v5  ;;  %v3966_v27 = vpop.f32.mrb[13].mxu1 }
 0x574   : > { %v1762_v25 = vpop.f32.mrb[14].mxu1 }
 0x575   : > { %v1815_v59 = vsub.f32 %v1765_v49, %v6637_v8  ;;  %v3967_v53 = vpop.f32.mrb[15].mxu1 }
 0x577   : > { %v1818_v50 = vadd.f32 %v7113_v42, %v1815_v59 }
 0x579   : > { %1822 = vst.msk [vmem:[%s5689_s15 + $0x4] sm:$0x3] %vm1819_vm13, %v1818_v50 }
 0x5a6   : > { %v2133_v13 = vpop.f32.mrb[16].mxu1 }
 0x5a7   : > { %v2188_v11 = vsub.f32 %v2133_v13, %v6665_v41  ;;  %v3986_v40 = vpop.f32.mrb[17].mxu1 }
 0x5a8   : > { %v2136_v52 = vpop.f32.mrb[18].mxu1 }
 0x5a9   : > { %v2194_v9 = vadd.f32 %v6727_v60, %v2188_v11  ;;  %v3987_v16 = vpop.f32.mrb[19].mxu1 }
 0x5ab   : > { %2546 = vst.msk [vmem:[%s5689_s15 + $0x8] sm:$0x3] %vm1819_vm13, %v2194_v9 }
 0x5b6   : > { %v2484_v8 = vpop.f32.mrb[20].mxu1 }
 0x5b7   : > { %v4012_v34 = vpop.f32.mrb[21].mxu1 }
 0x5b8   : > { %v2487_v41 = vpop.f32.mrb[22].mxu1 }
 0x5b9   : > { %4541 = shalt.err (!%p4538_p5)
}
 0x5ba   : > { %s4542_s0 = scalar_lea.hbm %s6750_s30, 960  ;;  %s4546_s14 = scalar_lea.hbm %s7116_s9, 1920 }
 0x5bb   : > { %p4543_p6 = scmp.ne.s32.totalorder %s6750_s30, %s4542_s0  ;;  %p4547_p10 = scmp.lt.u32.totalorder %s6750_s30, %s7116_s9 }
 0x5bc   : > { %p4548_p11 = scmp.lt.u32.totalorder %s4546_s14, %s4542_s0  ;;  %p4550_p13 = scmp.lt.u32.totalorder %s4542_s0, %s6750_s30 }
 0x5bd   : > { %p4544_p7 = pnand %p4543_p6, %p4830_p4 }
 0x5be   : > { %p4549_p12 = por %p4548_p11, %p4547_p10 }
 0x5bf   : > { %p4545_p9 = pneg %p4544_p7 }
 0x5c0   : > { %p4551_p0 = por %p4550_p13, %p4549_p12 }
 0x5c2   : > { %p4552_p1 = pnand %p4551_p0, %p4545_p9 }
 0x5c4   : > { %4555 = shalt.err (!%p4552_p1)
}
 0x5c5   : > { %s4689_s2 = smov 64   ;;  %v4013_v23 = vpop.f32.mrb[23].mxu1  ;;  %v2541_v62 = vrot.slane %v6727_v60, 2  ;;  %v3127_v58 = vrot.slane %v6727_v60, 6  ;;  %v3699_v61 = vpop.permute.xlu0 %3698 }
 0x5c6   : > { %4041 = dma.vmem_to_hbm [thread:$0]  (%p4830_p4), %s6752_s4, 960, %s6750_s30, %s6756_s29, %s4689_s2, %s4689_s2, %s7085_s22   ;;  %v2534_v30 = vpop.f32.mrb[24].mxu1 }
 0x5c7   : > { %v4018_v47 = vpop.f32.mrb[25].mxu1 }
 0x5c8   : > { %v2537_v56 = vpop.f32.mrb[26].mxu1 }
 0x5c9   : > { %v4019_v15 = vpop.f32.mrb[27].mxu1 }
 0x5ca   : > { %v3120_v12 = vpop.f32.mrb[28].mxu1 }
 0x5cb   : > { %v4024_v17 = vpop.f32.mrb[29].mxu1 }
 0x5cc   : > { %v3123_v45 = vpop.f32.mrb[30].mxu1 }
 0x5cd   : > { %v4025_v35 = vpop.f32.mrb[31].mxu1 }
 0x5f6   : > { %v2429_v1 = vpop.f32.mrb[12].mxu0 }
 0x5f7   : > { %v2490_v57 = vsub.f32 %v2429_v1, %v2484_v8  ;;  %v4006_v46 = vpop.f32.mrb[13].mxu0 }
 0x5f8   : > { %v2432_v63 = vpop.f32.mrb[14].mxu0 }
 0x5f9   : > { %v2540_v2 = vsub.f32 %v2490_v57, %v2534_v30  ;;  %v4007_v24 = vpop.f32.mrb[15].mxu0 }
 0x5fb   : > { %v2543_v10 = vadd.f32 %v2541_v62, %v2540_v2 }
 0x5fd   : > { %2547 = vst.msk [vmem:[%s5689_s15 + $0xa] sm:$0x3] %vm1819_vm13, %v2543_v10 }
 0x621   : > { %v3071_v44 = vpop.f32.mrb[16].mxu0 }
 0x622   : > { %v3126_v18 = vsub.f32 %v3071_v44, %v3120_v12  ;;  %v3073_v26 = vpop.f32.mrb[17].mxu0 }
 0x623   : > { %v3074_v6 = vpop.f32.mrb[18].mxu0 }
 0x624   : > { %v3129_v37 = vadd.f32 %v3127_v58, %v3126_v18  ;;  %v3075_v21 = vpop.f32.mrb[19].mxu0 }
 0x626   : > { %3704 = vst.msk [vmem:[%s5689_s15 + $0xe] sm:$0x3] %vm1819_vm13, %v3129_v37 }
 0x629   : > { %v3639_v4 = vpop.f32.mrb[20].mxu0 }
 0x62a   : > { %v4030_v36 = vpop.f32.mrb[21].mxu0 }
 0x62b   : > { %v3642_v32 = vpop.f32.mrb[22].mxu0 }
 0x62c   : > { %v4031_v33 = vpop.f32.mrb[23].mxu0 }
 0x62d   : > { %v3587_v20 = vpop.f32.mrb[32].mxu1 }
 0x62e   : > { %v3645_v43 = vsub.f32 %v3587_v20, %v3639_v4  ;;  %v3589_v3 = vpop.f32.mrb[33].mxu1 }
 0x62f   : > { %v3590_v31 = vpop.f32.mrb[34].mxu1 }
 0x630   : > { %v3591_v39 = vpop.f32.mrb[35].mxu1 }
 0x631   : > { %v3689_v54 = vpop.f32.mrb[24].mxu0 }
 0x632   : > { %v3695_v0 = vsub.f32 %v3645_v43, %v3689_v54  ;;  %v4036_v28 = vpop.f32.mrb[25].mxu0 }
 0x633   : > { %v3692_v29 = vpop.f32.mrb[26].mxu0 }
 0x634   : > { %v3701_v60 = vadd.f32 %v3699_v61, %v3695_v0  ;;  %v4037_v14 = vpop.f32.mrb[27].mxu0 }
 0x636   : > { %3705 = vst.msk [vmem:[%s5689_s15 + $0x10] sm:$0x3] %vm1819_vm13, %v3701_v60 }
 0x637 PF: > { %s7118_s22 = sld [smem:[#allocation10_spill]]  ;;  %s7119_s7 = sld [smem:[#allocation5_spill]] }
 0x63d   : > { %p4047_p4 = scmp.ge.s32.totalorder %s7118_s22, 2  ;;  %s3772_s8 = sand.u32 1, %s7119_s7  }
 0x63e   : > { %s3773_s23 = scalar_lea.sflag [#allocation3], %s3772_s8 }
 0x63f   : > { %p4044_p2 = pnand %p4047_p4, %p4837_p8 }
 0x641   : > { %4581 = dma.done.wait (!%p4044_p2), %s3773_s23, 960  }
 0x642   : > { %4583 = vsyncadd (!%p4044_p2), %s3773_s23, 4294966336  ;;  %s33_s22 = sadd.s32 1, %s7118_s22   ;;  %s7121_s0 = sld [smem:[#allocation6_spill]] }
 0x643   : > { %p30_p3 = scmp.ge.s32.totalorder %s33_s22, 4   ;;  %s7122_s30 = sld [smem:[#allocation7_spill]] }
 0x644   : > { %s7123_s20 = sld [smem:[#allocation14_spill]]  ;;  %s7124_s21 = sld [smem:[#allocation9_spill]] }
 0x645   : > { %s7125_s1 = sld [smem:[#allocation11_spill]]  ;;  %32 = sbr.rel (!%p30_p3) target bundleno = 23 (0x17), region = 153 }
 0x64c   :  { %3778 = vsyncpa [#allocation3], 1 }
 0x64d   :  { %3780 = vsyncpa [#allocation3 + $0x1], 1 }

</bundles_post_ra>
